<compile_context>
chip_gen: v5e
topology: v5e:2x2
jax: 0.10.0
libtpu: 0.0.40
codegen_flags: <defaults>
</compile_context>

<pallas_src>
import functools
import math

import jax
import jax.numpy as jnp
from jax.experimental import pallas as pl
from jax.experimental.pallas import tpu as pltpu


# ---------------------------------------------------------------------------
# helpers (in-kernel)
# ---------------------------------------------------------------------------
def _layer_norm(x, gamma, beta, eps=1e-5):
    """PyTorch LayerNorm over the last (lane) dim of a [rows, D] tile."""
    mu = jnp.mean(x, axis=-1, keepdims=True)
    var = jnp.mean((x - mu) ** 2, axis=-1, keepdims=True)
    return (x - mu) * jax.lax.rsqrt(var + eps) * gamma + beta


# ---------------------------------------------------------------------------
# the single fused forward kernel
# ---------------------------------------------------------------------------
def _fused_forward_kernel(*refs, batch, seq, d_model, n_heads, n_layers, n_tables):
    B, S, D = batch, seq, d_model
    SB = B * S
    dh = D // n_heads
    scale = 1.0 / math.sqrt(dh)
    f32 = jnp.float32

    it = iter(refs)
    idx_refs = [next(it) for _ in range(n_tables)]     # int32 [SB,1] per table
    pos_idx_ref = next(it)                             # int32 [SB,1]
    tab_refs = [next(it) for _ in range(n_tables)]     # [V_c, D] folded tables
    pos_emb_ref = next(it)                             # [1+max_seq, D]
    (comb_b_ref, cat_g_ref, cat_b_ref,
     wq_ref, wk_ref, wv_ref, bq_ref, bk_ref, bv_ref, wo_ref, bo_ref,
     hmask_ref, mha_g_ref, mha_b_ref,
     ff_w_ref, ff_b_ref, ff_g_ref, ff_bb_ref,
     wih_ref, whh_ref, lstm_b_ref, fc_w_ref, fc_b_ref,
     out_ref, xg_ref, ys_ref) = tuple(it)

    def onehot_rows(idx_ref, table_ref):
        """Gather rows of `table` by int32 indices as a one-hot MXU matmul."""
        v = table_ref.shape[0]
        lane = jax.lax.broadcasted_iota(jnp.int32, (SB, v), 1)
        onehot = (lane == idx_ref[...]).astype(f32)
        return jnp.dot(onehot, table_ref[...], preferred_element_type=f32)

    # ---- 1) embeddings (folded through comb_proj) + bias + LayerNorm + position
    x = comb_b_ref[...]
    for idx_ref, tab_ref in zip(idx_refs, tab_refs):
        x = x + onehot_rows(idx_ref, tab_ref)
    x = _layer_norm(x, cat_g_ref[...], cat_b_ref[...])
    x = x + onehot_rows(pos_idx_ref, pos_emb_ref)                       # [SB, D]

    # ---- 2) last-query MHA + residual (broadcast over seq) + LayerNorm
    x3 = x.reshape(B, S, D)
    q = jnp.dot(x3[:, S - 1, :], wq_ref[...], preferred_element_type=f32) + bq_ref[...]
    k = jnp.dot(x, wk_ref[...], preferred_element_type=f32) + bk_ref[...]
    v = jnp.dot(x, wv_ref[...], preferred_element_type=f32) + bv_ref[...]
    # lane-dense per-head scores: hmask[d', d] = 1 iff head(d') == head(d)
    qk = q[:, None, :] * k.reshape(B, S, D)                             # [B, S, D]
    s = jnp.dot(qk.reshape(SB, D), hmask_ref[...],
                preferred_element_type=f32) * scale
    s = s.reshape(B, S, D)
    s = s - jnp.max(s, axis=1, keepdims=True)                           # stable softmax
    p = jnp.exp(s)
    p = p * pl.reciprocal(jnp.sum(p, axis=1, keepdims=True), approx=True)
    attn = jnp.sum(p * v.reshape(B, S, D), axis=1)                      # [B, D]
    y = jnp.dot(attn, wo_ref[...], preferred_element_type=f32) + bo_ref[...]
    x = (x3 + y[:, None, :]).reshape(SB, D)                             # residual broadcast
    x = _layer_norm(x, mha_g_ref[...], mha_b_ref[...])

    # ---- 3) feedforward (ReLU -> Linear) + residual + LayerNorm
    y = jnp.dot(jnp.maximum(x, 0.0), ff_w_ref[...],
                preferred_element_type=f32) + ff_b_ref[...]
    x = _layer_norm(x + y, ff_g_ref[...], ff_bb_ref[...])               # [SB, D]

    # ---- 4) LSTM layers, batched over B (time-major rows: row = t*B + b)
    # batch-major -> time-major via static slices + concat (S is small & static)
    x3 = x.reshape(B, S, D)
    x_tm = jnp.concatenate([x3[:, t, :] for t in range(S)], axis=0)     # [S*B, D]

    for layer in range(n_layers):
        seq_in = x_tm if layer == 0 else ys_ref[...]
        # hoisted input-to-hidden matmul for the whole sequence
        xg_ref[...] = jnp.dot(seq_in, wih_ref[layer],
                              preferred_element_type=f32) + lstm_b_ref[layer]
        whh = whh_ref[layer]                                            # [D, 4D]

        def step(t, carry):
            h, c = carry                                                # [B, D] each
            g = xg_ref[pl.ds(t * B, B), :] + jnp.dot(
                h, whh, preferred_element_type=f32)                     # [B, 4D]
            i_g = jax.nn.sigmoid(g[:, 0 * D:1 * D])      # PyTorch gate order: i,f,g,o
            f_g = jax.nn.sigmoid(g[:, 1 * D:2 * D])
            g_g = jnp.tanh(g[:, 2 * D:3 * D])
            o_g = jax.nn.sigmoid(g[:, 3 * D:4 * D])
            c = f_g * c + i_g * g_g
            h = o_g * jnp.tanh(c)
            ys_ref[pl.ds(t * B, B), :] = h
            return h, c

        zeros = jnp.zeros((B, D), f32)
        # S = 8 here -> full unroll; cap the unroll factor if max_seq_len grows large.
        jax.lax.fori_loop(0, S, step, (zeros, zeros), unroll=True)

    # ---- 5) fc head on the LSTM output (VPU lane reduction, no MXU N=1 matmul)
    out_ref[...] = jnp.sum(ys_ref[...] * fc_w_ref[...], axis=-1,
                           keepdims=True) + fc_b_ref[...]


# ---------------------------------------------------------------------------
# parameters
# ---------------------------------------------------------------------------
def init_params(key, cfg):
    d = cfg["D"]
    intd = cfg["intd"]
    e = intd * (len(cfg["cate_cols"]) + 1)
    keys = iter(jax.random.split(key, 64))

    def xavier(shape):
        fan_out, fan_in = shape
        std = math.sqrt(2.0 / (fan_in + fan_out))
        return jax.random.normal(next(keys), shape, jnp.float32) * std

    def linear(shape, fan_in):
        bound = 1.0 / math.sqrt(fan_in)
        return jax.random.uniform(next(keys), shape, jnp.float32, -bound, bound)

    p = {"emb": {}}
    for c in cfg["cate_cols"]:
        p["emb"][c] = xavier((cfg["n_cate"][c] + 1, intd))
    p["emb"]["Interaction"] = xavier((3, intd))

    p["comb_w"] = linear((d, e), e)
    p["comb_b"] = linear((d,), e)
    p["cat_ln_g"] = jnp.ones((d,), jnp.float32)
    p["cat_ln_b"] = jnp.zeros((d,), jnp.float32)

    pos = xavier((1 + cfg["max_seq_len"], d))
    p["pos_emb"] = pos.at[0].set(0.0)                       # padding_idx=0

    p["in_proj_w"] = xavier((3 * d, d))
    p["in_proj_b"] = jnp.zeros((3 * d,), jnp.float32)
    p["out_proj_w"] = linear((d, d), d)
    p["out_proj_b"] = jnp.zeros((d,), jnp.float32)
    p["mha_ln_g"] = jnp.ones((d,), jnp.float32)
    p["mha_ln_b"] = jnp.zeros((d,), jnp.float32)

    p["ff_w"] = linear((d, d), d)
    p["ff_b"] = linear((d,), d)
    p["ff_ln_g"] = jnp.ones((d,), jnp.float32)
    p["ff_ln_b"] = jnp.zeros((d,), jnp.float32)

    p["lstm_wih"], p["lstm_whh"], p["lstm_bih"], p["lstm_bhh"] = [], [], [], []
    for _ in range(cfg["n_layers"]):
        p["lstm_wih"].append(linear((4 * d, d), d))
        p["lstm_whh"].append(linear((4 * d, d), d))
        p["lstm_bih"].append(linear((4 * d,), d))
        p["lstm_bhh"].append(linear((4 * d,), d))

    p["fc_w"] = linear((1, d), d)
    p["fc_b"] = linear((1,), d)
    return p


def prep_pallas_params(p, cfg):
    d = cfg["D"]
    intd = cfg["intd"]
    dh = d // cfg["n_heads"]
    hi = jax.lax.Precision.HIGHEST
    cols = list(cfg["cate_cols"]) + ["Interaction"]

    q = {}
    # fold each embedding table through its comb_proj slice: table @ W[:, chunk].T
    q["m_tables"] = [
        jnp.dot(p["emb"][c], p["comb_w"][:, i * intd:(i + 1) * intd].T, precision=hi)
        for i, c in enumerate(cols)
    ]
    q["pos_emb"] = p["pos_emb"]
    q["comb_b"] = p["comb_b"][None, :]
    q["cat_ln_g"] = p["cat_ln_g"][None, :]
    q["cat_ln_b"] = p["cat_ln_b"][None, :]

    w, b = p["in_proj_w"], p["in_proj_b"]
    q["wq_t"], q["wk_t"], q["wv_t"] = w[:d].T, w[d:2 * d].T, w[2 * d:].T
    q["bq"], q["bk"], q["bv"] = b[:d][None, :], b[d:2 * d][None, :], b[2 * d:][None, :]
    q["wo_t"] = p["out_proj_w"].T
    q["bo"] = p["out_proj_b"][None, :]
    head_ids = jnp.arange(d) // dh
    q["head_mask"] = (head_ids[:, None] == head_ids[None, :]).astype(jnp.float32)
    q["mha_ln_g"] = p["mha_ln_g"][None, :]
    q["mha_ln_b"] = p["mha_ln_b"][None, :]

    q["ff_w_t"] = p["ff_w"].T
    q["ff_b"] = p["ff_b"][None, :]
    q["ff_ln_g"] = p["ff_ln_g"][None, :]
    q["ff_ln_b"] = p["ff_ln_b"][None, :]

    q["lstm_wih_t"] = jnp.stack([w_.T for w_ in p["lstm_wih"]])           # [L, D, 4D]
    q["lstm_whh_t"] = jnp.stack([w_.T for w_ in p["lstm_whh"]])           # [L, D, 4D]
    q["lstm_b"] = jnp.stack(
        [(bi + bh)[None, :] for bi, bh in zip(p["lstm_bih"], p["lstm_bhh"])])  # [L,1,4D]

    q["fc_w"] = p["fc_w"]                                                 # [1, D]
    q["fc_b"] = p["fc_b"][None, :]                                        # [1, 1]
    return q


# ---------------------------------------------------------------------------
# Pallas forward (single fused pallas_call)
# ---------------------------------------------------------------------------
def pallas_forward(pp, inputs, cfg):
    b_, s_ = inputs["Interaction"].shape
    d = cfg["D"]
    cols = list(cfg["cate_cols"]) + ["Interaction"]
    n_tab = len(cols)

    def flat_idx(a):                     # batch-major [B*S, 1] int32
        return a.reshape(b_ * s_, 1).astype(jnp.int32)

    args = (
        *[flat_idx(inputs[c]) for c in cols],
        flat_idx(inputs["Position"]),
        *pp["m_tables"],
        pp["pos_emb"],
        pp["comb_b"], pp["cat_ln_g"], pp["cat_ln_b"],
        pp["wq_t"], pp["wk_t"], pp["wv_t"], pp["bq"], pp["bk"], pp["bv"],
        pp["wo_t"], pp["bo"], pp["head_mask"], pp["mha_ln_g"], pp["mha_ln_b"],
        pp["ff_w_t"], pp["ff_b"], pp["ff_ln_g"], pp["ff_ln_b"],
        pp["lstm_wih_t"], pp["lstm_whh_t"], pp["lstm_b"],
        pp["fc_w"], pp["fc_b"],
    )

    kernel = functools.partial(
        _fused_forward_kernel, batch=b_, seq=s_, d_model=d,
        n_heads=cfg["n_heads"], n_layers=cfg["n_layers"], n_tables=n_tab)

    vmem = pl.BlockSpec(memory_space=pltpu.MemorySpace.VMEM)
    out = pl.pallas_call(
        kernel,
        out_shape=jax.ShapeDtypeStruct((s_ * b_, 1), jnp.float32),
        in_specs=[vmem] * len(args),
        out_specs=vmem,
        scratch_shapes=[
            pltpu.VMEM((s_ * b_, 4 * d), jnp.float32),   # hoisted LSTM gate pre-acts
            pltpu.VMEM((s_ * b_, d), jnp.float32),       # LSTM layer output sequence
        ],
    )(*args)
    # kernel writes time-major rows (row = t*B + b) -> reorder to [B, S]
    return out.reshape(s_, b_).T


# ---------------------------------------------------------------------------
# pure-JAX reference (matches the PyTorch module in eval mode)
# ---------------------------------------------------------------------------
def _ln_ref(x, g, b, eps=1e-5):
    mu = jnp.mean(x, axis=-1, keepdims=True)
    var = jnp.mean((x - mu) ** 2, axis=-1, keepdims=True)
    return (x - mu) / jnp.sqrt(var + eps) * g + b


def _mha_ref(q_in, kv, in_w, in_b, out_w, out_b, n_heads):
    bsz, sq, d = q_in.shape
    s = kv.shape[1]
    dh = d // n_heads
    wq, wk, wv = in_w[:d], in_w[d:2 * d], in_w[2 * d:]
    bq, bk, bv = in_b[:d], in_b[d:2 * d], in_b[2 * d:]
    q = (q_in @ wq.T + bq).reshape(bsz, sq, n_heads, dh).transpose(0, 2, 1, 3)
    k = (kv @ wk.T + bk).reshape(bsz, s, n_heads, dh).transpose(0, 2, 1, 3)
    v = (kv @ wv.T + bv).reshape(bsz, s, n_heads, dh).transpose(0, 2, 1, 3)
    att = jax.nn.softmax((q @ jnp.swapaxes(k, -1, -2)) / math.sqrt(dh), axis=-1)
    y = (att @ v).transpose(0, 2, 1, 3).reshape(bsz, sq, d)
    return y @ out_w.T + out_b


def _lstm_ref(x, wih, whh, bih, bhh):
    bsz = x.shape[0]
    d = whh.shape[1]

    def step(carry, x_t):
        h, c = carry
        g = x_t @ wih.T + bih + h @ whh.T + bhh
        i = jax.nn.sigmoid(g[:, :d])
        f = jax.nn.sigmoid(g[:, d:2 * d])
        gg = jnp.tanh(g[:, 2 * d:3 * d])
        o = jax.nn.sigmoid(g[:, 3 * d:])
        c = f * c + i * gg
        h = o * jnp.tanh(c)
        return (h, c), h

    h0 = jnp.zeros((bsz, d), jnp.float32)
    c0 = jnp.zeros((bsz, d), jnp.float32)
    _, hs = jax.lax.scan(step, (h0, c0), jnp.swapaxes(x, 0, 1))
    return jnp.swapaxes(hs, 0, 1)


def reference_forward(p, inputs, cfg):
    embs = [p["emb"][c][inputs[c]] for c in cfg["cate_cols"]]
    embs.append(p["emb"]["Interaction"][inputs["Interaction"]])
    embed = jnp.concatenate(embs, axis=-1)
    x = embed @ p["comb_w"].T + p["comb_b"]
    x = _ln_ref(x, p["cat_ln_g"], p["cat_ln_b"])
    x = x + p["pos_emb"][inputs["Position"]]
    y = _mha_ref(x[:, -1:, :], x, p["in_proj_w"], p["in_proj_b"],
                 p["out_proj_w"], p["out_proj_b"], cfg["n_heads"])
    x = _ln_ref(x + y, p["mha_ln_g"], p["mha_ln_b"])
    y = jnp.maximum(x, 0.0) @ p["ff_w"].T + p["ff_b"]
    x = _ln_ref(x + y, p["ff_ln_g"], p["ff_ln_b"])
    for layer in range(cfg["n_layers"]):
        x = _lstm_ref(x, p["lstm_wih"][layer], p["lstm_whh"][layer],
                      p["lstm_bih"][layer], p["lstm_bhh"][layer])
    out = x @ p["fc_w"].T + p["fc_b"]
    return out[..., 0]


# ---------------------------------------------------------------------------
# main
# ---------------------------------------------------------------------------
if __name__ == "__main__":
    cfg = {
        "cate_cols": ["assessmentItemID", "testId"],
        "n_cate": {"assessmentItemID": 10, "testId": 6},
        "hidden_dim": 32,
        "intd": 16,          # hidden_dim // 2
        "D": 64,             # 2 * hidden_dim (cont_cols == [] -> hd *= 2)
        "n_heads": 2,
        "n_layers": 2,
        "max_seq_len": 8,
    }
    batch, seq = 2, 8

    key = jax.random.PRNGKey(0)
    k_params, k_a, k_t, k_i = jax.random.split(key, 4)
    params = init_params(k_params, cfg)
    pparams = prep_pallas_params(params, cfg)

    inputs = {
        "assessmentItemID": jax.random.randint(
            k_a, (batch, seq), 0, cfg["n_cate"]["assessmentItemID"] + 1, dtype=jnp.int32),
        "testId": jax.random.randint(
            k_t, (batch, seq), 0, cfg["n_cate"]["testId"] + 1, dtype=jnp.int32),
        "Interaction": jax.random.randint(k_i, (batch, seq), 0, 3, dtype=jnp.int32),
        "Position": jnp.tile(jnp.arange(1, seq + 1, dtype=jnp.int32)[None, :], (batch, 1)),
    }

    out = pallas_forward(pparams, inputs, cfg)
    out = jax.block_until_ready(out)

    with jax.default_matmul_precision("highest"):
        ref = reference_forward(params, inputs, cfg)
    ref = jax.block_until_ready(ref)

    assert out.shape == (batch, seq), out.shape
    # tolerance tightened from 1e-2 -> 5e-3; headroom left for the MXU f32 pass
    # structure and the approximate (EUP) softmax reciprocal.
    assert jnp.allclose(out, ref, atol=5e-3, rtol=5e-3), float(jnp.max(jnp.abs(out - ref)))
    print("KERNEL_OK")
</pallas_src>

<mosaic_0001>
module attributes {stable_mosaic.version = 11 : i64} {
  func.func @_fused_forward_kernel(%arg0: memref<16x1xi32, #tpu.memory_space<vmem>>, %arg1: memref<16x1xi32, #tpu.memory_space<vmem>>, %arg2: memref<16x1xi32, #tpu.memory_space<vmem>>, %arg3: memref<16x1xi32, #tpu.memory_space<vmem>>, %arg4: memref<11x64xf32, #tpu.memory_space<vmem>>, %arg5: memref<7x64xf32, #tpu.memory_space<vmem>>, %arg6: memref<3x64xf32, #tpu.memory_space<vmem>>, %arg7: memref<9x64xf32, #tpu.memory_space<vmem>>, %arg8: memref<1x64xf32, #tpu.memory_space<vmem>>, %arg9: memref<1x64xf32, #tpu.memory_space<vmem>>, %arg10: memref<1x64xf32, #tpu.memory_space<vmem>>, %arg11: memref<64x64xf32, #tpu.memory_space<vmem>>, %arg12: memref<64x64xf32, #tpu.memory_space<vmem>>, %arg13: memref<64x64xf32, #tpu.memory_space<vmem>>, %arg14: memref<1x64xf32, #tpu.memory_space<vmem>>, %arg15: memref<1x64xf32, #tpu.memory_space<vmem>>, %arg16: memref<1x64xf32, #tpu.memory_space<vmem>>, %arg17: memref<64x64xf32, #tpu.memory_space<vmem>>, %arg18: memref<1x64xf32, #tpu.memory_space<vmem>>, %arg19: memref<64x64xf32, #tpu.memory_space<vmem>>, %arg20: memref<1x64xf32, #tpu.memory_space<vmem>>, %arg21: memref<1x64xf32, #tpu.memory_space<vmem>>, %arg22: memref<64x64xf32, #tpu.memory_space<vmem>>, %arg23: memref<1x64xf32, #tpu.memory_space<vmem>>, %arg24: memref<1x64xf32, #tpu.memory_space<vmem>>, %arg25: memref<1x64xf32, #tpu.memory_space<vmem>>, %arg26: memref<2x64x256xf32, #tpu.memory_space<vmem>>, %arg27: memref<2x64x256xf32, #tpu.memory_space<vmem>>, %arg28: memref<2x1x256xf32, #tpu.memory_space<vmem>>, %arg29: memref<1x64xf32, #tpu.memory_space<vmem>>, %arg30: memref<1x1xf32, #tpu.memory_space<vmem>>, %arg31: memref<16x1xf32, #tpu.memory_space<vmem>>, %arg32: memref<16x256xf32, #tpu.memory_space<vmem>>, %arg33: memref<16x64xf32, #tpu.memory_space<vmem>>) attributes {dimension_semantics = [], scalar_prefetch = 0 : i64, scratch_operands = 2 : i64, tpu.core_type = #tpu.core_type<tc>} {
    %c0 = arith.constant 0 : index
    %c0_0 = arith.constant 0 : index
    %0 = vector.load %arg8[%c0, %c0_0] : memref<1x64xf32, #tpu.memory_space<vmem>>, vector<1x64xf32>
    %1 = tpu.iota {dimensions = array<i32: 1>} : vector<16x11xi32>
    %c0_1 = arith.constant 0 : index
    %c0_2 = arith.constant 0 : index
    %2 = vector.load %arg0[%c0_1, %c0_2] : memref<16x1xi32, #tpu.memory_space<vmem>>, vector<16x1xi32>
    %3 = vector.broadcast %2 : vector<16x1xi32> to vector<16x11xi32>
    %4 = arith.cmpi eq, %1, %3 : vector<16x11xi32>
    %5 = arith.extui %4 : vector<16x11xi1> to vector<16x11xi32>
    %6 = arith.sitofp %5 : vector<16x11xi32> to vector<16x11xf32>
    %c0_3 = arith.constant 0 : index
    %c0_4 = arith.constant 0 : index
    %7 = vector.load %arg4[%c0_3, %c0_4] : memref<11x64xf32, #tpu.memory_space<vmem>>, vector<11x64xf32>
    %cst = arith.constant dense<0.000000e+00> : vector<16x64xf32>
    %8 = tpu.matmul %6, %7, %cst {dimension_numbers = #tpu.dot_dimension_numbers<[1], [0], [0], [1], [0, 0, 1, 1], [], []>} : vector<16x11xf32>, vector<11x64xf32>, vector<16x64xf32> -> vector<16x64xf32>
    %9 = vector.broadcast %0 : vector<1x64xf32> to vector<16x64xf32>
    %10 = arith.addf %9, %8 : vector<16x64xf32>
    %11 = tpu.iota {dimensions = array<i32: 1>} : vector<16x7xi32>
    %c0_5 = arith.constant 0 : index
    %c0_6 = arith.constant 0 : index
    %12 = vector.load %arg1[%c0_5, %c0_6] : memref<16x1xi32, #tpu.memory_space<vmem>>, vector<16x1xi32>
    %13 = vector.broadcast %12 : vector<16x1xi32> to vector<16x7xi32>
    %14 = arith.cmpi eq, %11, %13 : vector<16x7xi32>
    %15 = arith.extui %14 : vector<16x7xi1> to vector<16x7xi32>
    %16 = arith.sitofp %15 : vector<16x7xi32> to vector<16x7xf32>
    %c0_7 = arith.constant 0 : index
    %c0_8 = arith.constant 0 : index
    %17 = vector.load %arg5[%c0_7, %c0_8] : memref<7x64xf32, #tpu.memory_space<vmem>>, vector<7x64xf32>
    %cst_9 = arith.constant dense<0.000000e+00> : vector<16x64xf32>
    %18 = tpu.matmul %16, %17, %cst_9 {dimension_numbers = #tpu.dot_dimension_numbers<[1], [0], [0], [1], [0, 0, 1, 1], [], []>} : vector<16x7xf32>, vector<7x64xf32>, vector<16x64xf32> -> vector<16x64xf32>
    %19 = arith.addf %10, %18 : vector<16x64xf32>
    %20 = tpu.iota {dimensions = array<i32: 1>} : vector<16x3xi32>
    %c0_10 = arith.constant 0 : index
    %c0_11 = arith.constant 0 : index
    %21 = vector.load %arg2[%c0_10, %c0_11] : memref<16x1xi32, #tpu.memory_space<vmem>>, vector<16x1xi32>
    %22 = vector.broadcast %21 : vector<16x1xi32> to vector<16x3xi32>
    %23 = arith.cmpi eq, %20, %22 : vector<16x3xi32>
    %24 = arith.extui %23 : vector<16x3xi1> to vector<16x3xi32>
    %25 = arith.sitofp %24 : vector<16x3xi32> to vector<16x3xf32>
    %c0_12 = arith.constant 0 : index
    %c0_13 = arith.constant 0 : index
    %26 = vector.load %arg6[%c0_12, %c0_13] : memref<3x64xf32, #tpu.memory_space<vmem>>, vector<3x64xf32>
    %cst_14 = arith.constant dense<0.000000e+00> : vector<16x64xf32>
    %27 = tpu.matmul %25, %26, %cst_14 {dimension_numbers = #tpu.dot_dimension_numbers<[1], [0], [0], [1], [0, 0, 1, 1], [], []>} : vector<16x3xf32>, vector<3x64xf32>, vector<16x64xf32> -> vector<16x64xf32>
    %28 = arith.addf %19, %27 : vector<16x64xf32>
    %c0_15 = arith.constant 0 : index
    %c0_16 = arith.constant 0 : index
    %29 = vector.load %arg9[%c0_15, %c0_16] : memref<1x64xf32, #tpu.memory_space<vmem>>, vector<1x64xf32>
    %c0_17 = arith.constant 0 : index
    %c0_18 = arith.constant 0 : index
    %30 = vector.load %arg10[%c0_17, %c0_18] : memref<1x64xf32, #tpu.memory_space<vmem>>, vector<1x64xf32>
    %cst_19 = arith.constant dense<0.000000e+00> : vector<16xf32>
    %31 = vector.multi_reduction <add>, %28, %cst_19 [1] : vector<16x64xf32> to vector<16xf32>
    %32 = vector.shape_cast %31 : vector<16xf32> to vector<16x1xf32>
    %cst_20 = arith.constant 6.400000e+01 : f32
    %33 = vector.broadcast %cst_20 : f32 to vector<16x1xf32>
    %34 = arith.divf %32, %33 : vector<16x1xf32>
    %35 = vector.broadcast %34 : vector<16x1xf32> to vector<16x64xf32>
    %36 = arith.subf %28, %35 : vector<16x64xf32>
    %37 = arith.mulf %36, %36 : vector<16x64xf32>
    %cst_21 = arith.constant dense<0.000000e+00> : vector<16xf32>
    %38 = vector.multi_reduction <add>, %37, %cst_21 [1] : vector<16x64xf32> to vector<16xf32>
    %39 = vector.shape_cast %38 : vector<16xf32> to vector<16x1xf32>
    %cst_22 = arith.constant 6.400000e+01 : f32
    %40 = vector.broadcast %cst_22 : f32 to vector<16x1xf32>
    %41 = arith.divf %39, %40 : vector<16x1xf32>
    %42 = vector.broadcast %34 : vector<16x1xf32> to vector<16x64xf32>
    %43 = arith.subf %28, %42 : vector<16x64xf32>
    %cst_23 = arith.constant 9.99999974E-6 : f32
    %44 = vector.broadcast %cst_23 : f32 to vector<16x1xf32>
    %45 = arith.addf %41, %44 : vector<16x1xf32>
    %46 = math.rsqrt %45 : vector<16x1xf32>
    %47 = vector.broadcast %46 : vector<16x1xf32> to vector<16x64xf32>
    %48 = arith.mulf %43, %47 : vector<16x64xf32>
    %49 = vector.broadcast %29 : vector<1x64xf32> to vector<16x64xf32>
    %50 = arith.mulf %48, %49 : vector<16x64xf32>
    %51 = vector.broadcast %30 : vector<1x64xf32> to vector<16x64xf32>
    %52 = arith.addf %50, %51 : vector<16x64xf32>
    %53 = tpu.iota {dimensions = array<i32: 1>} : vector<16x9xi32>
    %c0_24 = arith.constant 0 : index
    %c0_25 = arith.constant 0 : index
    %54 = vector.load %arg3[%c0_24, %c0_25] : memref<16x1xi32, #tpu.memory_space<vmem>>, vector<16x1xi32>
    %55 = vector.broadcast %54 : vector<16x1xi32> to vector<16x9xi32>
    %56 = arith.cmpi eq, %53, %55 : vector<16x9xi32>
    %57 = arith.extui %56 : vector<16x9xi1> to vector<16x9xi32>
    %58 = arith.sitofp %57 : vector<16x9xi32> to vector<16x9xf32>
    %c0_26 = arith.constant 0 : index
    %c0_27 = arith.constant 0 : index
    %59 = vector.load %arg7[%c0_26, %c0_27] : memref<9x64xf32, #tpu.memory_space<vmem>>, vector<9x64xf32>
    %cst_28 = arith.constant dense<0.000000e+00> : vector<16x64xf32>
    %60 = tpu.matmul %58, %59, %cst_28 {dimension_numbers = #tpu.dot_dimension_numbers<[1], [0], [0], [1], [0, 0, 1, 1], [], []>} : vector<16x9xf32>, vector<9x64xf32>, vector<16x64xf32> -> vector<16x64xf32>
    %61 = arith.addf %52, %60 : vector<16x64xf32>
    %62 = vector.shape_cast %61 : vector<16x64xf32> to vector<2x8x64xf32>
    %63 = vector.extract_strided_slice %62 {offsets = [0, 7, 0], sizes = [2, 1, 64], strides = [1, 1, 1]} : vector<2x8x64xf32> to vector<2x1x64xf32>
    %64 = vector.shape_cast %63 : vector<2x1x64xf32> to vector<2x64xf32>
    %c0_29 = arith.constant 0 : index
    %c0_30 = arith.constant 0 : index
    %65 = vector.load %arg11[%c0_29, %c0_30] : memref<64x64xf32, #tpu.memory_space<vmem>>, vector<64x64xf32>
    %cst_31 = arith.constant dense<0.000000e+00> : vector<2x64xf32>
    %66 = tpu.matmul %64, %65, %cst_31 {dimension_numbers = #tpu.dot_dimension_numbers<[1], [0], [0], [1], [0, 0, 1, 1], [], []>} : vector<2x64xf32>, vector<64x64xf32>, vector<2x64xf32> -> vector<2x64xf32>
    %c0_32 = arith.constant 0 : index
    %c0_33 = arith.constant 0 : index
    %67 = vector.load %arg14[%c0_32, %c0_33] : memref<1x64xf32, #tpu.memory_space<vmem>>, vector<1x64xf32>
    %68 = vector.broadcast %67 : vector<1x64xf32> to vector<2x64xf32>
    %69 = arith.addf %66, %68 : vector<2x64xf32>
    %c0_34 = arith.constant 0 : index
    %c0_35 = arith.constant 0 : index
    %70 = vector.load %arg12[%c0_34, %c0_35] : memref<64x64xf32, #tpu.memory_space<vmem>>, vector<64x64xf32>
    %cst_36 = arith.constant dense<0.000000e+00> : vector<16x64xf32>
    %71 = tpu.matmul %61, %70, %cst_36 {dimension_numbers = #tpu.dot_dimension_numbers<[1], [0], [0], [1], [0, 0, 1, 1], [], []>} : vector<16x64xf32>, vector<64x64xf32>, vector<16x64xf32> -> vector<16x64xf32>
    %c0_37 = arith.constant 0 : index
    %c0_38 = arith.constant 0 : index
    %72 = vector.load %arg15[%c0_37, %c0_38] : memref<1x64xf32, #tpu.memory_space<vmem>>, vector<1x64xf32>
    %73 = vector.broadcast %72 : vector<1x64xf32> to vector<16x64xf32>
    %74 = arith.addf %71, %73 : vector<16x64xf32>
    %c0_39 = arith.constant 0 : index
    %c0_40 = arith.constant 0 : index
    %75 = vector.load %arg13[%c0_39, %c0_40] : memref<64x64xf32, #tpu.memory_space<vmem>>, vector<64x64xf32>
    %cst_41 = arith.constant dense<0.000000e+00> : vector<16x64xf32>
    %76 = tpu.matmul %61, %75, %cst_41 {dimension_numbers = #tpu.dot_dimension_numbers<[1], [0], [0], [1], [0, 0, 1, 1], [], []>} : vector<16x64xf32>, vector<64x64xf32>, vector<16x64xf32> -> vector<16x64xf32>
    %c0_42 = arith.constant 0 : index
    %c0_43 = arith.constant 0 : index
    %77 = vector.load %arg16[%c0_42, %c0_43] : memref<1x64xf32, #tpu.memory_space<vmem>>, vector<1x64xf32>
    %78 = vector.broadcast %77 : vector<1x64xf32> to vector<16x64xf32>
    %79 = arith.addf %76, %78 : vector<16x64xf32>
    %80 = vector.shape_cast %69 : vector<2x64xf32> to vector<2x1x64xf32>
    %81 = vector.shape_cast %74 : vector<16x64xf32> to vector<2x8x64xf32>
    %82 = vector.broadcast %80 : vector<2x1x64xf32> to vector<2x8x64xf32>
    %83 = arith.mulf %82, %81 : vector<2x8x64xf32>
    %84 = vector.shape_cast %83 : vector<2x8x64xf32> to vector<16x64xf32>
    %c0_44 = arith.constant 0 : index
    %c0_45 = arith.constant 0 : index
    %85 = vector.load %arg19[%c0_44, %c0_45] : memref<64x64xf32, #tpu.memory_space<vmem>>, vector<64x64xf32>
    %cst_46 = arith.constant dense<0.000000e+00> : vector<16x64xf32>
    %86 = tpu.matmul %84, %85, %cst_46 {dimension_numbers = #tpu.dot_dimension_numbers<[1], [0], [0], [1], [0, 0, 1, 1], [], []>} : vector<16x64xf32>, vector<64x64xf32>, vector<16x64xf32> -> vector<16x64xf32>
    %cst_47 = arith.constant 0.176776692 : f32
    %87 = vector.broadcast %cst_47 : f32 to vector<16x64xf32>
    %88 = arith.mulf %86, %87 : vector<16x64xf32>
    %89 = vector.shape_cast %88 : vector<16x64xf32> to vector<2x8x64xf32>
    %cst_48 = arith.constant dense<0xFF800000> : vector<2x64xf32>
    %90 = vector.multi_reduction <maximumf>, %89, %cst_48 [1] : vector<2x8x64xf32> to vector<2x64xf32>
    %91 = vector.shape_cast %90 : vector<2x64xf32> to vector<2x1x64xf32>
    %92 = vector.broadcast %91 : vector<2x1x64xf32> to vector<2x8x64xf32>
    %93 = arith.subf %89, %92 : vector<2x8x64xf32>
    %94 = math.exp %93 : vector<2x8x64xf32>
    %cst_49 = arith.constant dense<0.000000e+00> : vector<2x64xf32>
    %95 = vector.multi_reduction <add>, %94, %cst_49 [1] : vector<2x8x64xf32> to vector<2x64xf32>
    %96 = vector.shape_cast %95 : vector<2x64xf32> to vector<2x1x64xf32>
    %97 = tpu.reciprocal %96 {approx = true} : vector<2x1x64xf32> -> vector<2x1x64xf32>
    %98 = vector.broadcast %97 : vector<2x1x64xf32> to vector<2x8x64xf32>
    %99 = arith.mulf %94, %98 : vector<2x8x64xf32>
    %100 = vector.shape_cast %79 : vector<16x64xf32> to vector<2x8x64xf32>
    %101 = arith.mulf %99, %100 : vector<2x8x64xf32>
    %cst_50 = arith.constant dense<0.000000e+00> : vector<2x64xf32>
    %102 = vector.multi_reduction <add>, %101, %cst_50 [1] : vector<2x8x64xf32> to vector<2x64xf32>
    %c0_51 = arith.constant 0 : index
    %c0_52 = arith.constant 0 : index
    %103 = vector.load %arg17[%c0_51, %c0_52] : memref<64x64xf32, #tpu.memory_space<vmem>>, vector<64x64xf32>
    %cst_53 = arith.constant dense<0.000000e+00> : vector<2x64xf32>
    %104 = tpu.matmul %102, %103, %cst_53 {dimension_numbers = #tpu.dot_dimension_numbers<[1], [0], [0], [1], [0, 0, 1, 1], [], []>} : vector<2x64xf32>, vector<64x64xf32>, vector<2x64xf32> -> vector<2x64xf32>
    %c0_54 = arith.constant 0 : index
    %c0_55 = arith.constant 0 : index
    %105 = vector.load %arg18[%c0_54, %c0_55] : memref<1x64xf32, #tpu.memory_space<vmem>>, vector<1x64xf32>
    %106 = vector.broadcast %105 : vector<1x64xf32> to vector<2x64xf32>
    %107 = arith.addf %104, %106 : vector<2x64xf32>
    %108 = vector.shape_cast %107 : vector<2x64xf32> to vector<2x1x64xf32>
    %109 = vector.broadcast %108 : vector<2x1x64xf32> to vector<2x8x64xf32>
    %110 = arith.addf %62, %109 : vector<2x8x64xf32>
    %111 = vector.shape_cast %110 : vector<2x8x64xf32> to vector<16x64xf32>
    %c0_56 = arith.constant 0 : index
    %c0_57 = arith.constant 0 : index
    %112 = vector.load %arg20[%c0_56, %c0_57] : memref<1x64xf32, #tpu.memory_space<vmem>>, vector<1x64xf32>
    %c0_58 = arith.constant 0 : index
    %c0_59 = arith.constant 0 : index
    %113 = vector.load %arg21[%c0_58, %c0_59] : memref<1x64xf32, #tpu.memory_space<vmem>>, vector<1x64xf32>
    %cst_60 = arith.constant dense<0.000000e+00> : vector<16xf32>
    %114 = vector.multi_reduction <add>, %111, %cst_60 [1] : vector<16x64xf32> to vector<16xf32>
    %115 = vector.shape_cast %114 : vector<16xf32> to vector<16x1xf32>
    %cst_61 = arith.constant 6.400000e+01 : f32
    %116 = vector.broadcast %cst_61 : f32 to vector<16x1xf32>
    %117 = arith.divf %115, %116 : vector<16x1xf32>
    %118 = vector.broadcast %117 : vector<16x1xf32> to vector<16x64xf32>
    %119 = arith.subf %111, %118 : vector<16x64xf32>
    %120 = arith.mulf %119, %119 : vector<16x64xf32>
    %cst_62 = arith.constant dense<0.000000e+00> : vector<16xf32>
    %121 = vector.multi_reduction <add>, %120, %cst_62 [1] : vector<16x64xf32> to vector<16xf32>
    %122 = vector.shape_cast %121 : vector<16xf32> to vector<16x1xf32>
    %cst_63 = arith.constant 6.400000e+01 : f32
    %123 = vector.broadcast %cst_63 : f32 to vector<16x1xf32>
    %124 = arith.divf %122, %123 : vector<16x1xf32>
    %125 = vector.broadcast %117 : vector<16x1xf32> to vector<16x64xf32>
    %126 = arith.subf %111, %125 : vector<16x64xf32>
    %cst_64 = arith.constant 9.99999974E-6 : f32
    %127 = vector.broadcast %cst_64 : f32 to vector<16x1xf32>
    %128 = arith.addf %124, %127 : vector<16x1xf32>
    %129 = math.rsqrt %128 : vector<16x1xf32>
    %130 = vector.broadcast %129 : vector<16x1xf32> to vector<16x64xf32>
    %131 = arith.mulf %126, %130 : vector<16x64xf32>
    %132 = vector.broadcast %112 : vector<1x64xf32> to vector<16x64xf32>
    %133 = arith.mulf %131, %132 : vector<16x64xf32>
    %134 = vector.broadcast %113 : vector<1x64xf32> to vector<16x64xf32>
    %135 = arith.addf %133, %134 : vector<16x64xf32>
    %cst_65 = arith.constant 0.000000e+00 : f32
    %136 = vector.broadcast %cst_65 : f32 to vector<16x64xf32>
    %137 = arith.maximumf %135, %136 : vector<16x64xf32>
    %c0_66 = arith.constant 0 : index
    %c0_67 = arith.constant 0 : index
    %138 = vector.load %arg22[%c0_66, %c0_67] : memref<64x64xf32, #tpu.memory_space<vmem>>, vector<64x64xf32>
    %cst_68 = arith.constant dense<0.000000e+00> : vector<16x64xf32>
    %139 = tpu.matmul %137, %138, %cst_68 {dimension_numbers = #tpu.dot_dimension_numbers<[1], [0], [0], [1], [0, 0, 1, 1], [], []>} : vector<16x64xf32>, vector<64x64xf32>, vector<16x64xf32> -> vector<16x64xf32>
    %c0_69 = arith.constant 0 : index
    %c0_70 = arith.constant 0 : index
    %140 = vector.load %arg23[%c0_69, %c0_70] : memref<1x64xf32, #tpu.memory_space<vmem>>, vector<1x64xf32>
    %141 = vector.broadcast %140 : vector<1x64xf32> to vector<16x64xf32>
    %142 = arith.addf %139, %141 : vector<16x64xf32>
    %143 = arith.addf %135, %142 : vector<16x64xf32>
    %c0_71 = arith.constant 0 : index
    %c0_72 = arith.constant 0 : index
    %144 = vector.load %arg24[%c0_71, %c0_72] : memref<1x64xf32, #tpu.memory_space<vmem>>, vector<1x64xf32>
    %c0_73 = arith.constant 0 : index
    %c0_74 = arith.constant 0 : index
    %145 = vector.load %arg25[%c0_73, %c0_74] : memref<1x64xf32, #tpu.memory_space<vmem>>, vector<1x64xf32>
    %cst_75 = arith.constant dense<0.000000e+00> : vector<16xf32>
    %146 = vector.multi_reduction <add>, %143, %cst_75 [1] : vector<16x64xf32> to vector<16xf32>
    %147 = vector.shape_cast %146 : vector<16xf32> to vector<16x1xf32>
    %cst_76 = arith.constant 6.400000e+01 : f32
    %148 = vector.broadcast %cst_76 : f32 to vector<16x1xf32>
    %149 = arith.divf %147, %148 : vector<16x1xf32>
    %150 = vector.broadcast %149 : vector<16x1xf32> to vector<16x64xf32>
    %151 = arith.subf %143, %150 : vector<16x64xf32>
    %152 = arith.mulf %151, %151 : vector<16x64xf32>
    %cst_77 = arith.constant dense<0.000000e+00> : vector<16xf32>
    %153 = vector.multi_reduction <add>, %152, %cst_77 [1] : vector<16x64xf32> to vector<16xf32>
    %154 = vector.shape_cast %153 : vector<16xf32> to vector<16x1xf32>
    %cst_78 = arith.constant 6.400000e+01 : f32
    %155 = vector.broadcast %cst_78 : f32 to vector<16x1xf32>
    %156 = arith.divf %154, %155 : vector<16x1xf32>
    %157 = vector.broadcast %149 : vector<16x1xf32> to vector<16x64xf32>
    %158 = arith.subf %143, %157 : vector<16x64xf32>
    %cst_79 = arith.constant 9.99999974E-6 : f32
    %159 = vector.broadcast %cst_79 : f32 to vector<16x1xf32>
    %160 = arith.addf %156, %159 : vector<16x1xf32>
    %161 = math.rsqrt %160 : vector<16x1xf32>
    %162 = vector.broadcast %161 : vector<16x1xf32> to vector<16x64xf32>
    %163 = arith.mulf %158, %162 : vector<16x64xf32>
    %164 = vector.broadcast %144 : vector<1x64xf32> to vector<16x64xf32>
    %165 = arith.mulf %163, %164 : vector<16x64xf32>
    %166 = vector.broadcast %145 : vector<1x64xf32> to vector<16x64xf32>
    %167 = arith.addf %165, %166 : vector<16x64xf32>
    %168 = vector.shape_cast %167 : vector<16x64xf32> to vector<2x8x64xf32>
    %169 = vector.extract_strided_slice %168 {offsets = [0, 0, 0], sizes = [2, 1, 64], strides = [1, 1, 1]} : vector<2x8x64xf32> to vector<2x1x64xf32>
    %170 = vector.shape_cast %169 : vector<2x1x64xf32> to vector<2x64xf32>
    %171 = vector.extract_strided_slice %168 {offsets = [0, 1, 0], sizes = [2, 1, 64], strides = [1, 1, 1]} : vector<2x8x64xf32> to vector<2x1x64xf32>
    %172 = vector.shape_cast %171 : vector<2x1x64xf32> to vector<2x64xf32>
    %173 = vector.extract_strided_slice %168 {offsets = [0, 2, 0], sizes = [2, 1, 64], strides = [1, 1, 1]} : vector<2x8x64xf32> to vector<2x1x64xf32>
    %174 = vector.shape_cast %173 : vector<2x1x64xf32> to vector<2x64xf32>
    %175 = vector.extract_strided_slice %168 {offsets = [0, 3, 0], sizes = [2, 1, 64], strides = [1, 1, 1]} : vector<2x8x64xf32> to vector<2x1x64xf32>
    %176 = vector.shape_cast %175 : vector<2x1x64xf32> to vector<2x64xf32>
    %177 = vector.extract_strided_slice %168 {offsets = [0, 4, 0], sizes = [2, 1, 64], strides = [1, 1, 1]} : vector<2x8x64xf32> to vector<2x1x64xf32>
    %178 = vector.shape_cast %177 : vector<2x1x64xf32> to vector<2x64xf32>
    %179 = vector.extract_strided_slice %168 {offsets = [0, 5, 0], sizes = [2, 1, 64], strides = [1, 1, 1]} : vector<2x8x64xf32> to vector<2x1x64xf32>
    %180 = vector.shape_cast %179 : vector<2x1x64xf32> to vector<2x64xf32>
    %181 = vector.extract_strided_slice %168 {offsets = [0, 6, 0], sizes = [2, 1, 64], strides = [1, 1, 1]} : vector<2x8x64xf32> to vector<2x1x64xf32>
    %182 = vector.shape_cast %181 : vector<2x1x64xf32> to vector<2x64xf32>
    %183 = vector.extract_strided_slice %168 {offsets = [0, 7, 0], sizes = [2, 1, 64], strides = [1, 1, 1]} : vector<2x8x64xf32> to vector<2x1x64xf32>
    %184 = vector.shape_cast %183 : vector<2x1x64xf32> to vector<2x64xf32>
    %185 = tpu.concatenate %170, %172, %174, %176, %178, %180, %182, %184 in 0 : vector<2x64xf32>, vector<2x64xf32>, vector<2x64xf32>, vector<2x64xf32>, vector<2x64xf32>, vector<2x64xf32>, vector<2x64xf32>, vector<2x64xf32> -> vector<16x64xf32>
    %c0_80 = arith.constant 0 : index
    %c0_81 = arith.constant 0 : index
    %c0_82 = arith.constant 0 : index
    %186 = vector.load %arg26[%c0_80, %c0_81, %c0_82] : memref<2x64x256xf32, #tpu.memory_space<vmem>>, vector<1x64x256xf32>
    %187 = vector.shape_cast %186 : vector<1x64x256xf32> to vector<64x256xf32>
    %cst_83 = arith.constant dense<0.000000e+00> : vector<16x256xf32>
    %188 = tpu.matmul %185, %187, %cst_83 {dimension_numbers = #tpu.dot_dimension_numbers<[1], [0], [0], [1], [0, 0, 1, 1], [], []>} : vector<16x64xf32>, vector<64x256xf32>, vector<16x256xf32> -> vector<16x256xf32>
    %c0_84 = arith.constant 0 : index
    %c0_85 = arith.constant 0 : index
    %c0_86 = arith.constant 0 : index
    %189 = vector.load %arg28[%c0_84, %c0_85, %c0_86] : memref<2x1x256xf32, #tpu.memory_space<vmem>>, vector<1x1x256xf32>
    %190 = vector.shape_cast %189 : vector<1x1x256xf32> to vector<1x256xf32>
    %191 = vector.broadcast %190 : vector<1x256xf32> to vector<16x256xf32>
    %192 = arith.addf %188, %191 : vector<16x256xf32>
    %c0_87 = arith.constant 0 : index
    %c0_88 = arith.constant 0 : index
    %193 = vector.load %arg32[%c0_87, %c0_88] : memref<16x256xf32, #tpu.memory_space<vmem>>, vector<16x256xf32>
    tpu.vector_store %arg32[%c0_87, %c0_88], %192 {strides = array<i32>} : memref<16x256xf32, #tpu.memory_space<vmem>>, vector<16x256xf32>,
    %c0_89 = arith.constant 0 : index
    %c0_90 = arith.constant 0 : index
    %c0_91 = arith.constant 0 : index
    %194 = vector.load %arg27[%c0_89, %c0_90, %c0_91] : memref<2x64x256xf32, #tpu.memory_space<vmem>>, vector<1x64x256xf32>
    %195 = vector.shape_cast %194 : vector<1x64x256xf32> to vector<64x256xf32>
    %cst_92 = arith.constant 0.000000e+00 : f32
    %196 = vector.broadcast %cst_92 : f32 to vector<2x64xf32>
    %c0_i32 = arith.constant 0 : i32
    %c2_i32 = arith.constant 2 : i32
    %197 = arith.muli %c0_i32, %c2_i32 : i32
    %198 = arith.index_cast %197 : i32 to index
    %c0_93 = arith.constant 0 : index
    %199 = vector.load %arg32[%198, %c0_93] : memref<16x256xf32, #tpu.memory_space<vmem>>, vector<2x256xf32>
    %cst_94 = arith.constant dense<0.000000e+00> : vector<2x256xf32>
    %200 = tpu.matmul %196, %195, %cst_94 {dimension_numbers = #tpu.dot_dimension_numbers<[1], [0], [0], [1], [0, 0, 1, 1], [], []>} : vector<2x64xf32>, vector<64x256xf32>, vector<2x256xf32> -> vector<2x256xf32>
    %201 = arith.addf %199, %200 : vector<2x256xf32>
    %202 = vector.extract_strided_slice %201 {offsets = [0, 0], sizes = [2, 64], strides = [1, 1]} : vector<2x256xf32> to vector<2x64xf32>
    %203 = arith.negf %202 : vector<2x64xf32>
    %204 = math.exp %203 : vector<2x64xf32>
    %cst_95 = arith.constant 1.000000e+00 : f32
    %205 = vector.broadcast %cst_95 : f32 to vector<2x64xf32>
    %206 = arith.addf %205, %204 : vector<2x64xf32>
    %207 = arith.divf %205, %206 : vector<2x64xf32>
    %208 = vector.extract_strided_slice %201 {offsets = [0, 64], sizes = [2, 64], strides = [1, 1]} : vector<2x256xf32> to vector<2x64xf32>
    %209 = arith.negf %208 : vector<2x64xf32>
    %210 = math.exp %209 : vector<2x64xf32>
    %cst_96 = arith.constant 1.000000e+00 : f32
    %211 = vector.broadcast %cst_96 : f32 to vector<2x64xf32>
    %212 = arith.addf %211, %210 : vector<2x64xf32>
    %213 = arith.divf %211, %212 : vector<2x64xf32>
    %214 = vector.extract_strided_slice %201 {offsets = [0, 128], sizes = [2, 64], strides = [1, 1]} : vector<2x256xf32> to vector<2x64xf32>
    %215 = math.tanh %214 : vector<2x64xf32>
    %216 = vector.extract_strided_slice %201 {offsets = [0, 192], sizes = [2, 64], strides = [1, 1]} : vector<2x256xf32> to vector<2x64xf32>
    %217 = arith.negf %216 : vector<2x64xf32>
    %218 = math.exp %217 : vector<2x64xf32>
    %cst_97 = arith.constant 1.000000e+00 : f32
    %219 = vector.broadcast %cst_97 : f32 to vector<2x64xf32>
    %220 = arith.addf %219, %218 : vector<2x64xf32>
    %221 = arith.divf %219, %220 : vector<2x64xf32>
    %222 = arith.mulf %213, %196 : vector<2x64xf32>
    %223 = arith.mulf %207, %215 : vector<2x64xf32>
    %224 = arith.addf %222, %223 : vector<2x64xf32>
    %225 = math.tanh %224 : vector<2x64xf32>
    %226 = arith.mulf %221, %225 : vector<2x64xf32>
    %c2_i32_98 = arith.constant 2 : i32
    %227 = arith.muli %c0_i32, %c2_i32_98 : i32
    %228 = arith.index_cast %227 : i32 to index
    %c0_99 = arith.constant 0 : index
    %229 = vector.load %arg33[%228, %c0_99] : memref<16x64xf32, #tpu.memory_space<vmem>>, vector<2x64xf32>
    tpu.vector_store %arg33[%228, %c0_99], %226 {strides = array<i32>} : memref<16x64xf32, #tpu.memory_space<vmem>>, vector<2x64xf32>,
    %c1_i32 = arith.constant 1 : i32
    %c2_i32_100 = arith.constant 2 : i32
    %230 = arith.muli %c1_i32, %c2_i32_100 : i32
    %231 = arith.index_cast %230 : i32 to index
    %c0_101 = arith.constant 0 : index
    %232 = vector.load %arg32[%231, %c0_101] : memref<16x256xf32, #tpu.memory_space<vmem>>, vector<2x256xf32>
    %cst_102 = arith.constant dense<0.000000e+00> : vector<2x256xf32>
    %233 = tpu.matmul %226, %195, %cst_102 {dimension_numbers = #tpu.dot_dimension_numbers<[1], [0], [0], [1], [0, 0, 1, 1], [], []>} : vector<2x64xf32>, vector<64x256xf32>, vector<2x256xf32> -> vector<2x256xf32>
    %234 = arith.addf %232, %233 : vector<2x256xf32>
    %235 = vector.extract_strided_slice %234 {offsets = [0, 0], sizes = [2, 64], strides = [1, 1]} : vector<2x256xf32> to vector<2x64xf32>
    %236 = arith.negf %235 : vector<2x64xf32>
    %237 = math.exp %236 : vector<2x64xf32>
    %cst_103 = arith.constant 1.000000e+00 : f32
    %238 = vector.broadcast %cst_103 : f32 to vector<2x64xf32>
    %239 = arith.addf %238, %237 : vector<2x64xf32>
    %240 = arith.divf %238, %239 : vector<2x64xf32>
    %241 = vector.extract_strided_slice %234 {offsets = [0, 64], sizes = [2, 64], strides = [1, 1]} : vector<2x256xf32> to vector<2x64xf32>
    %242 = arith.negf %241 : vector<2x64xf32>
    %243 = math.exp %242 : vector<2x64xf32>
    %cst_104 = arith.constant 1.000000e+00 : f32
    %244 = vector.broadcast %cst_104 : f32 to vector<2x64xf32>
    %245 = arith.addf %244, %243 : vector<2x64xf32>
    %246 = arith.divf %244, %245 : vector<2x64xf32>
    %247 = vector.extract_strided_slice %234 {offsets = [0, 128], sizes = [2, 64], strides = [1, 1]} : vector<2x256xf32> to vector<2x64xf32>
    %248 = math.tanh %247 : vector<2x64xf32>
    %249 = vector.extract_strided_slice %234 {offsets = [0, 192], sizes = [2, 64], strides = [1, 1]} : vector<2x256xf32> to vector<2x64xf32>
    %250 = arith.negf %249 : vector<2x64xf32>
    %251 = math.exp %250 : vector<2x64xf32>
    %cst_105 = arith.constant 1.000000e+00 : f32
    %252 = vector.broadcast %cst_105 : f32 to vector<2x64xf32>
    %253 = arith.addf %252, %251 : vector<2x64xf32>
    %254 = arith.divf %252, %253 : vector<2x64xf32>
    %255 = arith.mulf %246, %224 : vector<2x64xf32>
    %256 = arith.mulf %240, %248 : vector<2x64xf32>
    %257 = arith.addf %255, %256 : vector<2x64xf32>
    %258 = math.tanh %257 : vector<2x64xf32>
    %259 = arith.mulf %254, %258 : vector<2x64xf32>
    %c2_i32_106 = arith.constant 2 : i32
    %260 = arith.muli %c1_i32, %c2_i32_106 : i32
    %261 = arith.index_cast %260 : i32 to index
    %c0_107 = arith.constant 0 : index
    %262 = vector.load %arg33[%261, %c0_107] : memref<16x64xf32, #tpu.memory_space<vmem>>, vector<2x64xf32>
    tpu.vector_store %arg33[%261, %c0_107], %259 {strides = array<i32>} : memref<16x64xf32, #tpu.memory_space<vmem>>, vector<2x64xf32>,
    %c2_i32_108 = arith.constant 2 : i32
    %c2_i32_109 = arith.constant 2 : i32
    %263 = arith.muli %c2_i32_108, %c2_i32_109 : i32
    %264 = arith.index_cast %263 : i32 to index
    %c0_110 = arith.constant 0 : index
    %265 = vector.load %arg32[%264, %c0_110] : memref<16x256xf32, #tpu.memory_space<vmem>>, vector<2x256xf32>
    %cst_111 = arith.constant dense<0.000000e+00> : vector<2x256xf32>
    %266 = tpu.matmul %259, %195, %cst_111 {dimension_numbers = #tpu.dot_dimension_numbers<[1], [0], [0], [1], [0, 0, 1, 1], [], []>} : vector<2x64xf32>, vector<64x256xf32>, vector<2x256xf32> -> vector<2x256xf32>
    %267 = arith.addf %265, %266 : vector<2x256xf32>
    %268 = vector.extract_strided_slice %267 {offsets = [0, 0], sizes = [2, 64], strides = [1, 1]} : vector<2x256xf32> to vector<2x64xf32>
    %269 = arith.negf %268 : vector<2x64xf32>
    %270 = math.exp %269 : vector<2x64xf32>
    %cst_112 = arith.constant 1.000000e+00 : f32
    %271 = vector.broadcast %cst_112 : f32 to vector<2x64xf32>
    %272 = arith.addf %271, %270 : vector<2x64xf32>
    %273 = arith.divf %271, %272 : vector<2x64xf32>
    %274 = vector.extract_strided_slice %267 {offsets = [0, 64], sizes = [2, 64], strides = [1, 1]} : vector<2x256xf32> to vector<2x64xf32>
    %275 = arith.negf %274 : vector<2x64xf32>
    %276 = math.exp %275 : vector<2x64xf32>
    %cst_113 = arith.constant 1.000000e+00 : f32
    %277 = vector.broadcast %cst_113 : f32 to vector<2x64xf32>
    %278 = arith.addf %277, %276 : vector<2x64xf32>
    %279 = arith.divf %277, %278 : vector<2x64xf32>
    %280 = vector.extract_strided_slice %267 {offsets = [0, 128], sizes = [2, 64], strides = [1, 1]} : vector<2x256xf32> to vector<2x64xf32>
    %281 = math.tanh %280 : vector<2x64xf32>
    %282 = vector.extract_strided_slice %267 {offsets = [0, 192], sizes = [2, 64], strides = [1, 1]} : vector<2x256xf32> to vector<2x64xf32>
    %283 = arith.negf %282 : vector<2x64xf32>
    %284 = math.exp %283 : vector<2x64xf32>
    %cst_114 = arith.constant 1.000000e+00 : f32
    %285 = vector.broadcast %cst_114 : f32 to vector<2x64xf32>
    %286 = arith.addf %285, %284 : vector<2x64xf32>
    %287 = arith.divf %285, %286 : vector<2x64xf32>
    %288 = arith.mulf %279, %257 : vector<2x64xf32>
    %289 = arith.mulf %273, %281 : vector<2x64xf32>
    %290 = arith.addf %288, %289 : vector<2x64xf32>
    %291 = math.tanh %290 : vector<2x64xf32>
    %292 = arith.mulf %287, %291 : vector<2x64xf32>
    %c2_i32_115 = arith.constant 2 : i32
    %293 = arith.muli %c2_i32_108, %c2_i32_115 : i32
    %294 = arith.index_cast %293 : i32 to index
    %c0_116 = arith.constant 0 : index
    %295 = vector.load %arg33[%294, %c0_116] : memref<16x64xf32, #tpu.memory_space<vmem>>, vector<2x64xf32>
    tpu.vector_store %arg33[%294, %c0_116], %292 {strides = array<i32>} : memref<16x64xf32, #tpu.memory_space<vmem>>, vector<2x64xf32>,
    %c3_i32 = arith.constant 3 : i32
    %c2_i32_117 = arith.constant 2 : i32
    %296 = arith.muli %c3_i32, %c2_i32_117 : i32
    %297 = arith.index_cast %296 : i32 to index
    %c0_118 = arith.constant 0 : index
    %298 = vector.load %arg32[%297, %c0_118] : memref<16x256xf32, #tpu.memory_space<vmem>>, vector<2x256xf32>
    %cst_119 = arith.constant dense<0.000000e+00> : vector<2x256xf32>
    %299 = tpu.matmul %292, %195, %cst_119 {dimension_numbers = #tpu.dot_dimension_numbers<[1], [0], [0], [1], [0, 0, 1, 1], [], []>} : vector<2x64xf32>, vector<64x256xf32>, vector<2x256xf32> -> vector<2x256xf32>
    %300 = arith.addf %298, %299 : vector<2x256xf32>
    %301 = vector.extract_strided_slice %300 {offsets = [0, 0], sizes = [2, 64], strides = [1, 1]} : vector<2x256xf32> to vector<2x64xf32>
    %302 = arith.negf %301 : vector<2x64xf32>
    %303 = math.exp %302 : vector<2x64xf32>
    %cst_120 = arith.constant 1.000000e+00 : f32
    %304 = vector.broadcast %cst_120 : f32 to vector<2x64xf32>
    %305 = arith.addf %304, %303 : vector<2x64xf32>
    %306 = arith.divf %304, %305 : vector<2x64xf32>
    %307 = vector.extract_strided_slice %300 {offsets = [0, 64], sizes = [2, 64], strides = [1, 1]} : vector<2x256xf32> to vector<2x64xf32>
    %308 = arith.negf %307 : vector<2x64xf32>
    %309 = math.exp %308 : vector<2x64xf32>
    %cst_121 = arith.constant 1.000000e+00 : f32
    %310 = vector.broadcast %cst_121 : f32 to vector<2x64xf32>
    %311 = arith.addf %310, %309 : vector<2x64xf32>
    %312 = arith.divf %310, %311 : vector<2x64xf32>
    %313 = vector.extract_strided_slice %300 {offsets = [0, 128], sizes = [2, 64], strides = [1, 1]} : vector<2x256xf32> to vector<2x64xf32>
    %314 = math.tanh %313 : vector<2x64xf32>
    %315 = vector.extract_strided_slice %300 {offsets = [0, 192], sizes = [2, 64], strides = [1, 1]} : vector<2x256xf32> to vector<2x64xf32>
    %316 = arith.negf %315 : vector<2x64xf32>
    %317 = math.exp %316 : vector<2x64xf32>
    %cst_122 = arith.constant 1.000000e+00 : f32
    %318 = vector.broadcast %cst_122 : f32 to vector<2x64xf32>
    %319 = arith.addf %318, %317 : vector<2x64xf32>
    %320 = arith.divf %318, %319 : vector<2x64xf32>
    %321 = arith.mulf %312, %290 : vector<2x64xf32>
    %322 = arith.mulf %306, %314 : vector<2x64xf32>
    %323 = arith.addf %321, %322 : vector<2x64xf32>
    %324 = math.tanh %323 : vector<2x64xf32>
    %325 = arith.mulf %320, %324 : vector<2x64xf32>
    %c2_i32_123 = arith.constant 2 : i32
    %326 = arith.muli %c3_i32, %c2_i32_123 : i32
    %327 = arith.index_cast %326 : i32 to index
    %c0_124 = arith.constant 0 : index
    %328 = vector.load %arg33[%327, %c0_124] : memref<16x64xf32, #tpu.memory_space<vmem>>, vector<2x64xf32>
    tpu.vector_store %arg33[%327, %c0_124], %325 {strides = array<i32>} : memref<16x64xf32, #tpu.memory_space<vmem>>, vector<2x64xf32>,
    %c4_i32 = arith.constant 4 : i32
    %c2_i32_125 = arith.constant 2 : i32
    %329 = arith.muli %c4_i32, %c2_i32_125 : i32
    %330 = arith.index_cast %329 : i32 to index
    %c0_126 = arith.constant 0 : index
    %331 = vector.load %arg32[%330, %c0_126] : memref<16x256xf32, #tpu.memory_space<vmem>>, vector<2x256xf32>
    %cst_127 = arith.constant dense<0.000000e+00> : vector<2x256xf32>
    %332 = tpu.matmul %325, %195, %cst_127 {dimension_numbers = #tpu.dot_dimension_numbers<[1], [0], [0], [1], [0, 0, 1, 1], [], []>} : vector<2x64xf32>, vector<64x256xf32>, vector<2x256xf32> -> vector<2x256xf32>
    %333 = arith.addf %331, %332 : vector<2x256xf32>
    %334 = vector.extract_strided_slice %333 {offsets = [0, 0], sizes = [2, 64], strides = [1, 1]} : vector<2x256xf32> to vector<2x64xf32>
    %335 = arith.negf %334 : vector<2x64xf32>
    %336 = math.exp %335 : vector<2x64xf32>
    %cst_128 = arith.constant 1.000000e+00 : f32
    %337 = vector.broadcast %cst_128 : f32 to vector<2x64xf32>
    %338 = arith.addf %337, %336 : vector<2x64xf32>
    %339 = arith.divf %337, %338 : vector<2x64xf32>
    %340 = vector.extract_strided_slice %333 {offsets = [0, 64], sizes = [2, 64], strides = [1, 1]} : vector<2x256xf32> to vector<2x64xf32>
    %341 = arith.negf %340 : vector<2x64xf32>
    %342 = math.exp %341 : vector<2x64xf32>
    %cst_129 = arith.constant 1.000000e+00 : f32
    %343 = vector.broadcast %cst_129 : f32 to vector<2x64xf32>
    %344 = arith.addf %343, %342 : vector<2x64xf32>
    %345 = arith.divf %343, %344 : vector<2x64xf32>
    %346 = vector.extract_strided_slice %333 {offsets = [0, 128], sizes = [2, 64], strides = [1, 1]} : vector<2x256xf32> to vector<2x64xf32>
    %347 = math.tanh %346 : vector<2x64xf32>
    %348 = vector.extract_strided_slice %333 {offsets = [0, 192], sizes = [2, 64], strides = [1, 1]} : vector<2x256xf32> to vector<2x64xf32>
    %349 = arith.negf %348 : vector<2x64xf32>
    %350 = math.exp %349 : vector<2x64xf32>
    %cst_130 = arith.constant 1.000000e+00 : f32
    %351 = vector.broadcast %cst_130 : f32 to vector<2x64xf32>
    %352 = arith.addf %351, %350 : vector<2x64xf32>
    %353 = arith.divf %351, %352 : vector<2x64xf32>
    %354 = arith.mulf %345, %323 : vector<2x64xf32>
    %355 = arith.mulf %339, %347 : vector<2x64xf32>
    %356 = arith.addf %354, %355 : vector<2x64xf32>
    %357 = math.tanh %356 : vector<2x64xf32>
    %358 = arith.mulf %353, %357 : vector<2x64xf32>
    %c2_i32_131 = arith.constant 2 : i32
    %359 = arith.muli %c4_i32, %c2_i32_131 : i32
    %360 = arith.index_cast %359 : i32 to index
    %c0_132 = arith.constant 0 : index
    %361 = vector.load %arg33[%360, %c0_132] : memref<16x64xf32, #tpu.memory_space<vmem>>, vector<2x64xf32>
    tpu.vector_store %arg33[%360, %c0_132], %358 {strides = array<i32>} : memref<16x64xf32, #tpu.memory_space<vmem>>, vector<2x64xf32>,
    %c5_i32 = arith.constant 5 : i32
    %c2_i32_133 = arith.constant 2 : i32
    %362 = arith.muli %c5_i32, %c2_i32_133 : i32
    %363 = arith.index_cast %362 : i32 to index
    %c0_134 = arith.constant 0 : index
    %364 = vector.load %arg32[%363, %c0_134] : memref<16x256xf32, #tpu.memory_space<vmem>>, vector<2x256xf32>
    %cst_135 = arith.constant dense<0.000000e+00> : vector<2x256xf32>
    %365 = tpu.matmul %358, %195, %cst_135 {dimension_numbers = #tpu.dot_dimension_numbers<[1], [0], [0], [1], [0, 0, 1, 1], [], []>} : vector<2x64xf32>, vector<64x256xf32>, vector<2x256xf32> -> vector<2x256xf32>
    %366 = arith.addf %364, %365 : vector<2x256xf32>
    %367 = vector.extract_strided_slice %366 {offsets = [0, 0], sizes = [2, 64], strides = [1, 1]} : vector<2x256xf32> to vector<2x64xf32>
    %368 = arith.negf %367 : vector<2x64xf32>
    %369 = math.exp %368 : vector<2x64xf32>
    %cst_136 = arith.constant 1.000000e+00 : f32
    %370 = vector.broadcast %cst_136 : f32 to vector<2x64xf32>
    %371 = arith.addf %370, %369 : vector<2x64xf32>
    %372 = arith.divf %370, %371 : vector<2x64xf32>
    %373 = vector.extract_strided_slice %366 {offsets = [0, 64], sizes = [2, 64], strides = [1, 1]} : vector<2x256xf32> to vector<2x64xf32>
    %374 = arith.negf %373 : vector<2x64xf32>
    %375 = math.exp %374 : vector<2x64xf32>
    %cst_137 = arith.constant 1.000000e+00 : f32
    %376 = vector.broadcast %cst_137 : f32 to vector<2x64xf32>
    %377 = arith.addf %376, %375 : vector<2x64xf32>
    %378 = arith.divf %376, %377 : vector<2x64xf32>
    %379 = vector.extract_strided_slice %366 {offsets = [0, 128], sizes = [2, 64], strides = [1, 1]} : vector<2x256xf32> to vector<2x64xf32>
    %380 = math.tanh %379 : vector<2x64xf32>
    %381 = vector.extract_strided_slice %366 {offsets = [0, 192], sizes = [2, 64], strides = [1, 1]} : vector<2x256xf32> to vector<2x64xf32>
    %382 = arith.negf %381 : vector<2x64xf32>
    %383 = math.exp %382 : vector<2x64xf32>
    %cst_138 = arith.constant 1.000000e+00 : f32
    %384 = vector.broadcast %cst_138 : f32 to vector<2x64xf32>
    %385 = arith.addf %384, %383 : vector<2x64xf32>
    %386 = arith.divf %384, %385 : vector<2x64xf32>
    %387 = arith.mulf %378, %356 : vector<2x64xf32>
    %388 = arith.mulf %372, %380 : vector<2x64xf32>
    %389 = arith.addf %387, %388 : vector<2x64xf32>
    %390 = math.tanh %389 : vector<2x64xf32>
    %391 = arith.mulf %386, %390 : vector<2x64xf32>
    %c2_i32_139 = arith.constant 2 : i32
    %392 = arith.muli %c5_i32, %c2_i32_139 : i32
    %393 = arith.index_cast %392 : i32 to index
    %c0_140 = arith.constant 0 : index
    %394 = vector.load %arg33[%393, %c0_140] : memref<16x64xf32, #tpu.memory_space<vmem>>, vector<2x64xf32>
    tpu.vector_store %arg33[%393, %c0_140], %391 {strides = array<i32>} : memref<16x64xf32, #tpu.memory_space<vmem>>, vector<2x64xf32>,
    %c6_i32 = arith.constant 6 : i32
    %c2_i32_141 = arith.constant 2 : i32
    %395 = arith.muli %c6_i32, %c2_i32_141 : i32
    %396 = arith.index_cast %395 : i32 to index
    %c0_142 = arith.constant 0 : index
    %397 = vector.load %arg32[%396, %c0_142] : memref<16x256xf32, #tpu.memory_space<vmem>>, vector<2x256xf32>
    %cst_143 = arith.constant dense<0.000000e+00> : vector<2x256xf32>
    %398 = tpu.matmul %391, %195, %cst_143 {dimension_numbers = #tpu.dot_dimension_numbers<[1], [0], [0], [1], [0, 0, 1, 1], [], []>} : vector<2x64xf32>, vector<64x256xf32>, vector<2x256xf32> -> vector<2x256xf32>
    %399 = arith.addf %397, %398 : vector<2x256xf32>
    %400 = vector.extract_strided_slice %399 {offsets = [0, 0], sizes = [2, 64], strides = [1, 1]} : vector<2x256xf32> to vector<2x64xf32>
    %401 = arith.negf %400 : vector<2x64xf32>
    %402 = math.exp %401 : vector<2x64xf32>
    %cst_144 = arith.constant 1.000000e+00 : f32
    %403 = vector.broadcast %cst_144 : f32 to vector<2x64xf32>
    %404 = arith.addf %403, %402 : vector<2x64xf32>
    %405 = arith.divf %403, %404 : vector<2x64xf32>
    %406 = vector.extract_strided_slice %399 {offsets = [0, 64], sizes = [2, 64], strides = [1, 1]} : vector<2x256xf32> to vector<2x64xf32>
    %407 = arith.negf %406 : vector<2x64xf32>
    %408 = math.exp %407 : vector<2x64xf32>
    %cst_145 = arith.constant 1.000000e+00 : f32
    %409 = vector.broadcast %cst_145 : f32 to vector<2x64xf32>
    %410 = arith.addf %409, %408 : vector<2x64xf32>
    %411 = arith.divf %409, %410 : vector<2x64xf32>
    %412 = vector.extract_strided_slice %399 {offsets = [0, 128], sizes = [2, 64], strides = [1, 1]} : vector<2x256xf32> to vector<2x64xf32>
    %413 = math.tanh %412 : vector<2x64xf32>
    %414 = vector.extract_strided_slice %399 {offsets = [0, 192], sizes = [2, 64], strides = [1, 1]} : vector<2x256xf32> to vector<2x64xf32>
    %415 = arith.negf %414 : vector<2x64xf32>
    %416 = math.exp %415 : vector<2x64xf32>
    %cst_146 = arith.constant 1.000000e+00 : f32
    %417 = vector.broadcast %cst_146 : f32 to vector<2x64xf32>
    %418 = arith.addf %417, %416 : vector<2x64xf32>
    %419 = arith.divf %417, %418 : vector<2x64xf32>
    %420 = arith.mulf %411, %389 : vector<2x64xf32>
    %421 = arith.mulf %405, %413 : vector<2x64xf32>
    %422 = arith.addf %420, %421 : vector<2x64xf32>
    %423 = math.tanh %422 : vector<2x64xf32>
    %424 = arith.mulf %419, %423 : vector<2x64xf32>
    %c2_i32_147 = arith.constant 2 : i32
    %425 = arith.muli %c6_i32, %c2_i32_147 : i32
    %426 = arith.index_cast %425 : i32 to index
    %c0_148 = arith.constant 0 : index
    %427 = vector.load %arg33[%426, %c0_148] : memref<16x64xf32, #tpu.memory_space<vmem>>, vector<2x64xf32>
    tpu.vector_store %arg33[%426, %c0_148], %424 {strides = array<i32>} : memref<16x64xf32, #tpu.memory_space<vmem>>, vector<2x64xf32>,
    %c7_i32 = arith.constant 7 : i32
    %c2_i32_149 = arith.constant 2 : i32
    %428 = arith.muli %c7_i32, %c2_i32_149 : i32
    %429 = arith.index_cast %428 : i32 to index
    %c0_150 = arith.constant 0 : index
    %430 = vector.load %arg32[%429, %c0_150] : memref<16x256xf32, #tpu.memory_space<vmem>>, vector<2x256xf32>
    %cst_151 = arith.constant dense<0.000000e+00> : vector<2x256xf32>
    %431 = tpu.matmul %424, %195, %cst_151 {dimension_numbers = #tpu.dot_dimension_numbers<[1], [0], [0], [1], [0, 0, 1, 1], [], []>} : vector<2x64xf32>, vector<64x256xf32>, vector<2x256xf32> -> vector<2x256xf32>
    %432 = arith.addf %430, %431 : vector<2x256xf32>
    %433 = vector.extract_strided_slice %432 {offsets = [0, 0], sizes = [2, 64], strides = [1, 1]} : vector<2x256xf32> to vector<2x64xf32>
    %434 = arith.negf %433 : vector<2x64xf32>
    %435 = math.exp %434 : vector<2x64xf32>
    %cst_152 = arith.constant 1.000000e+00 : f32
    %436 = vector.broadcast %cst_152 : f32 to vector<2x64xf32>
    %437 = arith.addf %436, %435 : vector<2x64xf32>
    %438 = arith.divf %436, %437 : vector<2x64xf32>
    %439 = vector.extract_strided_slice %432 {offsets = [0, 64], sizes = [2, 64], strides = [1, 1]} : vector<2x256xf32> to vector<2x64xf32>
    %440 = arith.negf %439 : vector<2x64xf32>
    %441 = math.exp %440 : vector<2x64xf32>
    %cst_153 = arith.constant 1.000000e+00 : f32
    %442 = vector.broadcast %cst_153 : f32 to vector<2x64xf32>
    %443 = arith.addf %442, %441 : vector<2x64xf32>
    %444 = arith.divf %442, %443 : vector<2x64xf32>
    %445 = vector.extract_strided_slice %432 {offsets = [0, 128], sizes = [2, 64], strides = [1, 1]} : vector<2x256xf32> to vector<2x64xf32>
    %446 = math.tanh %445 : vector<2x64xf32>
    %447 = vector.extract_strided_slice %432 {offsets = [0, 192], sizes = [2, 64], strides = [1, 1]} : vector<2x256xf32> to vector<2x64xf32>
    %448 = arith.negf %447 : vector<2x64xf32>
    %449 = math.exp %448 : vector<2x64xf32>
    %cst_154 = arith.constant 1.000000e+00 : f32
    %450 = vector.broadcast %cst_154 : f32 to vector<2x64xf32>
    %451 = arith.addf %450, %449 : vector<2x64xf32>
    %452 = arith.divf %450, %451 : vector<2x64xf32>
    %453 = arith.mulf %444, %422 : vector<2x64xf32>
    %454 = arith.mulf %438, %446 : vector<2x64xf32>
    %455 = arith.addf %453, %454 : vector<2x64xf32>
    %456 = math.tanh %455 : vector<2x64xf32>
    %457 = arith.mulf %452, %456 : vector<2x64xf32>
    %c2_i32_155 = arith.constant 2 : i32
    %458 = arith.muli %c7_i32, %c2_i32_155 : i32
    %459 = arith.index_cast %458 : i32 to index
    %c0_156 = arith.constant 0 : index
    %460 = vector.load %arg33[%459, %c0_156] : memref<16x64xf32, #tpu.memory_space<vmem>>, vector<2x64xf32>
    tpu.vector_store %arg33[%459, %c0_156], %457 {strides = array<i32>} : memref<16x64xf32, #tpu.memory_space<vmem>>, vector<2x64xf32>,
    %c8_i32 = arith.constant 8 : i32
    %c0_157 = arith.constant 0 : index
    %c0_158 = arith.constant 0 : index
    %461 = vector.load %arg33[%c0_157, %c0_158] : memref<16x64xf32, #tpu.memory_space<vmem>>, vector<16x64xf32>
    %c1 = arith.constant 1 : index
    %c0_159 = arith.constant 0 : index
    %c0_160 = arith.constant 0 : index
    %462 = vector.load %arg26[%c1, %c0_159, %c0_160] : memref<2x64x256xf32, #tpu.memory_space<vmem>>, vector<1x64x256xf32>
    %463 = vector.shape_cast %462 : vector<1x64x256xf32> to vector<64x256xf32>
    %cst_161 = arith.constant dense<0.000000e+00> : vector<16x256xf32>
    %464 = tpu.matmul %461, %463, %cst_161 {dimension_numbers = #tpu.dot_dimension_numbers<[1], [0], [0], [1], [0, 0, 1, 1], [], []>} : vector<16x64xf32>, vector<64x256xf32>, vector<16x256xf32> -> vector<16x256xf32>
    %c1_162 = arith.constant 1 : index
    %c0_163 = arith.constant 0 : index
    %c0_164 = arith.constant 0 : index
    %465 = vector.load %arg28[%c1_162, %c0_163, %c0_164] : memref<2x1x256xf32, #tpu.memory_space<vmem>>, vector<1x1x256xf32>
    %466 = vector.shape_cast %465 : vector<1x1x256xf32> to vector<1x256xf32>
    %467 = vector.broadcast %466 : vector<1x256xf32> to vector<16x256xf32>
    %468 = arith.addf %464, %467 : vector<16x256xf32>
    %c0_165 = arith.constant 0 : index
    %c0_166 = arith.constant 0 : index
    %469 = vector.load %arg32[%c0_165, %c0_166] : memref<16x256xf32, #tpu.memory_space<vmem>>, vector<16x256xf32>
    tpu.vector_store %arg32[%c0_165, %c0_166], %468 {strides = array<i32>} : memref<16x256xf32, #tpu.memory_space<vmem>>, vector<16x256xf32>,
    %c1_167 = arith.constant 1 : index
    %c0_168 = arith.constant 0 : index
    %c0_169 = arith.constant 0 : index
    %470 = vector.load %arg27[%c1_167, %c0_168, %c0_169] : memref<2x64x256xf32, #tpu.memory_space<vmem>>, vector<1x64x256xf32>
    %471 = vector.shape_cast %470 : vector<1x64x256xf32> to vector<64x256xf32>
    %cst_170 = arith.constant 0.000000e+00 : f32
    %472 = vector.broadcast %cst_170 : f32 to vector<2x64xf32>
    %c0_i32_171 = arith.constant 0 : i32
    %c2_i32_172 = arith.constant 2 : i32
    %473 = arith.muli %c0_i32_171, %c2_i32_172 : i32
    %474 = arith.index_cast %473 : i32 to index
    %c0_173 = arith.constant 0 : index
    %475 = vector.load %arg32[%474, %c0_173] : memref<16x256xf32, #tpu.memory_space<vmem>>, vector<2x256xf32>
    %cst_174 = arith.constant dense<0.000000e+00> : vector<2x256xf32>
    %476 = tpu.matmul %472, %471, %cst_174 {dimension_numbers = #tpu.dot_dimension_numbers<[1], [0], [0], [1], [0, 0, 1, 1], [], []>} : vector<2x64xf32>, vector<64x256xf32>, vector<2x256xf32> -> vector<2x256xf32>
    %477 = arith.addf %475, %476 : vector<2x256xf32>
    %478 = vector.extract_strided_slice %477 {offsets = [0, 0], sizes = [2, 64], strides = [1, 1]} : vector<2x256xf32> to vector<2x64xf32>
    %479 = arith.negf %478 : vector<2x64xf32>
    %480 = math.exp %479 : vector<2x64xf32>
    %cst_175 = arith.constant 1.000000e+00 : f32
    %481 = vector.broadcast %cst_175 : f32 to vector<2x64xf32>
    %482 = arith.addf %481, %480 : vector<2x64xf32>
    %483 = arith.divf %481, %482 : vector<2x64xf32>
    %484 = vector.extract_strided_slice %477 {offsets = [0, 64], sizes = [2, 64], strides = [1, 1]} : vector<2x256xf32> to vector<2x64xf32>
    %485 = arith.negf %484 : vector<2x64xf32>
    %486 = math.exp %485 : vector<2x64xf32>
    %cst_176 = arith.constant 1.000000e+00 : f32
    %487 = vector.broadcast %cst_176 : f32 to vector<2x64xf32>
    %488 = arith.addf %487, %486 : vector<2x64xf32>
    %489 = arith.divf %487, %488 : vector<2x64xf32>
    %490 = vector.extract_strided_slice %477 {offsets = [0, 128], sizes = [2, 64], strides = [1, 1]} : vector<2x256xf32> to vector<2x64xf32>
    %491 = math.tanh %490 : vector<2x64xf32>
    %492 = vector.extract_strided_slice %477 {offsets = [0, 192], sizes = [2, 64], strides = [1, 1]} : vector<2x256xf32> to vector<2x64xf32>
    %493 = arith.negf %492 : vector<2x64xf32>
    %494 = math.exp %493 : vector<2x64xf32>
    %cst_177 = arith.constant 1.000000e+00 : f32
    %495 = vector.broadcast %cst_177 : f32 to vector<2x64xf32>
    %496 = arith.addf %495, %494 : vector<2x64xf32>
    %497 = arith.divf %495, %496 : vector<2x64xf32>
    %498 = arith.mulf %489, %472 : vector<2x64xf32>
    %499 = arith.mulf %483, %491 : vector<2x64xf32>
    %500 = arith.addf %498, %499 : vector<2x64xf32>
    %501 = math.tanh %500 : vector<2x64xf32>
    %502 = arith.mulf %497, %501 : vector<2x64xf32>
    %c2_i32_178 = arith.constant 2 : i32
    %503 = arith.muli %c0_i32_171, %c2_i32_178 : i32
    %504 = arith.index_cast %503 : i32 to index
    %c0_179 = arith.constant 0 : index
    %505 = vector.load %arg33[%504, %c0_179] : memref<16x64xf32, #tpu.memory_space<vmem>>, vector<2x64xf32>
    tpu.vector_store %arg33[%504, %c0_179], %502 {strides = array<i32>} : memref<16x64xf32, #tpu.memory_space<vmem>>, vector<2x64xf32>,
    %c1_i32_180 = arith.constant 1 : i32
    %c2_i32_181 = arith.constant 2 : i32
    %506 = arith.muli %c1_i32_180, %c2_i32_181 : i32
    %507 = arith.index_cast %506 : i32 to index
    %c0_182 = arith.constant 0 : index
    %508 = vector.load %arg32[%507, %c0_182] : memref<16x256xf32, #tpu.memory_space<vmem>>, vector<2x256xf32>
    %cst_183 = arith.constant dense<0.000000e+00> : vector<2x256xf32>
    %509 = tpu.matmul %502, %471, %cst_183 {dimension_numbers = #tpu.dot_dimension_numbers<[1], [0], [0], [1], [0, 0, 1, 1], [], []>} : vector<2x64xf32>, vector<64x256xf32>, vector<2x256xf32> -> vector<2x256xf32>
    %510 = arith.addf %508, %509 : vector<2x256xf32>
    %511 = vector.extract_strided_slice %510 {offsets = [0, 0], sizes = [2, 64], strides = [1, 1]} : vector<2x256xf32> to vector<2x64xf32>
    %512 = arith.negf %511 : vector<2x64xf32>
    %513 = math.exp %512 : vector<2x64xf32>
    %cst_184 = arith.constant 1.000000e+00 : f32
    %514 = vector.broadcast %cst_184 : f32 to vector<2x64xf32>
    %515 = arith.addf %514, %513 : vector<2x64xf32>
    %516 = arith.divf %514, %515 : vector<2x64xf32>
    %517 = vector.extract_strided_slice %510 {offsets = [0, 64], sizes = [2, 64], strides = [1, 1]} : vector<2x256xf32> to vector<2x64xf32>
    %518 = arith.negf %517 : vector<2x64xf32>
    %519 = math.exp %518 : vector<2x64xf32>
    %cst_185 = arith.constant 1.000000e+00 : f32
    %520 = vector.broadcast %cst_185 : f32 to vector<2x64xf32>
    %521 = arith.addf %520, %519 : vector<2x64xf32>
    %522 = arith.divf %520, %521 : vector<2x64xf32>
    %523 = vector.extract_strided_slice %510 {offsets = [0, 128], sizes = [2, 64], strides = [1, 1]} : vector<2x256xf32> to vector<2x64xf32>
    %524 = math.tanh %523 : vector<2x64xf32>
    %525 = vector.extract_strided_slice %510 {offsets = [0, 192], sizes = [2, 64], strides = [1, 1]} : vector<2x256xf32> to vector<2x64xf32>
    %526 = arith.negf %525 : vector<2x64xf32>
    %527 = math.exp %526 : vector<2x64xf32>
    %cst_186 = arith.constant 1.000000e+00 : f32
    %528 = vector.broadcast %cst_186 : f32 to vector<2x64xf32>
    %529 = arith.addf %528, %527 : vector<2x64xf32>
    %530 = arith.divf %528, %529 : vector<2x64xf32>
    %531 = arith.mulf %522, %500 : vector<2x64xf32>
    %532 = arith.mulf %516, %524 : vector<2x64xf32>
    %533 = arith.addf %531, %532 : vector<2x64xf32>
    %534 = math.tanh %533 : vector<2x64xf32>
    %535 = arith.mulf %530, %534 : vector<2x64xf32>
    %c2_i32_187 = arith.constant 2 : i32
    %536 = arith.muli %c1_i32_180, %c2_i32_187 : i32
    %537 = arith.index_cast %536 : i32 to index
    %c0_188 = arith.constant 0 : index
    %538 = vector.load %arg33[%537, %c0_188] : memref<16x64xf32, #tpu.memory_space<vmem>>, vector<2x64xf32>
    tpu.vector_store %arg33[%537, %c0_188], %535 {strides = array<i32>} : memref<16x64xf32, #tpu.memory_space<vmem>>, vector<2x64xf32>,
    %c2_i32_189 = arith.constant 2 : i32
    %c2_i32_190 = arith.constant 2 : i32
    %539 = arith.muli %c2_i32_189, %c2_i32_190 : i32
    %540 = arith.index_cast %539 : i32 to index
    %c0_191 = arith.constant 0 : index
    %541 = vector.load %arg32[%540, %c0_191] : memref<16x256xf32, #tpu.memory_space<vmem>>, vector<2x256xf32>
    %cst_192 = arith.constant dense<0.000000e+00> : vector<2x256xf32>
    %542 = tpu.matmul %535, %471, %cst_192 {dimension_numbers = #tpu.dot_dimension_numbers<[1], [0], [0], [1], [0, 0, 1, 1], [], []>} : vector<2x64xf32>, vector<64x256xf32>, vector<2x256xf32> -> vector<2x256xf32>
    %543 = arith.addf %541, %542 : vector<2x256xf32>
    %544 = vector.extract_strided_slice %543 {offsets = [0, 0], sizes = [2, 64], strides = [1, 1]} : vector<2x256xf32> to vector<2x64xf32>
    %545 = arith.negf %544 : vector<2x64xf32>
    %546 = math.exp %545 : vector<2x64xf32>
    %cst_193 = arith.constant 1.000000e+00 : f32
    %547 = vector.broadcast %cst_193 : f32 to vector<2x64xf32>
    %548 = arith.addf %547, %546 : vector<2x64xf32>
    %549 = arith.divf %547, %548 : vector<2x64xf32>
    %550 = vector.extract_strided_slice %543 {offsets = [0, 64], sizes = [2, 64], strides = [1, 1]} : vector<2x256xf32> to vector<2x64xf32>
    %551 = arith.negf %550 : vector<2x64xf32>
    %552 = math.exp %551 : vector<2x64xf32>
    %cst_194 = arith.constant 1.000000e+00 : f32
    %553 = vector.broadcast %cst_194 : f32 to vector<2x64xf32>
    %554 = arith.addf %553, %552 : vector<2x64xf32>
    %555 = arith.divf %553, %554 : vector<2x64xf32>
    %556 = vector.extract_strided_slice %543 {offsets = [0, 128], sizes = [2, 64], strides = [1, 1]} : vector<2x256xf32> to vector<2x64xf32>
    %557 = math.tanh %556 : vector<2x64xf32>
    %558 = vector.extract_strided_slice %543 {offsets = [0, 192], sizes = [2, 64], strides = [1, 1]} : vector<2x256xf32> to vector<2x64xf32>
    %559 = arith.negf %558 : vector<2x64xf32>
    %560 = math.exp %559 : vector<2x64xf32>
    %cst_195 = arith.constant 1.000000e+00 : f32
    %561 = vector.broadcast %cst_195 : f32 to vector<2x64xf32>
    %562 = arith.addf %561, %560 : vector<2x64xf32>
    %563 = arith.divf %561, %562 : vector<2x64xf32>
    %564 = arith.mulf %555, %533 : vector<2x64xf32>
    %565 = arith.mulf %549, %557 : vector<2x64xf32>
    %566 = arith.addf %564, %565 : vector<2x64xf32>
    %567 = math.tanh %566 : vector<2x64xf32>
    %568 = arith.mulf %563, %567 : vector<2x64xf32>
    %c2_i32_196 = arith.constant 2 : i32
    %569 = arith.muli %c2_i32_189, %c2_i32_196 : i32
    %570 = arith.index_cast %569 : i32 to index
    %c0_197 = arith.constant 0 : index
    %571 = vector.load %arg33[%570, %c0_197] : memref<16x64xf32, #tpu.memory_space<vmem>>, vector<2x64xf32>
    tpu.vector_store %arg33[%570, %c0_197], %568 {strides = array<i32>} : memref<16x64xf32, #tpu.memory_space<vmem>>, vector<2x64xf32>,
    %c3_i32_198 = arith.constant 3 : i32
    %c2_i32_199 = arith.constant 2 : i32
    %572 = arith.muli %c3_i32_198, %c2_i32_199 : i32
    %573 = arith.index_cast %572 : i32 to index
    %c0_200 = arith.constant 0 : index
    %574 = vector.load %arg32[%573, %c0_200] : memref<16x256xf32, #tpu.memory_space<vmem>>, vector<2x256xf32>
    %cst_201 = arith.constant dense<0.000000e+00> : vector<2x256xf32>
    %575 = tpu.matmul %568, %471, %cst_201 {dimension_numbers = #tpu.dot_dimension_numbers<[1], [0], [0], [1], [0, 0, 1, 1], [], []>} : vector<2x64xf32>, vector<64x256xf32>, vector<2x256xf32> -> vector<2x256xf32>
    %576 = arith.addf %574, %575 : vector<2x256xf32>
    %577 = vector.extract_strided_slice %576 {offsets = [0, 0], sizes = [2, 64], strides = [1, 1]} : vector<2x256xf32> to vector<2x64xf32>
    %578 = arith.negf %577 : vector<2x64xf32>
    %579 = math.exp %578 : vector<2x64xf32>
    %cst_202 = arith.constant 1.000000e+00 : f32
    %580 = vector.broadcast %cst_202 : f32 to vector<2x64xf32>
    %581 = arith.addf %580, %579 : vector<2x64xf32>
    %582 = arith.divf %580, %581 : vector<2x64xf32>
    %583 = vector.extract_strided_slice %576 {offsets = [0, 64], sizes = [2, 64], strides = [1, 1]} : vector<2x256xf32> to vector<2x64xf32>
    %584 = arith.negf %583 : vector<2x64xf32>
    %585 = math.exp %584 : vector<2x64xf32>
    %cst_203 = arith.constant 1.000000e+00 : f32
    %586 = vector.broadcast %cst_203 : f32 to vector<2x64xf32>
    %587 = arith.addf %586, %585 : vector<2x64xf32>
    %588 = arith.divf %586, %587 : vector<2x64xf32>
    %589 = vector.extract_strided_slice %576 {offsets = [0, 128], sizes = [2, 64], strides = [1, 1]} : vector<2x256xf32> to vector<2x64xf32>
    %590 = math.tanh %589 : vector<2x64xf32>
    %591 = vector.extract_strided_slice %576 {offsets = [0, 192], sizes = [2, 64], strides = [1, 1]} : vector<2x256xf32> to vector<2x64xf32>
    %592 = arith.negf %591 : vector<2x64xf32>
    %593 = math.exp %592 : vector<2x64xf32>
    %cst_204 = arith.constant 1.000000e+00 : f32
    %594 = vector.broadcast %cst_204 : f32 to vector<2x64xf32>
    %595 = arith.addf %594, %593 : vector<2x64xf32>
    %596 = arith.divf %594, %595 : vector<2x64xf32>
    %597 = arith.mulf %588, %566 : vector<2x64xf32>
    %598 = arith.mulf %582, %590 : vector<2x64xf32>
    %599 = arith.addf %597, %598 : vector<2x64xf32>
    %600 = math.tanh %599 : vector<2x64xf32>
    %601 = arith.mulf %596, %600 : vector<2x64xf32>
    %c2_i32_205 = arith.constant 2 : i32
    %602 = arith.muli %c3_i32_198, %c2_i32_205 : i32
    %603 = arith.index_cast %602 : i32 to index
    %c0_206 = arith.constant 0 : index
    %604 = vector.load %arg33[%603, %c0_206] : memref<16x64xf32, #tpu.memory_space<vmem>>, vector<2x64xf32>
    tpu.vector_store %arg33[%603, %c0_206], %601 {strides = array<i32>} : memref<16x64xf32, #tpu.memory_space<vmem>>, vector<2x64xf32>,
    %c4_i32_207 = arith.constant 4 : i32
    %c2_i32_208 = arith.constant 2 : i32
    %605 = arith.muli %c4_i32_207, %c2_i32_208 : i32
    %606 = arith.index_cast %605 : i32 to index
    %c0_209 = arith.constant 0 : index
    %607 = vector.load %arg32[%606, %c0_209] : memref<16x256xf32, #tpu.memory_space<vmem>>, vector<2x256xf32>
    %cst_210 = arith.constant dense<0.000000e+00> : vector<2x256xf32>
    %608 = tpu.matmul %601, %471, %cst_210 {dimension_numbers = #tpu.dot_dimension_numbers<[1], [0], [0], [1], [0, 0, 1, 1], [], []>} : vector<2x64xf32>, vector<64x256xf32>, vector<2x256xf32> -> vector<2x256xf32>
    %609 = arith.addf %607, %608 : vector<2x256xf32>
    %610 = vector.extract_strided_slice %609 {offsets = [0, 0], sizes = [2, 64], strides = [1, 1]} : vector<2x256xf32> to vector<2x64xf32>
    %611 = arith.negf %610 : vector<2x64xf32>
    %612 = math.exp %611 : vector<2x64xf32>
    %cst_211 = arith.constant 1.000000e+00 : f32
    %613 = vector.broadcast %cst_211 : f32 to vector<2x64xf32>
    %614 = arith.addf %613, %612 : vector<2x64xf32>
    %615 = arith.divf %613, %614 : vector<2x64xf32>
    %616 = vector.extract_strided_slice %609 {offsets = [0, 64], sizes = [2, 64], strides = [1, 1]} : vector<2x256xf32> to vector<2x64xf32>
    %617 = arith.negf %616 : vector<2x64xf32>
    %618 = math.exp %617 : vector<2x64xf32>
    %cst_212 = arith.constant 1.000000e+00 : f32
    %619 = vector.broadcast %cst_212 : f32 to vector<2x64xf32>
    %620 = arith.addf %619, %618 : vector<2x64xf32>
    %621 = arith.divf %619, %620 : vector<2x64xf32>
    %622 = vector.extract_strided_slice %609 {offsets = [0, 128], sizes = [2, 64], strides = [1, 1]} : vector<2x256xf32> to vector<2x64xf32>
    %623 = math.tanh %622 : vector<2x64xf32>
    %624 = vector.extract_strided_slice %609 {offsets = [0, 192], sizes = [2, 64], strides = [1, 1]} : vector<2x256xf32> to vector<2x64xf32>
    %625 = arith.negf %624 : vector<2x64xf32>
    %626 = math.exp %625 : vector<2x64xf32>
    %cst_213 = arith.constant 1.000000e+00 : f32
    %627 = vector.broadcast %cst_213 : f32 to vector<2x64xf32>
    %628 = arith.addf %627, %626 : vector<2x64xf32>
    %629 = arith.divf %627, %628 : vector<2x64xf32>
    %630 = arith.mulf %621, %599 : vector<2x64xf32>
    %631 = arith.mulf %615, %623 : vector<2x64xf32>
    %632 = arith.addf %630, %631 : vector<2x64xf32>
    %633 = math.tanh %632 : vector<2x64xf32>
    %634 = arith.mulf %629, %633 : vector<2x64xf32>
    %c2_i32_214 = arith.constant 2 : i32
    %635 = arith.muli %c4_i32_207, %c2_i32_214 : i32
    %636 = arith.index_cast %635 : i32 to index
    %c0_215 = arith.constant 0 : index
    %637 = vector.load %arg33[%636, %c0_215] : memref<16x64xf32, #tpu.memory_space<vmem>>, vector<2x64xf32>
    tpu.vector_store %arg33[%636, %c0_215], %634 {strides = array<i32>} : memref<16x64xf32, #tpu.memory_space<vmem>>, vector<2x64xf32>,
    %c5_i32_216 = arith.constant 5 : i32
    %c2_i32_217 = arith.constant 2 : i32
    %638 = arith.muli %c5_i32_216, %c2_i32_217 : i32
    %639 = arith.index_cast %638 : i32 to index
    %c0_218 = arith.constant 0 : index
    %640 = vector.load %arg32[%639, %c0_218] : memref<16x256xf32, #tpu.memory_space<vmem>>, vector<2x256xf32>
    %cst_219 = arith.constant dense<0.000000e+00> : vector<2x256xf32>
    %641 = tpu.matmul %634, %471, %cst_219 {dimension_numbers = #tpu.dot_dimension_numbers<[1], [0], [0], [1], [0, 0, 1, 1], [], []>} : vector<2x64xf32>, vector<64x256xf32>, vector<2x256xf32> -> vector<2x256xf32>
    %642 = arith.addf %640, %641 : vector<2x256xf32>
    %643 = vector.extract_strided_slice %642 {offsets = [0, 0], sizes = [2, 64], strides = [1, 1]} : vector<2x256xf32> to vector<2x64xf32>
    %644 = arith.negf %643 : vector<2x64xf32>
    %645 = math.exp %644 : vector<2x64xf32>
    %cst_220 = arith.constant 1.000000e+00 : f32
    %646 = vector.broadcast %cst_220 : f32 to vector<2x64xf32>
    %647 = arith.addf %646, %645 : vector<2x64xf32>
    %648 = arith.divf %646, %647 : vector<2x64xf32>
    %649 = vector.extract_strided_slice %642 {offsets = [0, 64], sizes = [2, 64], strides = [1, 1]} : vector<2x256xf32> to vector<2x64xf32>
    %650 = arith.negf %649 : vector<2x64xf32>
    %651 = math.exp %650 : vector<2x64xf32>
    %cst_221 = arith.constant 1.000000e+00 : f32
    %652 = vector.broadcast %cst_221 : f32 to vector<2x64xf32>
    %653 = arith.addf %652, %651 : vector<2x64xf32>
    %654 = arith.divf %652, %653 : vector<2x64xf32>
    %655 = vector.extract_strided_slice %642 {offsets = [0, 128], sizes = [2, 64], strides = [1, 1]} : vector<2x256xf32> to vector<2x64xf32>
    %656 = math.tanh %655 : vector<2x64xf32>
    %657 = vector.extract_strided_slice %642 {offsets = [0, 192], sizes = [2, 64], strides = [1, 1]} : vector<2x256xf32> to vector<2x64xf32>
    %658 = arith.negf %657 : vector<2x64xf32>
    %659 = math.exp %658 : vector<2x64xf32>
    %cst_222 = arith.constant 1.000000e+00 : f32
    %660 = vector.broadcast %cst_222 : f32 to vector<2x64xf32>
    %661 = arith.addf %660, %659 : vector<2x64xf32>
    %662 = arith.divf %660, %661 : vector<2x64xf32>
    %663 = arith.mulf %654, %632 : vector<2x64xf32>
    %664 = arith.mulf %648, %656 : vector<2x64xf32>
    %665 = arith.addf %663, %664 : vector<2x64xf32>
    %666 = math.tanh %665 : vector<2x64xf32>
    %667 = arith.mulf %662, %666 : vector<2x64xf32>
    %c2_i32_223 = arith.constant 2 : i32
    %668 = arith.muli %c5_i32_216, %c2_i32_223 : i32
    %669 = arith.index_cast %668 : i32 to index
    %c0_224 = arith.constant 0 : index
    %670 = vector.load %arg33[%669, %c0_224] : memref<16x64xf32, #tpu.memory_space<vmem>>, vector<2x64xf32>
    tpu.vector_store %arg33[%669, %c0_224], %667 {strides = array<i32>} : memref<16x64xf32, #tpu.memory_space<vmem>>, vector<2x64xf32>,
    %c6_i32_225 = arith.constant 6 : i32
    %c2_i32_226 = arith.constant 2 : i32
    %671 = arith.muli %c6_i32_225, %c2_i32_226 : i32
    %672 = arith.index_cast %671 : i32 to index
    %c0_227 = arith.constant 0 : index
    %673 = vector.load %arg32[%672, %c0_227] : memref<16x256xf32, #tpu.memory_space<vmem>>, vector<2x256xf32>
    %cst_228 = arith.constant dense<0.000000e+00> : vector<2x256xf32>
    %674 = tpu.matmul %667, %471, %cst_228 {dimension_numbers = #tpu.dot_dimension_numbers<[1], [0], [0], [1], [0, 0, 1, 1], [], []>} : vector<2x64xf32>, vector<64x256xf32>, vector<2x256xf32> -> vector<2x256xf32>
    %675 = arith.addf %673, %674 : vector<2x256xf32>
    %676 = vector.extract_strided_slice %675 {offsets = [0, 0], sizes = [2, 64], strides = [1, 1]} : vector<2x256xf32> to vector<2x64xf32>
    %677 = arith.negf %676 : vector<2x64xf32>
    %678 = math.exp %677 : vector<2x64xf32>
    %cst_229 = arith.constant 1.000000e+00 : f32
    %679 = vector.broadcast %cst_229 : f32 to vector<2x64xf32>
    %680 = arith.addf %679, %678 : vector<2x64xf32>
    %681 = arith.divf %679, %680 : vector<2x64xf32>
    %682 = vector.extract_strided_slice %675 {offsets = [0, 64], sizes = [2, 64], strides = [1, 1]} : vector<2x256xf32> to vector<2x64xf32>
    %683 = arith.negf %682 : vector<2x64xf32>
    %684 = math.exp %683 : vector<2x64xf32>
    %cst_230 = arith.constant 1.000000e+00 : f32
    %685 = vector.broadcast %cst_230 : f32 to vector<2x64xf32>
    %686 = arith.addf %685, %684 : vector<2x64xf32>
    %687 = arith.divf %685, %686 : vector<2x64xf32>
    %688 = vector.extract_strided_slice %675 {offsets = [0, 128], sizes = [2, 64], strides = [1, 1]} : vector<2x256xf32> to vector<2x64xf32>
    %689 = math.tanh %688 : vector<2x64xf32>
    %690 = vector.extract_strided_slice %675 {offsets = [0, 192], sizes = [2, 64], strides = [1, 1]} : vector<2x256xf32> to vector<2x64xf32>
    %691 = arith.negf %690 : vector<2x64xf32>
    %692 = math.exp %691 : vector<2x64xf32>
    %cst_231 = arith.constant 1.000000e+00 : f32
    %693 = vector.broadcast %cst_231 : f32 to vector<2x64xf32>
    %694 = arith.addf %693, %692 : vector<2x64xf32>
    %695 = arith.divf %693, %694 : vector<2x64xf32>
    %696 = arith.mulf %687, %665 : vector<2x64xf32>
    %697 = arith.mulf %681, %689 : vector<2x64xf32>
    %698 = arith.addf %696, %697 : vector<2x64xf32>
    %699 = math.tanh %698 : vector<2x64xf32>
    %700 = arith.mulf %695, %699 : vector<2x64xf32>
    %c2_i32_232 = arith.constant 2 : i32
    %701 = arith.muli %c6_i32_225, %c2_i32_232 : i32
    %702 = arith.index_cast %701 : i32 to index
    %c0_233 = arith.constant 0 : index
    %703 = vector.load %arg33[%702, %c0_233] : memref<16x64xf32, #tpu.memory_space<vmem>>, vector<2x64xf32>
    tpu.vector_store %arg33[%702, %c0_233], %700 {strides = array<i32>} : memref<16x64xf32, #tpu.memory_space<vmem>>, vector<2x64xf32>,
    %c7_i32_234 = arith.constant 7 : i32
    %c2_i32_235 = arith.constant 2 : i32
    %704 = arith.muli %c7_i32_234, %c2_i32_235 : i32
    %705 = arith.index_cast %704 : i32 to index
    %c0_236 = arith.constant 0 : index
    %706 = vector.load %arg32[%705, %c0_236] : memref<16x256xf32, #tpu.memory_space<vmem>>, vector<2x256xf32>
    %cst_237 = arith.constant dense<0.000000e+00> : vector<2x256xf32>
    %707 = tpu.matmul %700, %471, %cst_237 {dimension_numbers = #tpu.dot_dimension_numbers<[1], [0], [0], [1], [0, 0, 1, 1], [], []>} : vector<2x64xf32>, vector<64x256xf32>, vector<2x256xf32> -> vector<2x256xf32>
    %708 = arith.addf %706, %707 : vector<2x256xf32>
    %709 = vector.extract_strided_slice %708 {offsets = [0, 0], sizes = [2, 64], strides = [1, 1]} : vector<2x256xf32> to vector<2x64xf32>
    %710 = arith.negf %709 : vector<2x64xf32>
    %711 = math.exp %710 : vector<2x64xf32>
    %cst_238 = arith.constant 1.000000e+00 : f32
    %712 = vector.broadcast %cst_238 : f32 to vector<2x64xf32>
    %713 = arith.addf %712, %711 : vector<2x64xf32>
    %714 = arith.divf %712, %713 : vector<2x64xf32>
    %715 = vector.extract_strided_slice %708 {offsets = [0, 64], sizes = [2, 64], strides = [1, 1]} : vector<2x256xf32> to vector<2x64xf32>
    %716 = arith.negf %715 : vector<2x64xf32>
    %717 = math.exp %716 : vector<2x64xf32>
    %cst_239 = arith.constant 1.000000e+00 : f32
    %718 = vector.broadcast %cst_239 : f32 to vector<2x64xf32>
    %719 = arith.addf %718, %717 : vector<2x64xf32>
    %720 = arith.divf %718, %719 : vector<2x64xf32>
    %721 = vector.extract_strided_slice %708 {offsets = [0, 128], sizes = [2, 64], strides = [1, 1]} : vector<2x256xf32> to vector<2x64xf32>
    %722 = math.tanh %721 : vector<2x64xf32>
    %723 = vector.extract_strided_slice %708 {offsets = [0, 192], sizes = [2, 64], strides = [1, 1]} : vector<2x256xf32> to vector<2x64xf32>
    %724 = arith.negf %723 : vector<2x64xf32>
    %725 = math.exp %724 : vector<2x64xf32>
    %cst_240 = arith.constant 1.000000e+00 : f32
    %726 = vector.broadcast %cst_240 : f32 to vector<2x64xf32>
    %727 = arith.addf %726, %725 : vector<2x64xf32>
    %728 = arith.divf %726, %727 : vector<2x64xf32>
    %729 = arith.mulf %720, %698 : vector<2x64xf32>
    %730 = arith.mulf %714, %722 : vector<2x64xf32>
    %731 = arith.addf %729, %730 : vector<2x64xf32>
    %732 = math.tanh %731 : vector<2x64xf32>
    %733 = arith.mulf %728, %732 : vector<2x64xf32>
    %c2_i32_241 = arith.constant 2 : i32
    %734 = arith.muli %c7_i32_234, %c2_i32_241 : i32
    %735 = arith.index_cast %734 : i32 to index
    %c0_242 = arith.constant 0 : index
    %736 = vector.load %arg33[%735, %c0_242] : memref<16x64xf32, #tpu.memory_space<vmem>>, vector<2x64xf32>
    tpu.vector_store %arg33[%735, %c0_242], %733 {strides = array<i32>} : memref<16x64xf32, #tpu.memory_space<vmem>>, vector<2x64xf32>,
    %c8_i32_243 = arith.constant 8 : i32
    %c0_244 = arith.constant 0 : index
    %c0_245 = arith.constant 0 : index
    %737 = vector.load %arg33[%c0_244, %c0_245] : memref<16x64xf32, #tpu.memory_space<vmem>>, vector<16x64xf32>
    %c0_246 = arith.constant 0 : index
    %c0_247 = arith.constant 0 : index
    %738 = vector.load %arg29[%c0_246, %c0_247] : memref<1x64xf32, #tpu.memory_space<vmem>>, vector<1x64xf32>
    %739 = vector.broadcast %738 : vector<1x64xf32> to vector<16x64xf32>
    %740 = arith.mulf %737, %739 : vector<16x64xf32>
    %cst_248 = arith.constant dense<0.000000e+00> : vector<16xf32>
    %741 = vector.multi_reduction <add>, %740, %cst_248 [1] : vector<16x64xf32> to vector<16xf32>
    %742 = vector.shape_cast %741 : vector<16xf32> to vector<16x1xf32>
    %c0_249 = arith.constant 0 : index
    %c0_250 = arith.constant 0 : index
    %743 = vector.load %arg30[%c0_249, %c0_250] : memref<1x1xf32, #tpu.memory_space<vmem>>, vector<1x1xf32>
    %744 = vector.broadcast %743 : vector<1x1xf32> to vector<16x1xf32>
    %745 = arith.addf %742, %744 : vector<16x1xf32>
    %c0_251 = arith.constant 0 : index
    %c0_252 = arith.constant 0 : index
    %746 = vector.load %arg31[%c0_251, %c0_252] : memref<16x1xf32, #tpu.memory_space<vmem>>, vector<16x1xf32>
    tpu.vector_store %arg31[%c0_251, %c0_252], %745 {strides = array<i32>} : memref<16x1xf32, #tpu.memory_space<vmem>>, vector<16x1xf32>,
    return
  }
}

</mosaic_0001>

<bundles_post_ra>
// kernel: tpu_custom_call.1
= control target key start
LH: loop header
LB: loop body
LE: loop exit
PB: predicated region body
PF: predicated region fallthrough
CT: control target
= control target key end

     0   :  { %s3559_s6 = smov 1   ;;  %s3560_s10 = smov 2   ;;  %s4469_s0 = inlined_call_operand.smem [shape: u32[32], index: -1, kind: input, shape index: {}] }
   0x1   :  { %s3614_s5 = sld [smem:[%s4469_s0]]   ;;  %s3561_s14 = smov 3  }
   0x2   :  { %s3619_s9 = sld [smem:[%s4469_s0 + %s3559_s6]]   ;;  %s3562_s18 = smov 4  }
   0x3   :  { %s3624_s13 = sld [smem:[%s4469_s0 + %s3560_s10]]   ;;  %s3563_s22 = smov 5  }
   0x4   :  { %s3629_s17 = sld [smem:[%s4469_s0 + %s3561_s14]]   ;;  %s3564_s26 = smov 6  }
   0x5   :  { %s3634_s21 = sld [smem:[%s4469_s0 + %s3562_s18]]   ;;  %s3565_s30 = smov 7  }
   0x6   :  { %s3639_s25 = sld [smem:[%s4469_s0 + %s3563_s22]]   ;;  %s3566_s4 = smov 8  }
   0x7   :  { %s3644_s29 = sld [smem:[%s4469_s0 + %s3564_s26]]   ;;  %s3567_s10 = smov 9  }
   0x8   :  { %s3649_s3 = sld [smem:[%s4469_s0 + %s3565_s30]]   ;;  %s3568_s15 = smov 10  }
   0x9   :  { %s3654_s8 = sld [smem:[%s4469_s0 + %s3566_s4]]   ;;  %s3569_s20 = smov 11  }
   0xa   :  { %s3659_s14 = sld [smem:[%s4469_s0 + %s3567_s10]]   ;;  %s3570_s26 = smov 12  }
   0xb   :  { %4472 = sst [smem:[#allocation23_spill]] %s3634_s21  ;;  %s3571_s1 = smov 13  }
   0xc   :  { %s3664_s19 = sld [smem:[%s4469_s0 + %s3568_s15]]   ;;  %s3572_s7 = smov 14  }
   0xd   :  { %s3669_s24 = sld [smem:[%s4469_s0 + %s3569_s20]]   ;;  %s3573_s15 = smov 15  }
   0xe   :  { %4473 = sst [smem:[#allocation24_spill]] %s3649_s3  ;;  %s3574_s22 = smov 16  }
   0xf   :  { %4474 = sst [smem:[#allocation25_spill]] %s3654_s8  ;;  %s3575_s28 = smov 17  }
  0x10   :  { %4475 = sst [smem:[#allocation26_spill]] %s3659_s14  ;;  %s3589_s16 = smov 31  }
  0x11   :  { %s3674_s30 = sld [smem:[%s4469_s0 + %s3570_s26]]  }
  0x12   :  { %4476 = sst [smem:[#allocation27_spill]] %s3664_s19 }
  0x13   :  { %s3679_s6 = sld [smem:[%s4469_s0 + %s3571_s1]]  }
  0x14   :  { %s3684_s12 = sld [smem:[%s4469_s0 + %s3572_s7]]   ;;  %s3576_s7 = smov 18  }
  0x15   :  { %s3689_s20 = sld [smem:[%s4469_s0 + %s3573_s15]]   ;;  %s3577_s15 = smov 19  }
  0x16   :  { %s3694_s27 = sld [smem:[%s4469_s0 + %s3574_s22]]   ;;  %s3578_s22 = smov 20  }
  0x17   :  { %s3699_s4 = sld [smem:[%s4469_s0 + %s3575_s28]]   ;;  %s3579_s28 = smov 21  }
  0x18   :  { %s3719_s19 = sld [smem:[%s4469_s0 + %s3579_s28]]   ;;  %s3583_s28 = smov 25  }
  0x19   :  { %s3767_s21 = sld [smem:[%s4469_s0 + %s3589_s16]]  }
  0x1a   :  { %4477 = sst [smem:[#allocation28_spill]] %s3684_s12 }
  0x1b   :  { %4478 = sst [smem:[#allocation29_spill]] %s3689_s20 }
  0x1c   :  { %4479 = sst [smem:[#allocation30_spill]] %s3694_s27 }
  0x1d   :  { %s3704_s12 = sld [smem:[%s4469_s0 + %s3576_s7]]   ;;  %s3580_s7 = smov 22  }
  0x1e   :  { %s3709_s20 = sld [smem:[%s4469_s0 + %s3577_s15]]   ;;  %s3581_s15 = smov 23  }
  0x1f   :  { %s3714_s27 = sld [smem:[%s4469_s0 + %s3578_s22]]   ;;  %s3582_s22 = smov 24  }
  0x20   :  { %4482 = sst [smem:[#allocation33_spill]] %s3719_s19 }
  0x21   :  { %s3729_s14 = sld [smem:[%s4469_s0 + %s3581_s15]]   ;;  %s3585_s15 = smov 27  }
  0x22   :  { %s3739_s19 = sld [smem:[%s4469_s0 + %s3583_s28]]   ;;  %s3587_s28 = smov 29  }
  0x23   :  { %4480 = sst [smem:[#allocation31_spill]] %s3704_s12 }
  0x24   :  { %s3724_s12 = sld [smem:[%s4469_s0 + %s3580_s7]]   ;;  %s3584_s7 = smov 26  }
  0x25   :  { %4481 = sst [smem:[#allocation32_spill]] %s3714_s27 }
  0x26   :  { %s3734_s27 = sld [smem:[%s4469_s0 + %s3582_s22]]   ;;  %s3586_s22 = smov 28  }
  0x27   :  { %4483 = sst [smem:[#allocation34_spill]] %s3729_s14 }
  0x28   :  { %4485 = sst [smem:[#allocation36_spill]] %s3739_s19 }
  0x29   :  { %s3744_s8 = sld [smem:[%s4469_s0 + %s3584_s7]]   ;;  %s3588_s7 = smov 30  }
  0x2a   :  { %s3749_s14 = sld [smem:[%s4469_s0 + %s3585_s15]]  }
  0x2b   :  { %s3759_s19 = sld [smem:[%s4469_s0 + %s3587_s28]]  }
  0x2c   :  { %4484 = sst [smem:[#allocation35_spill]] %s3734_s27 }
  0x2d   :  { %s3754_s27 = sld [smem:[%s4469_s0 + %s3586_s22]]  }
  0x2e   :  { %s2978_s3 = sld [smem:[%s4469_s0 + %s3588_s7]]  }
  0x34   :  { %v68_v0 = vstv %s2978_s3 }
  0x35   :  { %69 = vst [vmem:[#allocation4] sm:$0x1] %v68_v0 }
  0x36   :  { %70 = vsyncpa [#allocation6], 0 }
  0x37   :  { %71 = vsyncpa [#allocation8], 0 }
  0x38   :  { %72 = vsyncpa [#allocation11], 0 }
  0x39   :  { %73 = vsyncpa [#allocation14], 0 }
  0x3a   :  { %74 = vsyncpa [#allocation17], 0  ;;  %s114_s22 = sshll.u32 %s3674_s30, 4  ;;  %s3590_s23 = smov [#allocation7]   ;;  %s115_s22 = int_to_ptr.hbm [resolvable:$true] %s114_s22 }
  0x3b   :  { %s116_s26 = sshll.u32 %s3590_s23, 4  ;;  %s146_s28 = sshll.u32 %s3699_s4, 4  ;;  %s117_s26 = int_to_ptr.vmem [resolvable:$true] %s116_s26  ;;  %s147_s28 = int_to_ptr.hbm [resolvable:$true] %s146_s28 }
  0x3c   :  { %s3357_s1 = sshra.s32 %s115_s22, 4  ;;  %s3361_s3 = scalar_lea.hbm %s3674_s30, 64  ;;  %s3358_s1 = int_to_ptr.hbm [resolvable:$true] %s3357_s1 }
  0x3d   :  { %s3359_s0 = scalar_lea.hbm %s3358_s1, 64  ;;  %p3362_p1 = scmp.lt.s32.totalorder %s3358_s1, %s3674_s30 }
  0x3e   :  { %p3360_p0 = scmp.ne.s32.totalorder %s3358_s1, %s3359_s0  ;;  %p3363_p2 = scmp.lt.s32.totalorder %s3361_s3, %s3359_s0 }
  0x40   :  { %p3364_p3 = por %p3363_p2, %p3362_p1 }
  0x42   :  { %p3365_p4 = pnand %p3364_p3, %p3360_p0 }
  0x44   :  { %3368 = shalt.err (!%p3365_p4)
}
  0x45   :  { %s3591_s2 = smov 128   ;;  %s3592_s7 = smov 8  }
  0x46   :  { %122 = dma.hbm_to_vmem [thread:$0]  %s115_s22, 1024, %s117_s26, [#allocation8], %s3591_s2, %s3591_s2, %s3592_s7  }
  0x47   :  { %s3593_s10 = smov [#allocation10]   ;;  %s178_s16 = sshll.u32 %s3724_s12, 4  ;;  %s3777_s16 = int_to_ptr.hbm [resolvable:$true] %s178_s16 }
  0x48   :  { %s148_s11 = sshll.u32 %s3593_s10, 4  ;;  %s3381_s30 = sshra.s32 %s147_s28, 4  ;;  %s149_s11 = int_to_ptr.vmem [resolvable:$true] %s148_s11  ;;  %s3382_s30 = int_to_ptr.hbm [resolvable:$true] %s3381_s30 }
  0x49   :  { %s3383_s15 = scalar_lea.hbm %s3382_s30, 64  ;;  %s3385_s18 = scalar_lea.hbm %s3699_s4, 64 }
  0x4a   :  { %p3384_p5 = scmp.ne.s32.totalorder %s3382_s30, %s3383_s15  ;;  %p3386_p6 = scmp.lt.s32.totalorder %s3382_s30, %s3699_s4 }
  0x4b   :  { %p3387_p7 = scmp.lt.s32.totalorder %s3385_s18, %s3383_s15 }
  0x4d   :  { %p3388_p8 = por %p3387_p7, %p3386_p6 }
  0x4f   :  { %p3389_p9 = pnand %p3388_p8, %p3384_p5 }
  0x51   :  { %3392 = shalt.err (!%p3389_p9)
}
  0x52   :  { %154 = dma.hbm_to_vmem [thread:$0]  %s147_s28, 1024, %s149_s11, [#allocation11], %s3591_s2, %s3591_s2, %s3592_s7  }
  0x53   :  { %s101_s22 = sshll.u32 %s3669_s24, 4  ;;  %s3594_s23 = smov [#allocation13]   ;;  %s3785_s22 = int_to_ptr.hbm [resolvable:$true] %s101_s22 }
  0x54   :  { %s180_s26 = sshll.u32 %s3594_s23, 4  ;;  %s3405_s1 = sshra.s32 %s3777_s16, 4  ;;  %s181_s26 = int_to_ptr.vmem [resolvable:$true] %s180_s26  ;;  %s3406_s1 = int_to_ptr.hbm [resolvable:$true] %s3405_s1 }
  0x55   :  { %s3407_s4 = scalar_lea.hbm %s3406_s1, 64  ;;  %s3409_s0 = scalar_lea.hbm %s3724_s12, 64 }
  0x56   :  { %p3408_p10 = scmp.ne.s32.totalorder %s3406_s1, %s3407_s4  ;;  %p3410_p11 = scmp.lt.s32.totalorder %s3406_s1, %s3724_s12 }
  0x57   :  { %p3411_p12 = scmp.lt.s32.totalorder %s3409_s0, %s3407_s4 }
  0x59   :  { %p3412_p13 = por %p3411_p12, %p3410_p11 }
  0x5b   :  { %p3413_p0 = pnand %p3412_p13, %p3408_p10 }
  0x5d   :  { %3416 = shalt.err (!%p3413_p0)
}
  0x5e   :  { %186 = dma.hbm_to_vmem [thread:$0]  %s3777_s16, 1024, %s181_s26, [#allocation14], %s3591_s2, %s3591_s2, %s3592_s7  }
  0x5f   :  { %s3595_s28 = smov [#allocation5]   ;;  %s127_s10 = sshll.u32 %s3679_s6, 4  ;;  %s3795_s10 = int_to_ptr.hbm [resolvable:$true] %s127_s10 }
  0x60   :  { %s103_s3 = sshll.u32 %s3595_s28, 4  ;;  %s3429_s12 = sshra.s32 %s3785_s22, 4  ;;  %s104_s3 = int_to_ptr.vmem [resolvable:$true] %s103_s3  ;;  %s3430_s12 = int_to_ptr.hbm [resolvable:$true] %s3429_s12 }
  0x61   :  { %s3431_s11 = scalar_lea.hbm %s3430_s12, 64  ;;  %s3433_s30 = scalar_lea.hbm %s3669_s24, 64 }
  0x62   :  { %p3432_p1 = scmp.ne.s32.totalorder %s3430_s12, %s3431_s11  ;;  %p3434_p2 = scmp.lt.s32.totalorder %s3430_s12, %s3669_s24 }
  0x63   :  { %p3435_p3 = scmp.lt.s32.totalorder %s3433_s30, %s3431_s11 }
  0x65   :  { %p3436_p4 = por %p3435_p3, %p3434_p2 }
  0x67   :  { %p3437_p5 = pnand %p3436_p4, %p3432_p1 }
  0x69   :  { %3440 = shalt.err (!%p3437_p5)
}
  0x6a   :  { %109 = dma.hbm_to_vmem [thread:$0]  %s3785_s22, 1024, %s104_s3, [#allocation6], %s3591_s2, %s3591_s2, %s3592_s7  }
  0x6b   :  { %s161_s16 = sshll.u32 %s3709_s20, 4  ;;  %s3596_s15 = smov [#allocation9]   ;;  %s3805_s16 = int_to_ptr.hbm [resolvable:$true] %s161_s16 }
  0x6c   :  { %s129_s18 = sshll.u32 %s3596_s15, 4  ;;  %s3453_s24 = sshra.s32 %s3795_s10, 4  ;;  %s130_s18 = int_to_ptr.vmem [resolvable:$true] %s129_s18  ;;  %s3454_s24 = int_to_ptr.hbm [resolvable:$true] %s3453_s24 }
  0x6d   :  { %s3455_s23 = scalar_lea.hbm %s3454_s24, 64  ;;  %s3457_s26 = scalar_lea.hbm %s3679_s6, 64 }
  0x6e   :  { %p3456_p6 = scmp.ne.s32.totalorder %s3454_s24, %s3455_s23  ;;  %p3458_p7 = scmp.lt.s32.totalorder %s3454_s24, %s3679_s6 }
  0x6f   :  { %p3459_p8 = scmp.lt.s32.totalorder %s3457_s26, %s3455_s23 }
  0x71   :  { %p3460_p9 = por %p3459_p8, %p3458_p7 }
  0x73   :  { %p3461_p10 = pnand %p3460_p9, %p3456_p6 }
  0x75   :  { %3464 = shalt.err (!%p3461_p10)
}
  0x76   :  { %135 = dma.hbm_to_vmem [thread:$0]  %s3795_s10, 1024, %s130_s18, [#allocation8], %s3591_s2, %s3591_s2, %s3592_s7  }
  0x77   :  { %s3597_s22 = smov [#allocation12]   ;;  %s197_s4 = sshll.u32 %s3744_s8, 4  ;;  %s3815_s4 = int_to_ptr.hbm [resolvable:$true] %s197_s4 }
  0x78   :  { %s163_s1 = sshll.u32 %s3597_s22, 4  ;;  %s3477_s6 = sshra.s32 %s3805_s16, 4  ;;  %s164_s1 = int_to_ptr.vmem [resolvable:$true] %s163_s1  ;;  %s3478_s6 = int_to_ptr.hbm [resolvable:$true] %s3477_s6 }
  0x79   :  { %s3479_s0 = scalar_lea.hbm %s3478_s6, 64  ;;  %s3481_s28 = scalar_lea.hbm %s3709_s20, 64 }
  0x7a   :  { %p3480_p11 = scmp.ne.s32.totalorder %s3478_s6, %s3479_s0  ;;  %p3482_p12 = scmp.lt.s32.totalorder %s3478_s6, %s3709_s20 }
  0x7b   :  { %p3483_p13 = scmp.lt.s32.totalorder %s3481_s28, %s3479_s0 }
  0x7d   :  { %p3484_p0 = por %p3483_p13, %p3482_p12 }
  0x7f   :  { %p3485_p1 = pnand %p3484_p0, %p3480_p11 }
  0x81   :  { %3488 = shalt.err (!%p3485_p1)
}
  0x82   :  { %169 = dma.hbm_to_vmem [thread:$0]  %s3805_s16, 1024, %s164_s1, [#allocation11], %s3591_s2, %s3591_s2, %s3592_s7  }
  0x83   :  { %s3598_s3 = smov [#allocation15]   ;;  %s210_s12 = sshll.u32 %s3749_s14, 4  ;;  %s211_s12 = int_to_ptr.hbm [resolvable:$true] %s210_s12 }
  0x84   :  { %s199_s10 = sshll.u32 %s3598_s3, 4  ;;  %s3501_s11 = sshra.s32 %s3815_s4, 4  ;;  %s200_s10 = int_to_ptr.vmem [resolvable:$true] %s199_s10  ;;  %s3502_s11 = int_to_ptr.hbm [resolvable:$true] %s3501_s11 }
  0x85   :  { %s3503_s20 = scalar_lea.hbm %s3502_s11, 256  ;;  %s3505_s30 = scalar_lea.hbm %s3744_s8, 256 }
  0x86   :  { %p3504_p2 = scmp.ne.s32.totalorder %s3502_s11, %s3503_s20  ;;  %p3506_p3 = scmp.lt.s32.totalorder %s3502_s11, %s3744_s8 }
  0x87   :  { %p3507_p4 = scmp.lt.s32.totalorder %s3505_s30, %s3503_s20 }
  0x89   :  { %p3508_p5 = por %p3507_p4, %p3506_p3 }
  0x8b   :  { %p3509_p6 = pnand %p3508_p5, %p3504_p2 }
  0x8d   :  { %3512 = shalt.err (!%p3509_p6)
}
  0x8e   :  { %s3599_s15 = smov 256   ;;  %s3600_s18 = smov 16  }
  0x8f   :  { %205 = dma.hbm_to_vmem [thread:$0]  %s3815_s4, 4096, %s200_s10, [#allocation14], %s3599_s15, %s3599_s15, %s3600_s18  }
  0x90   :  { %s3601_s2 = smov [#allocation16]   ;;  %s3525_s16 = sshra.s32 %s211_s12, 4  ;;  %s3526_s16 = int_to_ptr.hbm [resolvable:$true] %s3525_s16 }
  0x91   :  { %s212_s7 = sshll.u32 %s3601_s2, 4  ;;  %s3527_s24 = scalar_lea.hbm %s3526_s16, 256  ;;  %s213_s7 = int_to_ptr.vmem [resolvable:$true] %s212_s7 }
  0x92   :  { %p3528_p7 = scmp.ne.s32.totalorder %s3526_s16, %s3527_s24  ;;  %s3529_s23 = scalar_lea.hbm %s3749_s14, 256 }
  0x93   :  { %p3530_p8 = scmp.lt.s32.totalorder %s3526_s16, %s3749_s14  ;;  %p3531_p9 = scmp.lt.s32.totalorder %s3529_s23, %s3527_s24 }
  0x95   :  { %p3532_p10 = por %p3531_p9, %p3530_p8 }
  0x97   :  { %p3533_p11 = pnand %p3532_p10, %p3528_p7 }
  0x99   :  { %3536 = shalt.err (!%p3533_p11)
}
  0x9a   :  { %218 = dma.hbm_to_vmem [thread:$0]  %s211_s12, 4096, %s213_s7, [#allocation17], %s3599_s15, %s3599_s15, %s3600_s18  }
  0x9b   :  { %3549 = dma.done.wait [#allocation6], 1024  }
  0x9c   :  { %3550 = vsyncadd [#allocation6], 4294966272 }
  0x9d   :  { %3551 = dma.done.wait [#allocation8], 2048  }
  0x9e   :  { %3552 = vsyncadd [#allocation8], 4294965248 }
  0x9f   :  { %3553 = dma.done.wait [#allocation11], 2048  }
  0xa0   :  { %3554 = vsyncadd [#allocation11], 4294965248 }
  0xa1   :  { %3555 = dma.done.wait [#allocation14], 5120  }
  0xa2   :  { %3556 = vsyncadd [#allocation14], 4294962176 }
  0xa3   :  { %3557 = dma.done.wait [#allocation17], 4096  }
  0xa4   :  { %3558 = vsyncadd [#allocation17], 4294963200  ;;  %v3602_v1 = vmov 0   ;;  %v366_v2 = vld [vmem:[%s3624_s13] sm:$0xff]  ;;  %v261_v4 = vld [vmem:[%s3614_s5 + $0x8] sm:$0xff]  ;;  %s4486_s8 = sld [smem:[#allocation23_spill]]  ;;  %v258_v16 = vlaneseq }
  0xa5   :  { %3127 = vset.pattern.permute.xlu1 %v3602_v1  ;;  %3126 = vset.pattern.permute.xlu0 %v3602_v1  ;;  %v315_v3 = vld [vmem:[%s3619_s9] sm:$0xff]  ;;  %v367_v5 = vld [vmem:[%s3624_s13 + $0x8] sm:$0xff]  ;;  %s4487_s14 = sld [smem:[#allocation24_spill]]  ;;  %vm283_vm0 = vcmask 1042432   ;;  %vm337_vm1 = vcmask 1046528   ;;  %vm503_vm2 = vcmask 1040384  }
  0xa6   :  { %3128 = vset.pattern.permute.xlu2 %v3602_v1  ;;  %369 = vperm.xlu0 %3126, %v366_v2   ;;  %v260_v6 = vld [vmem:[%s3614_s5] sm:$0xff]  ;;  %v316_v7 = vld [vmem:[%s3619_s9 + $0x8] sm:$0xff]  ;;  %v259_v18 = vand.u32 127, %v258_v16  ;;  %vm381_vm3 = vcmask 23552   ;;  %vm330_vm4 = vcmask 56320   ;;  %v3603_v21 = vmov 0.0  }
  0xa7   :  { %318 = vperm.xlu1 %3127, %v315_v3   ;;  %266 = vperm.xlu2 %3128, %v261_v4   ;;  %v481_v8 = vld [vmem:[%s3629_s17 + $0x8] sm:$0xff]  ;;  %v480_v9 = vld [vmem:[%s3629_s17] sm:$0xff]  ;;  %vm276_vm8 = vcmask 89088   ;;  %s4488_s5 = sld [smem:[#allocation25_spill]]  ;;  %vm496_vm12 = vcmask 72704   ;;  %vm418_vm15 = vcmask 523264  }
  0xa8   :  { %v380_v10 = vld [vmem:[%s3644_s29] sm:$0x7]  ;;  %v3604_v50 = vmov 64.0   ;;  %v579_v3 = vld [vmem:[#allocation7 + $0x38] sm:$0xff]  ;;  %s4489_s9 = sld [smem:[#allocation26_spill]]  ;;  %s3605_s28 = smov 64  }
  0xa9   :  { %2992 = vmatpush.msk.msra.mxu2 %vm283_vm0, %v380_v10  ;;  %v329_v11 = vld [vmem:[%s3639_s25] sm:$0x7f]  ;;  %3143 = vrcp.f32 %v3604_v50  ;;  %v618_v4 = vld [vmem:[#allocation9 + $0x38] sm:$0xff]  ;;  %v615_v10 = vld [vmem:[#allocation9 + $0x20] sm:$0xff]  ;;  %s4490_s13 = sld [smem:[#allocation27_spill]] }
  0xaa   :  { %2987 = vmatpush.msk.msra.mxu1 %vm337_vm1, %v329_v11  ;;  %v275_v12 = vld [vmem:[%s4486_s8 + $0x8] sm:$0x7]  ;;  %v274_v13 = vld [vmem:[%s4486_s8] sm:$0xff]  ;;  %s4491_s17 = sld [smem:[#allocation28_spill]] }
  0xab   :  { %2982 = vmatpush.msk.msra.mxu0 %vm283_vm0, %v275_v12  ;;  %v495_v14 = vld [vmem:[%s4487_s14 + $0x8] sm:$0x1]  ;;  %v494_v15 = vld [vmem:[%s4487_s14] sm:$0xff]  ;;  %596 = vmatpush.msrb.mxu2 %v579_v3  ;;  %v575_v11 = vld [vmem:[#allocation7 + $0x18] sm:$0xff]  ;;  %s4492_s25 = sld [smem:[#allocation29_spill]] }
  0xac   :  { %2997 = vmatpush.msk.msra.mxu3 %vm503_vm2, %v495_v14  ;;  %v614_v12 = vld [vmem:[#allocation9 + $0x18] sm:$0xff]  ;;  %v613_v14 = vld [vmem:[#allocation9 + $0x10] sm:$0xff]  ;;  %v573_v16 = vld [vmem:[#allocation7 + $0x8] sm:$0xff]  ;;  %s4493_s29 = sld [smem:[#allocation30_spill]] }
  0xad   :  { %302 = vmatpush.msra.mxu0 %v274_v13  ;;  %v3129_v35 = vld [vmem:[%s4488_s5] ss:$0 sm:$0xff]  ;;  %v574_v13 = vld [vmem:[#allocation7 + $0x10] sm:$0xff]  ;;  %v658_v3 = vld [vmem:[#allocation12 + $0x20] sm:$0xff]  ;;  %s4494_s26 = sld [smem:[#allocation31_spill]] }
  0xae   :  { %263 = vperm.xlu0 %3126, %v260_v6   ;;  %522 = vmatpush.msra.mxu3 %v494_v15  ;;  %v617_v6 = vld [vmem:[#allocation9 + $0x30] sm:$0xff]  ;;  %v539_v15 = vld [vmem:[#allocation5 + $0x38] sm:$0xff]  ;;  %s4495_s22 = sld [smem:[#allocation32_spill]] }
  0xaf   :  { %372 = vperm.xlu1 %3127, %v367_v5   ;;  %321 = vperm.xlu2 %3128, %v316_v7   ;;  %v3144_v51 = vpop.eup %3143  ;;  %v578_v5 = vld [vmem:[#allocation7 + $0x30] sm:$0xff]  ;;  %v577_v7 = vld [vmem:[#allocation7 + $0x28] sm:$0xff]  ;;  %s4496_s1 = sld [smem:[#allocation33_spill]] }
  0xb0   :  { %v426_v52 = vmul.f32 64.0, %v3144_v51  ;;  %vm430_vm0 = vweird.f32 %v3144_v51  ;;  %631 = vmatpush.msrb.mxu0 %v618_v4  ;;  %597 = vmatpush.msrb.mxu2 %v578_v5  ;;  %v657_v4 = vld [vmem:[#allocation12 + $0x18] sm:$0xff]  ;;  %v656_v5 = vld [vmem:[#allocation12 + $0x10] sm:$0xff]  ;;  %s4497_s4 = sld [smem:[#allocation34_spill]] }
  0xb1   :  { %560 = vmatpush.msrb.mxu1 %v539_v15  ;;  %s4498_s6 = sld [smem:[#allocation35_spill]] }
  0xb2   :  { %v427_v53 = vsub.f32 1.0, %v426_v52  ;;  %632 = vmatpush.msrb.mxu0 %v617_v6  ;;  %598 = vmatpush.msrb.mxu2 %v577_v7  ;;  %v655_v6 = vld [vmem:[#allocation12 + $0x8] sm:$0xff]  ;;  %v654_v7 = vld [vmem:[#allocation12] sm:$0xff]  ;;  %s4499_s0 = sld [smem:[#allocation36_spill]] }
  0xb4   :  { %v428_v54 = vmul.f32 %v3144_v51, %v427_v53 }
  0xb6   :  { %483 = vperm.xlu0 %3126, %v480_v9   ;;  %v429_v55 = vadd.f32 %v3144_v51, %v428_v54  ;;  %v576_v9 = vld [vmem:[#allocation7 + $0x20] sm:$0xff] }
  0xb7   :  { %486 = vperm.xlu1 %3127, %v481_v8   ;;  %v616_v8 = vld [vmem:[#allocation9 + $0x28] sm:$0xff]  ;;  %599 = vmatpush.msrb.mxu2 %v576_v9 }
  0xb8   :  { %v3860_v56 = vsel %vm430_vm0, %v3144_v51, %v429_v55  ;;  %633 = vmatpush.msrb.mxu0 %v616_v8  ;;  %v3134_v9 = vld [vmem:[%s4491_s17] ss:$0 sm:$0xff] }
  0xb9   :  { %600 = vmatpush.msrb.mxu2 %v575_v11 }
  0xba   :  { %634 = vmatpush.msrb.mxu0 %v615_v10  ;;  %v3133_v10 = vld [vmem:[%s4492_s25] ss:$0 sm:$0xff] }
  0xbb   :  { %601 = vmatpush.msrb.mxu2 %v574_v13 }
  0xbc   :  { %635 = vmatpush.msrb.mxu0 %v614_v12 }
  0xbd   :  { %602 = vmatpush.msrb.mxu2 %v573_v16 }
  0xbe   :  { %636 = vmatpush.msrb.mxu0 %v613_v14 }
 0x101   :  { %v267_v17 = vpop.permute.xlu2 %266 }
 0x102   :  { %vm269_vm11 = vcmp.eq.s32.totalorder %v259_v18, %v267_v17  ;;  %v612_v17 = vld [vmem:[#allocation9 + $0x8] sm:$0xff] }
 0x103   :  { %v2981_v31 = vsel %vm269_vm11, 1.0, %v3603_v21  ;;  %637 = vmatpush.msrb.mxu0 %v612_v17 }
 0x109   :  { %v322_v24 = vpop.permute.xlu2 %321 }
 0x10a   :  { %vm324_vm7 = vcmp.eq.s32.totalorder %v259_v18, %v322_v24 }
 0x10b   :  { %v2986_v27 = vsel %vm324_vm7, 1.0, %v3603_v21  ;;  %vm548_vm7 = vcmask 1041409  }
 0x118   :  { %v370_v19 = vpop.permute.xlu0 %369 }
 0x119   :  { %v319_v20 = vpop.permute.xlu1 %318  ;;  %vm374_vm5 = vcmp.eq.s32.totalorder %v259_v18, %v370_v19  ;;  %v572_v19 = vld [vmem:[#allocation7] sm:$0xff] }
 0x11a   :  { %vm323_vm6 = vcmp.eq.s32.totalorder %v259_v18, %v319_v20  ;;  %v2990_v22 = vsel %vm374_vm5, 1.0, %v3603_v21  ;;  %v611_v20 = vld [vmem:[#allocation9] sm:$0xff]  ;;  %603 = vmatpush.msrb.mxu2 %v572_v19 }
 0x11b   :  { %v2985_v23 = vsel %vm323_vm6, 1.0, %v3603_v21  ;;  %2993 = vmatmul.msk.f32.vlgmr.msra.gmra.mxu2 %vm381_vm3, %v2990_v22  ;;  %v537_v22 = vld [vmem:[#allocation5 + $0x28] sm:$0xff]  ;;  %638 = vmatpush.msrb.mxu0 %v611_v20 }
 0x11c   :  { %2988 = vmatmul.msk.f32.vlgmr.msra.gmra.mxu1 %vm330_vm4, %v2985_v23  ;;  %v536_v23 = vld [vmem:[#allocation5 + $0x20] sm:$0xff] }
 0x120   :  { %v264_v26 = vpop.permute.xlu0 %263 }
 0x121   :  { %v373_v25 = vpop.permute.xlu1 %372  ;;  %vm268_vm10 = vcmp.eq.s32.totalorder %v259_v18, %v264_v26 }
 0x122   :  { %vm375_vm9 = vcmp.eq.s32.totalorder %v259_v18, %v373_v25  ;;  %v2980_v29 = vsel %vm268_vm10, 1.0, %v3603_v21  ;;  %v535_v25 = vld [vmem:[#allocation5 + $0x18] sm:$0xff] }
 0x123   :  { %v2991_v28 = vsel %vm375_vm9, 1.0, %v3603_v21  ;;  %2983 = vmatmul.msk.f32.vlgmr.msra.gmra.mxu0 %vm276_vm8, %v2980_v29  ;;  %v533_v29 = vld [vmem:[#allocation5 + $0x8] sm:$0xff] }
 0x124   :  { %2994 = vmatmul.msk.f32.gmra.mxu2 %vm381_vm3, %v2991_v28  ;;  %2989 = vmatmul.msk.f32.gmra.mxu1 %vm330_vm4, %v2986_v27  ;;  %v534_v27 = vld [vmem:[#allocation5 + $0x10] sm:$0xff] }
 0x128   :  { %v484_v30 = vpop.permute.xlu0 %483 }
 0x129   :  { %vm488_vm13 = vcmp.eq.s32.totalorder %v259_v18, %v484_v30  ;;  %v487_v33 = vpop.permute.xlu1 %486  ;;  %v532_v30 = vld [vmem:[#allocation5] sm:$0xff] }
 0x12a   :  { %v2995_v32 = vsel %vm488_vm13, 1.0, %v3603_v21  ;;  %vm489_vm14 = vcmp.eq.s32.totalorder %v259_v18, %v487_v33  ;;  %v538_v18 = vld [vmem:[#allocation5 + $0x30] sm:$0xff] }
 0x12b   :  { %2984 = vmatmul.msk.f32.gmra.mxu0 %vm276_vm8, %v2981_v31  ;;  %2998 = vmatmul.msk.f32.vlgmr.msra.gmra.mxu3 %vm496_vm12, %v2995_v32  ;;  %v2996_v34 = vsel %vm489_vm14, 1.0, %v3603_v21 }
 0x12c   :  { %561 = vmatpush.msrb.mxu1 %v538_v18 }
 0x12e   :  { %562 = vmatpush.msrb.mxu1 %v537_v22 }
 0x130   :  { %563 = vmatpush.msrb.mxu1 %v536_v23 }
 0x132   :  { %564 = vmatpush.msrb.mxu1 %v535_v25 }
 0x133   :  { %2999 = vmatmul.msk.f32.gmra.mxu3 %vm496_vm12, %v2996_v34 }
 0x134   :  { %565 = vmatpush.msrb.mxu1 %v534_v27 }
 0x136   :  { %566 = vmatpush.msrb.mxu1 %v533_v29 }
 0x138   :  { %567 = vmatpush.msrb.mxu1 %v532_v30 }
 0x199   :  { %v358_v36 = vpop.f32.mrf.mxu1 }
 0x19e   :  { %v408_v39 = vpop.f32.mrf.mxu2 }
 0x1a0   :  { %v304_v37 = vpop.f32.mrf.mxu0 }
 0x1a1   :  { %v313_v38 = vadd.f32 %v3129_v35, %v304_v37  ;;  %v361_v45 = vpop.f32.mrf.mxu1 }
 0x1a3   :  { %v364_v40 = vadd.f32 %v358_v36, %v313_v38 }
 0x1a5   :  { %v414_v41 = vadd.f32 %v408_v39, %v364_v40 }
 0x1a7   :  { %v419_v42 = vsel %vm418_vm15, %v414_v41, 0.0  ;;  %v411_v47 = vpop.f32.mrf.mxu2 }
 0x1a8   :  { %v307_v43 = vpop.f32.mrf.mxu0  ;;  %420 = vadd.xlane.f32.xlu2 %v419_v42  ;;  %v3130_v42 = vld [vmem:[%s4489_s9] ss:$0 sm:$0xff] }
 0x1a9   :  { %v314_v44 = vadd.f32 %v3129_v35, %v307_v43 }
 0x1ab   :  { %v365_v46 = vadd.f32 %v361_v45, %v314_v44 }
 0x1ad   :  { %v415_v48 = vadd.f32 %v411_v47, %v365_v46  ;;  %v3131_v46 = vld [vmem:[%s4490_s13] ss:$0 sm:$0xff] }
 0x1af   :  { %v422_v49 = vsel %vm418_vm15, %v415_v48, 0.0 }
 0x1b0   :  { %423 = vadd.xlane.f32.xlu0 %v422_v49  ;;  %v524_v49 = vpop.f32.mrf.mxu3 }
 0x21b   :  { %v421_v57 = vpop.xlane.xlu2 %420 }
 0x21c   :  { %v432_v58 = vmul.f32 %v3860_v56, %v421_v57 }
 0x21e   :  { %v3863_v59 = vsub.f32 %v414_v41, %v432_v58 }
 0x220   :  { %v436_v60 = vmul.f32 %v3863_v59, %v3863_v59 }
 0x222   :  { %v438_v61 = vsel %vm418_vm15, %v436_v60, 0.0 }
 0x223   :  { %v424_v62 = vpop.xlane.xlu0 %423  ;;  %439 = vadd.xlane.f32.xlu1 %v438_v61 }
 0x224   :  { %v433_v63 = vmul.f32 %v3860_v56, %v424_v62 }
 0x226   :  { %v3869_v0 = vsub.f32 %v415_v48, %v433_v63 }
 0x228   :  { %v437_v1 = vmul.f32 %v3869_v0, %v3869_v0 }
 0x22a   :  { %v441_v2 = vsel %vm418_vm15, %v437_v1, 0.0  ;;  %v660_v1 = vld [vmem:[#allocation12 + $0x30] sm:$0xff] }
 0x22b   :  { %442 = vadd.xlane.f32.xlu2 %v441_v2  ;;  %v659_v2 = vld [vmem:[#allocation12 + $0x28] sm:$0xff] }
 0x296   :  { %v440_v24 = vpop.xlane.xlu1 %439 }
 0x297   :  { %v444_v26 = vmul.f32 %v440_v24, %v3860_v56 }
 0x299   :  { %v446_v28 = vadd.f32 1e-05, %v444_v26 }
 0x29b   :  { %3145 = vrsqrt.f32 %v446_v28  ;;  %vm454_vm2 = vweird.f32 %v446_v28 }
 0x29e   :  { %v443_v31 = vpop.xlane.xlu2 %442 }
 0x29f   :  { %v445_v32 = vmul.f32 %v443_v31, %v3860_v56 }
 0x2a1   :  { %v3146_v33 = vpop.eup %3145  ;;  %v447_v34 = vadd.f32 1e-05, %v445_v32 }
 0x2a2   :  { %v449_v35 = vmul.f32 %v3146_v33, %v446_v28  ;;  %vm455_vm1 = vweird.f32 %v3146_v33 }
 0x2a3   :  { %3147 = vrsqrt.f32 %v447_v34  ;;  %vm456_vm3 = vmor %vm454_vm2, %vm455_vm1  ;;  %vm464_vm5 = vweird.f32 %v447_v34 }
 0x2a4   :  { %v450_v36 = vmul.f32 %v3146_v33, %v449_v35 }
 0x2a6   :  { %v451_v37 = vmul.f32 0.5, %v450_v36 }
 0x2a8   :  { %v452_v38 = vsub.f32 1.5, %v451_v37 }
 0x2a9   :  { %v3148_v39 = vpop.eup %3147 }
 0x2aa   :  { %v453_v40 = vmul.f32 %v3146_v33, %v452_v38  ;;  %v459_v41 = vmul.f32 %v3148_v39, %v447_v34  ;;  %vm465_vm4 = vweird.f32 %v3148_v39 }
 0x2ab   :  { %vm466_vm6 = vmor %vm464_vm5, %vm465_vm4  ;;  %vm956_vm5 = vcmask 1043459  }
 0x2ac   :  { %v457_v43 = vsel %vm456_vm3, %v3146_v33, %v453_v40  ;;  %v460_v44 = vmul.f32 %v3148_v39, %v459_v41 }
 0x2ad   :  { %v468_v45 = vmul.f32 %v457_v43, %v3863_v59  ;;  %v527_v59 = vpop.f32.mrf.mxu3  ;;  %v754_v43 = vld [vmem:[#allocation10 + $0x38] sm:$0xff] }
 0x2ae   :  { %v461_v47 = vmul.f32 0.5, %v460_v44  ;;  %772 = vmatpush.msra.mxu1 %v754_v43 }
 0x2af   :  { %v473_v48 = vmul.f32 %v3130_v42, %v468_v45 }
 0x2b0   :  { %v462_v50 = vsub.f32 1.5, %v461_v47  ;;  %v753_v47 = vld [vmem:[#allocation10 + $0x30] sm:$0xff] }
 0x2b1   :  { %v478_v51 = vadd.f32 %v3131_v46, %v473_v48  ;;  %773 = vmatpush.msra.mxu1 %v753_v47 }
 0x2b2   :  { %v463_v52 = vmul.f32 %v3148_v39, %v462_v50  ;;  %v751_v50 = vld [vmem:[#allocation10 + $0x20] sm:$0xff] }
 0x2b3   :  { %v3879_v53 = vadd.f32 %v524_v49, %v478_v51  ;;  %v752_v49 = vld [vmem:[#allocation10 + $0x28] sm:$0xff] }
 0x2b4   :  { %v467_v54 = vsel %vm466_vm6, %v3148_v39, %v463_v52  ;;  %774 = vmatpush.msra.mxu1 %v752_v49  ;;  %v750_v52 = vld [vmem:[#allocation10 + $0x18] sm:$0xff]  ;;  %vm961_vm6 = vcmask 1045509  }
 0x2b5   :  { %v469_v55 = vmul.f32 %v467_v54, %v3869_v0  ;;  %3001 = vmatmul.msk.f32.vlgmr.msrb.gmra.mxu2 %vm418_vm15, %v3879_v53  ;;  %3003 = vmatmul.msk.f32.vlgmr.msrb.gmra.mxu0 %vm418_vm15, %v3879_v53  ;;  %v546_v61 = vrot.slane %v3879_v53, 7  ;;  %v661_v0 = vld [vmem:[#allocation12 + $0x38] sm:$0xff] }
 0x2b6   :  { %676 = vmatpush.msrb.mxu3 %v661_v0  ;;  %775 = vmatpush.msra.mxu1 %v751_v50  ;;  %v747_v0 = vld [vmem:[#allocation10] sm:$0xff] }
 0x2b7   :  { %v474_v57 = vmul.f32 %v3130_v42, %v469_v55  ;;  %v749_v55 = vld [vmem:[#allocation10 + $0x10] sm:$0xff] }
 0x2b8   :  { %677 = vmatpush.msrb.mxu3 %v660_v1  ;;  %776 = vmatpush.msra.mxu1 %v750_v52 }
 0x2b9   :  { %v479_v58 = vadd.f32 %v3131_v46, %v474_v57 }
 0x2ba   :  { %678 = vmatpush.msrb.mxu3 %v659_v2  ;;  %777 = vmatpush.msra.mxu1 %v749_v55  ;;  %v855_v55 = vld [vmem:[#allocation13 + $0x28] sm:$0xff] }
 0x2bb   :  { %v3886_v60 = vadd.f32 %v527_v59, %v479_v58 }
 0x2bc   :  { %679 = vmatpush.msrb.mxu3 %v658_v3 }
 0x2bd   :  { %3002 = vmatmul.msk.f32.gmra.mxu2 %vm418_vm15, %v3886_v60  ;;  %3004 = vmatmul.msk.f32.gmra.mxu0 %vm418_vm15, %v3886_v60  ;;  %v547_v62 = vrot.slane %v3886_v60, 6 }
 0x2be   :  { %680 = vmatpush.msrb.mxu3 %v657_v4 }
 0x2bf   :  { %v549_v63 = vsel %vm548_vm7, %v547_v62, %v546_v61  ;;  %v748_v61 = vld [vmem:[#allocation10 + $0x8] sm:$0xff] }
 0x2c0   :  { %3000 = vmatmul.msk.f32.vlgmr.msrb.gmra.mxu1 %vm418_vm15, %v549_v63  ;;  %681 = vmatpush.msrb.mxu3 %v656_v5 }
 0x2c1   :  { %778 = vmatpush.msra.mxu1 %v748_v61  ;;  %v851_v61 = vld [vmem:[#allocation13 + $0x8] sm:$0xff] }
 0x2c2   :  { %682 = vmatpush.msrb.mxu3 %v655_v6  ;;  %v3132_v6 = vld [vmem:[%s4493_s29] ss:$0 sm:$0xff] }
 0x2c3   :  { %779 = vmatpush.msra.mxu1 %v747_v0 }
 0x2c4   :  { %683 = vmatpush.msrb.mxu3 %v654_v7 }
 0x332   :  { %v640_v4 = vpop.f32.mrf.mxu0 }
 0x338   :  { %v605_v8 = vpop.f32.mrf.mxu2 }
 0x339   :  { %v606_v13 = vadd.f32 %v3133_v10, %v605_v8 }
 0x33d   :  { %v569_v11 = vpop.f32.mrf.mxu1 }
 0x33e   :  { %v570_v12 = vadd.f32 %v3134_v9, %v569_v11 }
 0x340   :  { %v648_v14 = vperm.slane %v570_v12, 0  ;;  %v647_v15 = vrot.slane %v570_v12, 1  ;;  %v608_v17 = vpop.f32.mrf.mxu2 }
 0x341   :  { %v609_v19 = vadd.f32 %v3133_v10, %v608_v17  ;;  %v641_v10 = vadd.f32 %v3132_v6, %v640_v4 }
 0x342   :  { %v652_v16 = vmul.f32 %v648_v14, %v606_v13  ;;  %v649_v18 = vperm.slane %v647_v15, 0  ;;  %v643_v14 = vpop.f32.mrf.mxu0 }
 0x344   :  { %3005 = vmatmul.msk.f32.vlgmr.msrb.gmra.mxu3 %vm418_vm15, %v652_v16  ;;  %v653_v20 = vmul.f32 %v649_v18, %v609_v19  ;;  %v644_v18 = vadd.f32 %v3132_v6, %v643_v14 }
 0x34c   :  { %3006 = vmatmul.msk.f32.gmra.mxu3 %vm418_vm15, %v653_v20 }
 0x3c7   :  { %v685_v22 = vpop.f32.mrf.mxu3 }
 0x3c8   :  { %v691_v23 = vmul.f32 0.17677669, %v685_v22 }
 0x3ca   :  { %v693_v24 = vsel %vm418_vm15, %v691_v23, -inf }
 0x3cb   :  { %v694_v25 = vrot.slane %v693_v24, 4 }
 0x3cd   :  { %v695_v26 = vmax.f32 %v693_v24, %v694_v25 }
 0x3cf   :  { %v696_v27 = vrot.slane %v695_v26, 2  ;;  %v688_v28 = vpop.f32.mrf.mxu3 }
 0x3d0   :  { %v692_v29 = vmul.f32 0.17677669, %v688_v28 }
 0x3d1   :  { %v697_v30 = vmax.f32 %v695_v26, %v696_v27 }
 0x3d2   :  { %v700_v31 = vsel %vm418_vm15, %v692_v29, -inf }
 0x3d3   :  { %v698_v32 = vrot.slane %v697_v30, 1  ;;  %v701_v33 = vrot.slane %v700_v31, 4 }
 0x3d5   :  { %v699_v34 = vmax.f32 %v697_v30, %v698_v32  ;;  %v702_v35 = vmax.f32 %v700_v31, %v701_v33 }
 0x3d7   :  { %v707_v36 = vsub.f32 %v691_v23, %v699_v34  ;;  %v703_v37 = vrot.slane %v702_v35, 2  ;;  %v3135_v34 = vld [vmem:[%s4494_s26] ss:$0 sm:$0xff] }
 0x3d9   :  { %v709_v38 = vmul.f32 1.442695, %v707_v36  ;;  %v704_v39 = vmax.f32 %v702_v35, %v703_v37 }
 0x3db   :  { %3149 = vpow2.f32 %v709_v38  ;;  %v705_v40 = vrot.slane %v704_v39, 1 }
 0x3dd   :  { %v706_v41 = vmax.f32 %v704_v39, %v705_v40 }
 0x3df   :  { %v708_v42 = vsub.f32 %v692_v29, %v706_v41 }
 0x3e1   :  { %v3150_v44 = vpop.eup %3149  ;;  %v711_v45 = vmul.f32 1.442695, %v708_v42 }
 0x3e2   :  { %v713_v46 = vsel %vm418_vm15, %v3150_v44, 0.0 }
 0x3e3   :  { %v714_v48 = vrot.slane %v713_v46, 4  ;;  %3151 = vpow2.f32 %v711_v45 }
 0x3e5   :  { %v715_v51 = vadd.f32 %v714_v48, %v713_v46 }
 0x3e7   :  { %v716_v54 = vrot.slane %v715_v51, 2 }
 0x3e9   :  { %v3152_v57 = vpop.eup %3151  ;;  %v717_v58 = vadd.f32 %v716_v54, %v715_v51  ;;  %v856_v54 = vld [vmem:[#allocation13 + $0x30] sm:$0xff] }
 0x3ea   :  { %v720_v59 = vsel %vm418_vm15, %v3152_v57, 0.0 }
 0x3eb   :  { %v718_v62 = vrot.slane %v717_v58, 1  ;;  %v721_v63 = vrot.slane %v720_v59, 4 }
 0x3ed   :  { %v719_v1 = vadd.f32 %v718_v62, %v717_v58  ;;  %v722_v2 = vadd.f32 %v721_v63, %v720_v59  ;;  %v853_v58 = vld [vmem:[#allocation13 + $0x18] sm:$0xff]  ;;  %v852_v59 = vld [vmem:[#allocation13 + $0x10] sm:$0xff]  ;;  %v850_v62 = vld [vmem:[#allocation13] sm:$0xff] }
 0x3ef   :  { %3153 = vrcp.f32 %v719_v1  ;;  %v723_v3 = vrot.slane %v722_v2, 2 }
 0x3f1   :  { %v724_v5 = vadd.f32 %v723_v3, %v722_v2 }
 0x3f3   :  { %v725_v7 = vrot.slane %v724_v5, 1 }
 0x3f5   :  { %v3154_v8 = vpop.eup %3153  ;;  %v726_v9 = vadd.f32 %v725_v7, %v724_v5 }
 0x3f6   :  { %v729_v11 = vmul.f32 %v3154_v8, %v3150_v44 }
 0x3f7   :  { %3155 = vrcp.f32 %v726_v9 }
 0x3f8   :  { %v731_v12 = vmul.f32 %v729_v11, %v641_v10 }
 0x3fa   :  { %v733_v13 = vsel %vm418_vm15, %v731_v12, 0.0 }
 0x3fb   :  { %v734_v15 = vrot.slane %v733_v13, 4 }
 0x3fd   :  { %v3156_v16 = vpop.eup %3155  ;;  %v735_v17 = vadd.f32 %v734_v15, %v733_v13 }
 0x3fe   :  { %v730_v19 = vmul.f32 %v3156_v16, %v3152_v57  ;;  %v854_v57 = vld [vmem:[#allocation13 + $0x20] sm:$0xff]  ;;  %v3136_v16 = vld [vmem:[%s4495_s22] ss:$0 sm:$0xff] }
 0x3ff   :  { %v736_v22 = vrot.slane %v735_v17, 2 }
 0x400   :  { %v732_v20 = vmul.f32 %v730_v19, %v644_v18  ;;  %v3137_v19 = vld [vmem:[%s4496_s1] ss:$0 sm:$0xff] }
 0x401   :  { %v737_v25 = vadd.f32 %v736_v22, %v735_v17 }
 0x402   :  { %v740_v23 = vsel %vm418_vm15, %v732_v20, 0.0 }
 0x403   :  { %v741_v24 = vrot.slane %v740_v23, 4  ;;  %v738_v28 = vrot.slane %v737_v25, 1 }
 0x405   :  { %v742_v26 = vadd.f32 %v741_v24, %v740_v23  ;;  %v739_v31 = vadd.f32 %v738_v28, %v737_v25 }
 0x407   :  { %v743_v27 = vrot.slane %v742_v26, 2 }
 0x409   :  { %v744_v29 = vadd.f32 %v743_v27, %v742_v26 }
 0x40b   :  { %v745_v30 = vrot.slane %v744_v29, 1 }
 0x40d   :  { %v746_v32 = vadd.f32 %v745_v30, %v744_v29  ;;  %v3138_v30 = vld [vmem:[%s4497_s4] ss:$0 sm:$0xff] }
 0x40f   :  { %v761_v33 = vsel %vm548_vm7, %v746_v32, %v739_v31 }
 0x410   :  { %3007 = vmatmul.msk.f32.vlgmr.msra.gmra.mxu1 %vm418_vm15, %v761_v33 }
 0x48d   :  { %v781_v35 = vpop.f32.mrf.mxu1 }
 0x48e   :  { %v782_v36 = vadd.f32 %v3135_v34, %v781_v35 }
 0x490   :  { %v785_v37 = vrot.slane %v782_v36, 1  ;;  %v786_v38 = vperm.slane %v782_v36, 0 }
 0x492   :  { %v787_v39 = vperm.slane %v785_v37, 0  ;;  %v790_v40 = vadd.f32 %v786_v38, %v3879_v53 }
 0x494   :  { %v794_v41 = vsel %vm418_vm15, %v790_v40, 0.0  ;;  %v791_v42 = vadd.f32 %v787_v39, %v3886_v60  ;;  %v857_v60 = vld [vmem:[#allocation13 + $0x38] sm:$0xff] }
 0x495   :  { %795 = vadd.xlane.f32.xlu2 %v794_v41  ;;  %876 = vmatpush.msra.mxu2 %v857_v60  ;;  %v1004_v60 = vld [vmem:[#allocation15 + $0x58] sm:$0xff] }
 0x496   :  { %v797_v43 = vsel %vm418_vm15, %v791_v42, 0.0 }
 0x497   :  { %798 = vadd.xlane.f32.xlu0 %v797_v43  ;;  %877 = vmatpush.msra.mxu2 %v856_v54 }
 0x499   :  { %878 = vmatpush.msra.mxu2 %v855_v55 }
 0x49b   :  { %879 = vmatpush.msra.mxu2 %v854_v57  ;;  %v1001_v57 = vld [vmem:[#allocation15 + $0x40] sm:$0xff] }
 0x49d   :  { %880 = vmatpush.msra.mxu2 %v853_v58  ;;  %v1002_v58 = vld [vmem:[#allocation15 + $0x48] sm:$0xff] }
 0x49f   :  { %881 = vmatpush.msra.mxu2 %v852_v59 }
 0x4a1   :  { %882 = vmatpush.msra.mxu2 %v851_v61  ;;  %v999_v61 = vld [vmem:[#allocation15 + $0x30] sm:$0xff] }
 0x4a3   :  { %883 = vmatpush.msra.mxu2 %v850_v62  ;;  %v1000_v62 = vld [vmem:[#allocation15 + $0x38] sm:$0xff] }
 0x508   :  { %v796_v44 = vpop.xlane.xlu2 %795 }
 0x509   :  { %v800_v45 = vmul.f32 %v796_v44, %v3860_v56 }
 0x50a   :  { %v799_v46 = vpop.xlane.xlu0 %798 }
 0x50b   :  { %v802_v47 = vsub.f32 %v790_v40, %v800_v45  ;;  %v801_v48 = vmul.f32 %v799_v46, %v3860_v56 }
 0x50d   :  { %v803_v49 = vsub.f32 %v791_v42, %v801_v48  ;;  %v804_v50 = vmul.f32 %v802_v47, %v802_v47 }
 0x50f   :  { %v806_v51 = vsel %vm418_vm15, %v804_v50, 0.0  ;;  %v805_v53 = vmul.f32 %v803_v49, %v803_v49  ;;  %v1008_v50 = vld [vmem:[#allocation15 + $0x78] sm:$0xff] }
 0x510   :  { %807 = vadd.xlane.f32.xlu1 %v806_v51  ;;  %1052 = vmatpush.msra.mxu3 %v1008_v50  ;;  %v1005_v51 = vld [vmem:[#allocation15 + $0x60] sm:$0xff] }
 0x511   :  { %v809_v52 = vsel %vm418_vm15, %v805_v53, 0.0  ;;  %v1006_v53 = vld [vmem:[#allocation15 + $0x68] sm:$0xff] }
 0x512   :  { %810 = vadd.xlane.f32.xlu2 %v809_v52  ;;  %1053 = vmatpush.msra.mxu3 %v1006_v53  ;;  %v1003_v52 = vld [vmem:[#allocation15 + $0x50] sm:$0xff] }
 0x514   :  { %1054 = vmatpush.msra.mxu3 %v1004_v60 }
 0x516   :  { %1055 = vmatpush.msra.mxu3 %v1002_v58 }
 0x518   :  { %1056 = vmatpush.msra.mxu3 %v1000_v62 }
 0x583   :  { %v808_v63 = vpop.xlane.xlu1 %807 }
 0x584   :  { %v812_v0 = vmul.f32 %v808_v63, %v3860_v56  ;;  %v997_v63 = vld [vmem:[#allocation15 + $0x20] sm:$0xff] }
 0x585   :  { %v811_v1 = vpop.xlane.xlu2 %810 }
 0x586   :  { %v814_v2 = vadd.f32 1e-05, %v812_v0  ;;  %v813_v3 = vmul.f32 %v811_v1, %v3860_v56  ;;  %v998_v0 = vld [vmem:[#allocation15 + $0x28] sm:$0xff]  ;;  %v3942_v1 = vld [vmem:[#allocation16 + $0x70] sm:$0xff] }
 0x587   :  { %1100 = vmatpush.msrb.mxu1 %v3942_v1  ;;  %1057 = vmatpush.msra.mxu3 %v998_v0 }
 0x588   :  { %3157 = vrsqrt.f32 %v814_v2  ;;  %v815_v4 = vadd.f32 1e-05, %v813_v3  ;;  %vm822_vm9 = vweird.f32 %v814_v2  ;;  %v995_v3 = vld [vmem:[#allocation15 + $0x10] sm:$0xff] }
 0x58a   :  { %3159 = vrsqrt.f32 %v815_v4  ;;  %vm832_vm12 = vweird.f32 %v815_v4 }
 0x58e   :  { %v3158_v5 = vpop.eup %3157 }
 0x58f   :  { %v817_v6 = vmul.f32 %v3158_v5, %v814_v2  ;;  %vm823_vm8 = vweird.f32 %v3158_v5  ;;  %v3944_v2 = vld [vmem:[#allocation16 + $0x78] sm:$0xff] }
 0x590   :  { %v3160_v7 = vpop.eup %3159  ;;  %vm824_vm11 = vmor %vm822_vm9, %vm823_vm8  ;;  %1120 = vmatpush.msrb.mxu2 %v3944_v2  ;;  %vm984_vm8 = vcmask 1041408   ;;  %vm986_vm9 = vcmask 1043456  }
 0x591   :  { %v818_v8 = vmul.f32 %v3158_v5, %v817_v6  ;;  %v827_v9 = vmul.f32 %v3160_v7, %v815_v4  ;;  %vm833_vm10 = vweird.f32 %v3160_v7  ;;  %v996_v4 = vld [vmem:[#allocation15 + $0x18] sm:$0xff]  ;;  %v3951_v6 = vld [vmem:[#allocation16 + $0x68] sm:$0xff] }
 0x592   :  { %vm834_vm13 = vmor %vm832_vm12, %vm833_vm10  ;;  %1121 = vmatpush.msrb.mxu2 %v3951_v6  ;;  %1058 = vmatpush.msra.mxu3 %v996_v4  ;;  %vm988_vm10 = vcmask 1045504  }
 0x593   :  { %v819_v10 = vmul.f32 0.5, %v818_v8  ;;  %v828_v11 = vmul.f32 %v3160_v7, %v827_v9  ;;  %v994_v8 = vld [vmem:[#allocation15 + $0x8] sm:$0xff]  ;;  %v3955_v9 = vld [vmem:[#allocation16 + $0x50] sm:$0xff] }
 0x594   :  { %1059 = vmatpush.msra.mxu3 %v994_v8 }
 0x595   :  { %v820_v12 = vsub.f32 1.5, %v819_v10  ;;  %v829_v13 = vmul.f32 0.5, %v828_v11  ;;  %v3957_v10 = vld [vmem:[#allocation16 + $0x58] sm:$0xff] }
 0x596   :  { %1122 = vmatpush.msrb.mxu2 %v3957_v10  ;;  %1220 = vmatpush.msrb.mxu3 %v3944_v2 }
 0x597   :  { %v821_v14 = vmul.f32 %v3158_v5, %v820_v12  ;;  %v830_v15 = vsub.f32 1.5, %v829_v13 }
 0x598   :  { %1221 = vmatpush.msrb.mxu3 %v3951_v6 }
 0x599   :  { %v825_v17 = vsel %vm824_vm11, %v3158_v5, %v821_v14  ;;  %v831_v18 = vmul.f32 %v3160_v7, %v830_v15  ;;  %v3949_v5 = vld [vmem:[#allocation16 + $0x60] sm:$0xff]  ;;  %vm966_vm11 = vcmask 1047559  }
 0x59a   :  { %v836_v20 = vmul.f32 %v825_v17, %v802_v47  ;;  %1101 = vmatpush.msrb.mxu1 %v3949_v5  ;;  %v3964_v15 = vld [vmem:[#allocation16 + $0x40] sm:$0xff]  ;;  %v3968_v17 = vld [vmem:[#allocation16 + $0x30] sm:$0xff]  ;;  %1222 = vmatpush.msrb.mxu3 %v3957_v10 }
 0x59b   :  { %v835_v22 = vsel %vm834_vm13, %v3160_v7, %v831_v18  ;;  %v993_v7 = vld [vmem:[#allocation15] sm:$0xff]  ;;  %v3975_v18 = vld [vmem:[#allocation16 + $0x38] sm:$0xff] }
 0x59c   :  { %v841_v23 = vmul.f32 %v3136_v16, %v836_v20  ;;  %v837_v24 = vmul.f32 %v835_v22, %v803_v49  ;;  %v1007_v49 = vld [vmem:[#allocation15 + $0x70] sm:$0xff]  ;;  %1102 = vmatpush.msrb.mxu1 %v3955_v9  ;;  %v3980_v20 = vld [vmem:[#allocation16 + $0x28] sm:$0xff] }
 0x59d   :  { %1029 = vmatpush.msra.mxu0 %v1007_v49 }
 0x59e   :  { %v846_v25 = vadd.f32 %v3137_v19, %v841_v23  ;;  %v842_v27 = vmul.f32 %v3136_v16, %v837_v24  ;;  %v3966_v16 = vld [vmem:[#allocation16 + $0x48] sm:$0xff]  ;;  %1103 = vmatpush.msrb.mxu1 %v3964_v15  ;;  %v3986_v23 = vld [vmem:[#allocation16 + $0x10] sm:$0xff]  ;;  %v3988_v24 = vld [vmem:[#allocation16 + $0x18] sm:$0xff] }
 0x59f   :  { %1030 = vmatpush.msra.mxu0 %v1005_v51  ;;  %1123 = vmatpush.msrb.mxu2 %v3966_v16 }
 0x5a0   :  { %v848_v26 = vmax.f32 %v846_v25, 0.0  ;;  %v847_v28 = vadd.f32 %v3137_v19, %v842_v27  ;;  %v3978_v19 = vld [vmem:[#allocation16 + $0x20] sm:$0xff]  ;;  %1104 = vmatpush.msrb.mxu1 %v3968_v17  ;;  %1223 = vmatpush.msrb.mxu3 %v3966_v16 }
 0x5a1   :  { %1031 = vmatpush.msra.mxu0 %v1003_v52  ;;  %1124 = vmatpush.msrb.mxu2 %v3975_v18 }
 0x5a2   :  { %3008 = vmatmul.msk.f32.vlgmr.msra.gmra.mxu2 %vm418_vm15, %v848_v26  ;;  %v849_v29 = vmax.f32 %v847_v28, 0.0  ;;  %1105 = vmatpush.msrb.mxu1 %v3978_v19 }
 0x5a3   :  { %1032 = vmatpush.msra.mxu0 %v1001_v57  ;;  %1125 = vmatpush.msrb.mxu2 %v3980_v20 }
 0x5a4   :  { %1106 = vmatpush.msrb.mxu1 %v3986_v23  ;;  %1224 = vmatpush.msrb.mxu3 %v3975_v18 }
 0x5a5   :  { %1033 = vmatpush.msra.mxu0 %v999_v61  ;;  %1126 = vmatpush.msrb.mxu2 %v3988_v24 }
 0x5a6   :  { %1225 = vmatpush.msrb.mxu3 %v3980_v20 }
 0x5a7   :  { %1034 = vmatpush.msra.mxu0 %v997_v63 }
 0x5a8   :  { %1226 = vmatpush.msrb.mxu3 %v3988_v24 }
 0x5a9   :  { %1035 = vmatpush.msra.mxu0 %v995_v3 }
 0x5aa   :  { %3009 = vmatmul.msk.f32.gmra.mxu2 %vm418_vm15, %v849_v29  ;;  %v4000_v29 = vld [vmem:[#allocation16 + $0x8] sm:$0xff] }
 0x5ab   :  { %1036 = vmatpush.msra.mxu0 %v993_v7  ;;  %1127 = vmatpush.msrb.mxu2 %v4000_v29 }
 0x5ac   :  { %1227 = vmatpush.msrb.mxu3 %v4000_v29 }
 0x5ad   :  { %1200 = vmatpush.msrb.mxu0 %v3942_v1  ;;  %1332 = vmatpush.msra.mxu2 %v3944_v2 }
 0x5af   :  { %1201 = vmatpush.msrb.mxu0 %v3949_v5  ;;  %1333 = vmatpush.msra.mxu2 %v3951_v6 }
 0x5b1   :  { %1202 = vmatpush.msrb.mxu0 %v3955_v9  ;;  %1334 = vmatpush.msra.mxu2 %v3957_v10 }
 0x5b2   :  { %1128 = vmatmul.f32.vlgmr.msrb.gmra.mxu2 %v3603_v21 }
 0x5b3   :  { %1203 = vmatpush.msrb.mxu0 %v3964_v15  ;;  %1335 = vmatpush.msra.mxu2 %v3966_v16 }
 0x5b5   :  { %1204 = vmatpush.msrb.mxu0 %v3968_v17  ;;  %1336 = vmatpush.msra.mxu2 %v3975_v18 }
 0x5b7   :  { %1205 = vmatpush.msrb.mxu0 %v3978_v19  ;;  %1337 = vmatpush.msra.mxu2 %v3980_v20 }
 0x5b9   :  { %1206 = vmatpush.msrb.mxu0 %v3986_v23  ;;  %1338 = vmatpush.msra.mxu2 %v3988_v24 }
 0x5bb   :  { %1339 = vmatpush.msra.mxu2 %v4000_v29 }
 0x5bd   :  { %1556 = vmatpush.msrb.mxu2 %v3944_v2 }
 0x5bf   :  { %1557 = vmatpush.msrb.mxu2 %v3951_v6 }
 0x5c1   :  { %1558 = vmatpush.msrb.mxu2 %v3957_v10 }
 0x5c3   :  { %1559 = vmatpush.msrb.mxu2 %v3966_v16 }
 0x5c5   :  { %1560 = vmatpush.msrb.mxu2 %v3975_v18 }
 0x5c7   :  { %1561 = vmatpush.msrb.mxu2 %v3980_v20 }
 0x5c9   :  { %1562 = vmatpush.msrb.mxu2 %v3988_v24 }
 0x5cb   :  { %1563 = vmatpush.msrb.mxu2 %v4000_v29 }
 0x625   :  { %v885_v31 = vpop.f32.mrf.mxu2 }
 0x626   :  { %v886_v32 = vadd.f32 %v3138_v30, %v885_v31 }
 0x628   :  { %v891_v33 = vadd.f32 %v886_v32, %v846_v25 }
 0x62a   :  { %v895_v34 = vsel %vm418_vm15, %v891_v33, 0.0 }
 0x62b   :  { %896 = vadd.xlane.f32.xlu0 %v895_v34  ;;  %v3139_v34 = vld [vmem:[%s4498_s6] ss:$0 sm:$0xff] }
 0x62d   :  { %v888_v35 = vpop.f32.mrf.mxu2 }
 0x62e   :  { %v889_v36 = vadd.f32 %v3138_v30, %v888_v35 }
 0x630   :  { %v892_v37 = vadd.f32 %v889_v36, %v847_v28  ;;  %v3998_v28 = vld [vmem:[#allocation16] sm:$0xff] }
 0x631   :  { %1107 = vmatpush.msrb.mxu1 %v3998_v28  ;;  %1207 = vmatpush.msrb.mxu0 %v3998_v28 }
 0x632   :  { %v898_v38 = vsel %vm418_vm15, %v892_v37, 0.0  ;;  %1108 = vmatmul.f32.vlgmr.msrb.gmra.mxu1 %v3603_v21 }
 0x633   :  { %899 = vadd.xlane.f32.xlu1 %v898_v38  ;;  %1312 = vmatpush.msra.mxu1 %v3942_v1  ;;  %v3140_v38 = vld [vmem:[%s4499_s0] ss:$0 sm:$0xff] }
 0x635   :  { %1313 = vmatpush.msra.mxu1 %v3949_v5 }
 0x637   :  { %1314 = vmatpush.msra.mxu1 %v3955_v9 }
 0x639   :  { %1315 = vmatpush.msra.mxu1 %v3964_v15 }
 0x63b   :  { %1316 = vmatpush.msra.mxu1 %v3968_v17 }
 0x63d   :  { %1317 = vmatpush.msra.mxu1 %v3978_v19 }
 0x63f   :  { %1318 = vmatpush.msra.mxu1 %v3986_v23 }
 0x641   :  { %1319 = vmatpush.msra.mxu1 %v3998_v28 }
 0x643   :  { %1536 = vmatpush.msrb.mxu1 %v3942_v1 }
 0x645   :  { %1537 = vmatpush.msrb.mxu1 %v3949_v5 }
 0x647   :  { %1538 = vmatpush.msrb.mxu1 %v3955_v9 }
 0x649   :  { %1539 = vmatpush.msrb.mxu1 %v3964_v15 }
 0x64b   :  { %1540 = vmatpush.msrb.mxu1 %v3968_v17 }
 0x64d   :  { %1541 = vmatpush.msrb.mxu1 %v3978_v19 }
 0x64f   :  { %1542 = vmatpush.msrb.mxu1 %v3986_v23 }
 0x651   :  { %1543 = vmatpush.msrb.mxu1 %v3998_v28 }
 0x69e   :  { %v897_v39 = vpop.xlane.xlu0 %896 }
 0x69f   :  { %v901_v40 = vmul.f32 %v897_v39, %v3860_v56 }
 0x6a1   :  { %v3928_v41 = vsub.f32 %v891_v33, %v901_v40 }
 0x6a3   :  { %v905_v42 = vmul.f32 %v3928_v41, %v3928_v41 }
 0x6a5   :  { %v907_v43 = vsel %vm418_vm15, %v905_v42, 0.0 }
 0x6a6   :  { %v900_v44 = vpop.xlane.xlu1 %899  ;;  %908 = vadd.xlane.f32.xlu2 %v907_v43 }
 0x6a7   :  { %v902_v45 = vmul.f32 %v900_v44, %v3860_v56 }
 0x6a9   :  { %v3934_v46 = vsub.f32 %v892_v37, %v902_v45 }
 0x6ab   :  { %v906_v47 = vmul.f32 %v3934_v46, %v3934_v46 }
 0x6ad   :  { %v910_v48 = vsel %vm418_vm15, %v906_v47, 0.0 }
 0x6ae   :  { %911 = vadd.xlane.f32.xlu0 %v910_v48 }
 0x719   :  { %v909_v54 = vpop.xlane.xlu2 %908 }
 0x71a   :  { %v913_v55 = vmul.f32 %v909_v54, %v3860_v56 }
 0x71c   :  { %v3940_v59 = vadd.f32 1e-05, %v913_v55 }
 0x71e   :  { %3161 = vrsqrt.f32 %v3940_v59  ;;  %vm923_vm0 = vweird.f32 %v3940_v59 }
 0x721   :  { %v912_v11 = vpop.xlane.xlu0 %911 }
 0x722   :  { %v914_v12 = vmul.f32 %v912_v11, %v3860_v56 }
 0x724   :  { %v3162_v13 = vpop.eup %3161  ;;  %v3962_v14 = vadd.f32 1e-05, %v914_v12 }
 0x725   :  { %v918_v56 = vmul.f32 %v3162_v13, %v3940_v59  ;;  %vm924_vm14 = vweird.f32 %v3162_v13 }
 0x726   :  { %3163 = vrsqrt.f32 %v3962_v14  ;;  %vm925_vm1 = vmor %vm923_vm0, %vm924_vm14  ;;  %vm933_vm3 = vweird.f32 %v3962_v14 }
 0x727   :  { %v919_v22 = vmul.f32 %v3162_v13, %v918_v56 }
 0x729   :  { %v920_v25 = vmul.f32 0.5, %v919_v22 }
 0x72b   :  { %v921_v26 = vsub.f32 1.5, %v920_v25  ;;  %v1009_v25 = vld [vmem:[%s3754_s27] sm:$0x3] }
 0x72c   :  { %v3164_v27 = vpop.eup %3163 }
 0x72d   :  { %v922_v30 = vmul.f32 %v3162_v13, %v921_v26  ;;  %v928_v31 = vmul.f32 %v3164_v27, %v3962_v14  ;;  %vm934_vm2 = vweird.f32 %v3164_v27  ;;  %v1011_v26 = vperm.slane %v1009_v25, 0 }
 0x72e   :  { %vm935_vm4 = vmor %vm933_vm3, %vm934_vm2 }
 0x72f   :  { %v926_v32 = vsel %vm925_vm1, %v3162_v13, %v922_v30  ;;  %v929_v33 = vmul.f32 %v3164_v27, %v928_v31  ;;  %v1012_v31 = vperm.slane %v1009_v25, 1 }
 0x730   :  { %v937_v35 = vmul.f32 %v926_v32, %v3928_v41 }
 0x731   :  { %v930_v36 = vmul.f32 0.5, %v929_v33 }
 0x732   :  { %v942_v39 = vmul.f32 %v3139_v34, %v937_v35  ;;  %v1109_v35 = vpop.f32.mrf.mxu1 }
 0x733   :  { %v931_v37 = vsub.f32 1.5, %v930_v36 }
 0x734   :  { %v947_v43 = vadd.f32 %v3140_v38, %v942_v39 }
 0x735   :  { %v932_v40 = vmul.f32 %v3164_v27, %v931_v37 }
 0x736   :  { %v954_v47 = vrot.slane %v947_v43, 7  ;;  %v964_v53 = vrot.slane %v947_v43, 5  ;;  %v969_v52 = vrot.slane %v947_v43, 4  ;;  %v973_v59 = vrot.slane %v947_v43, 3 }
 0x737   :  { %v936_v41 = vsel %vm935_vm4, %v3164_v27, %v932_v40  ;;  %v977_v8 = vrot.slane %v947_v43, 2  ;;  %v981_v13 = vrot.slane %v947_v43, 1  ;;  %vm1186_vm4 = vcmask 517120  }
 0x738   :  { %v938_v42 = vmul.f32 %v936_v41, %v3934_v46  ;;  %v959_v46 = vrot.slane %v947_v43, 6 }
 0x73a   :  { %v943_v44 = vmul.f32 %v3139_v34, %v938_v42 }
 0x73c   :  { %v948_v45 = vadd.f32 %v3140_v38, %v943_v44 }
 0x73e   :  { %v951_v48 = vrot.slane %v948_v45, 7  ;;  %v955_v49 = vrot.slane %v948_v45, 6  ;;  %v960_v50 = vrot.slane %v948_v45, 5  ;;  %v965_v51 = vrot.slane %v948_v45, 4 }
 0x73f   :  { %v970_v60 = vrot.slane %v948_v45, 3  ;;  %v974_v54 = vrot.slane %v948_v45, 2  ;;  %v978_v62 = vrot.slane %v948_v45, 1  ;;  %v982_v56 = vsel %vm966_vm11, %v948_v45, %v981_v13  ;;  %v1129_v45 = vpop.f32.mrf.mxu2 }
 0x740   :  { %v952_v55 = vsel %vm548_vm7, %v951_v48, %v947_v43  ;;  %v957_v57 = vsel %vm956_vm5, %v955_v49, %v954_v47  ;;  %v962_v58 = vsel %vm961_vm6, %v960_v50, %v959_v46  ;;  %v967_v63 = vsel %vm966_vm11, %v965_v51, %v964_v53 }
 0x741   :  { %v985_v61 = vsel %vm984_vm8, %v952_v55, %v957_v57  ;;  %v971_v3 = vsel %vm548_vm7, %v970_v60, %v969_v52  ;;  %v975_v4 = vsel %vm956_vm5, %v974_v54, %v973_v59  ;;  %v979_v11 = vsel %vm961_vm6, %v978_v62, %v977_v8 }
 0x742   :  { %v987_v0 = vsel %vm986_vm9, %v985_v61, %v962_v58  ;;  %v990_v12 = vsel %vm984_vm8, %v971_v3, %v975_v4 }
 0x743   :  { %v989_v7 = vsel %vm988_vm10, %v987_v0, %v967_v63  ;;  %v991_v14 = vsel %vm986_vm9, %v990_v12, %v979_v11 }
 0x744   :  { %3010 = vmatmul.msk.f32.vlgmr.msra.gmra.mxu0 %vm418_vm15, %v989_v7  ;;  %3012 = vmatmul.msk.f32.vlgmr.msra.gmra.mxu3 %vm418_vm15, %v989_v7  ;;  %v992_v22 = vsel %vm988_vm10, %v991_v14, %v982_v56 }
 0x745   :  { %1424 = vmatpush.msra.mxu0 %v3942_v1  ;;  %1444 = vmatpush.msra.mxu3 %v3944_v2 }
 0x747   :  { %1425 = vmatpush.msra.mxu0 %v3949_v5  ;;  %1445 = vmatpush.msra.mxu3 %v3951_v6 }
 0x749   :  { %1426 = vmatpush.msra.mxu0 %v3955_v9  ;;  %1446 = vmatpush.msra.mxu3 %v3957_v10 }
 0x74b   :  { %1427 = vmatpush.msra.mxu0 %v3964_v15  ;;  %1447 = vmatpush.msra.mxu3 %v3966_v16 }
 0x74c   :  { %3011 = vmatmul.msk.f32.gmra.mxu0 %vm418_vm15, %v992_v22  ;;  %3013 = vmatmul.msk.f32.gmra.mxu3 %vm418_vm15, %v992_v22 }
 0x74d   :  { %1428 = vmatpush.msra.mxu0 %v3968_v17  ;;  %1448 = vmatpush.msra.mxu3 %v3975_v18 }
 0x74f   :  { %1429 = vmatpush.msra.mxu0 %v3978_v19  ;;  %1449 = vmatpush.msra.mxu3 %v3980_v20 }
 0x751   :  { %1430 = vmatpush.msra.mxu0 %v3986_v23  ;;  %1450 = vmatpush.msra.mxu3 %v3988_v24 }
 0x753   :  { %1431 = vmatpush.msra.mxu0 %v3998_v28  ;;  %1451 = vmatpush.msra.mxu3 %v4000_v29 }
 0x7c1   :  { %v1038_v27 = vpop.f32.mrf.mxu0 }
 0x7c2   :  { %v1039_v30 = vadd.f32 %v1038_v27, %v1011_v26 }
 0x7c4   :  { %1067 = vst [vmem:[#allocation2 + $0x10] sm:$0xff] %v1039_v30 }
 0x7c7   :  { %v1061_v32 = vpop.f32.mrf.mxu3 }
 0x7c8   :  { %v1062_v33 = vadd.f32 %v1061_v32, %v1012_v31 }
 0x7c9   :  { %v1041_v34 = vpop.f32.mrf.mxu0 }
 0x7ca   :  { %1068 = vst [vmem:[#allocation2] sm:$0xff] %v1062_v33  ;;  %v1042_v36 = vadd.f32 %v1041_v34, %v1011_v26 }
 0x7cb   :  { %v1087_v37 = vld [vmem:[#allocation2 + $0x10] sm:$0x3]  ;;  %v1188_v33 = vld [vmem:[#allocation2 + $0x10] sm:$0xc] }
 0x7cc   :  { %1069 = vst [vmem:[#allocation2 + $0x18] sm:$0xff] %v1042_v36  ;;  %v1132_v38 = vadd.f32 %v1109_v35, %v1087_v37 }
 0x7ce   :  { %v3014_v39 = vmul.f32 -1.442695, %v1132_v38 }
 0x7cf   :  { %v1064_v40 = vpop.f32.mrf.mxu3 }
 0x7d0   :  { %3165 = vpow2.f32 %v3014_v39  ;;  %v1065_v41 = vadd.f32 %v1064_v40, %v1012_v31 }
 0x7d1   :  { %v1088_v44 = vld [vmem:[#allocation2] sm:$0x3]  ;;  %v1189_v40 = vld [vmem:[#allocation2] sm:$0xc] }
 0x7d2   :  { %1070 = vst [vmem:[#allocation2 + $0x8] sm:$0xff] %v1065_v41  ;;  %v1133_v46 = vadd.f32 %v1129_v45, %v1088_v44 }
 0x7d4   :  { %v3015_v59 = vmul.f32 -1.442695, %v1133_v46 }
 0x7d6   :  { %v3166_v42 = vpop.eup %3165 }
 0x7d7   :  { %v1137_v43 = vadd.f32 1.0, %v3166_v42 }
 0x7d9   :  { %3167 = vrcp.f32 %v1137_v43  ;;  %v1149_v50 = vand.u32 2147483648, %v1137_v43  ;;  %v1147_v53 = vand.u32 2147483647, %v1137_v43  ;;  %vm1143_vm12 = vweird.f32 %v1137_v43 }
 0x7da   :  { %3169 = vtanh.f32 %v1133_v46 }
 0x7db   :  { %v1150_v60 = vor.u32 1.1754944e-38, %v1149_v50  ;;  %vm1148_vm14 = vcmp.eq.f32.partialorder %v1147_v53, 8.507059e+37  ;;  %3171 = vpow2.f32 %v3015_v59 }
 0x7df   :  { %v3168_v47 = vpop.eup %3167 }
 0x7e0   :  { %v1139_v48 = vmul.f32 %v3168_v47, %v1137_v43  ;;  %vm1144_vm7 = vweird.f32 %v3168_v47  ;;  %v3170_v55 = vpop.eup %3169 }
 0x7e1   :  { %vm1145_vm13 = vmor %vm1143_vm12, %vm1144_vm7  ;;  %v3172_v61 = vpop.eup %3171 }
 0x7e2   :  { %v1140_v49 = vsub.f32 1.0, %v1139_v48  ;;  %v1157_v62 = vadd.f32 1.0, %v3172_v61 }
 0x7e4   :  { %v1141_v51 = vmul.f32 %v3168_v47, %v1140_v49  ;;  %3173 = vrcp.f32 %v1157_v62  ;;  %v1169_v13 = vand.u32 2147483648, %v1157_v62  ;;  %vm1163_vm1 = vweird.f32 %v1157_v62 }
 0x7e5   :  { %v1167_v14 = vand.u32 2147483647, %v1157_v62 }
 0x7e6   :  { %v1142_v52 = vadd.f32 %v3168_v47, %v1141_v51  ;;  %v1170_v22 = vor.u32 1.1754944e-38, %v1169_v13 }
 0x7e7   :  { %vm1168_vm3 = vcmp.eq.f32.partialorder %v1167_v14, 8.507059e+37 }
 0x7e8   :  { %v1146_v54 = vsel %vm1145_vm13, %v3168_v47, %v1142_v52 }
 0x7e9   :  { %v1151_v57 = vsel %vm1148_vm14, %v1150_v60, %v1146_v54 }
 0x7ea   :  { %v1174_v58 = vmul.f32 %v3170_v55, %v1151_v57  ;;  %v3174_v63 = vpop.eup %3173  ;;  %v1173_v7 = vmul.f32 0.0, %v1151_v57 }
 0x7eb   :  { %v1159_v0 = vmul.f32 %v3174_v63, %v1157_v62  ;;  %vm1164_vm0 = vweird.f32 %v3174_v63 }
 0x7ec   :  { %1176 = vrot.lane.b32.xlu1 %v1174_v58, %s3605_s28  ;;  %vm1165_vm2 = vmor %vm1163_vm1, %vm1164_vm0 }
 0x7ed   :  { %v1160_v3 = vsub.f32 1.0, %v1159_v0 }
 0x7ef   :  { %v1161_v4 = vmul.f32 %v3174_v63, %v1160_v3 }
 0x7f1   :  { %v1162_v12 = vadd.f32 %v3174_v63, %v1161_v4 }
 0x7f3   :  { %v1166_v56 = vsel %vm1165_vm2, %v3174_v63, %v1162_v12 }
 0x7f4   :  { %v1171_v26 = vsel %vm1168_vm3, %v1170_v22, %v1166_v56 }
 0x85e   :  { %v1177_v8 = vpop.permute.xlu1 %1176 }
 0x85f   :  { %v4089_v11 = vadd.f32 %v1177_v8, %v1173_v7 }
 0x861   :  { %3175 = vtanh.f32 %v4089_v11  ;;  %v1280_v50 = vrot.slane %v4089_v11, 6 }
 0x867   :  { %v3176_v25 = vpop.eup %3175 }
 0x868   :  { %v1181_v27 = vmul.f32 %v3176_v25, %v1171_v26 }
 0x86a   :  { %1183 = vrot.lane.b32.xlu2 %v1181_v27, %s3605_s28 }
 0x8c4   :  { %v1184_v30 = vpop.permute.xlu2 %1183 }
 0x8c5   :  { %1187 = vst.msk [vmem:[#allocation3] sm:$0x3] %vm1186_vm4, %v1184_v30  ;;  %3016 = vmatmul.msk.f32.vlgmr.msrb.gmra.mxu0 %vm418_vm15, %v1184_v30  ;;  %3017 = vmatmul.msk.f32.vlgmr.msrb.gmra.mxu3 %vm418_vm15, %v1184_v30  ;;  %v1297_v30 = vld [vmem:[#allocation2 + $0x10] sm:$0x30] }
 0x8c6   :  { %1638 = vmatpush.msrb.mxu0 %v3942_v1  ;;  %1658 = vmatpush.msrb.mxu3 %v3944_v2 }
 0x8c8   :  { %1639 = vmatpush.msrb.mxu0 %v3949_v5  ;;  %1659 = vmatpush.msrb.mxu3 %v3951_v6 }
 0x8ca   :  { %1640 = vmatpush.msrb.mxu0 %v3955_v9  ;;  %1660 = vmatpush.msrb.mxu3 %v3957_v10 }
 0x8cc   :  { %1641 = vmatpush.msrb.mxu0 %v3964_v15  ;;  %1661 = vmatpush.msrb.mxu3 %v3966_v16 }
 0x8ce   :  { %1642 = vmatpush.msrb.mxu0 %v3968_v17  ;;  %1662 = vmatpush.msrb.mxu3 %v3975_v18 }
 0x8d0   :  { %1643 = vmatpush.msrb.mxu0 %v3978_v19  ;;  %1663 = vmatpush.msrb.mxu3 %v3980_v20 }
 0x8d2   :  { %1644 = vmatpush.msrb.mxu0 %v3986_v23  ;;  %1664 = vmatpush.msrb.mxu3 %v3988_v24 }
 0x8d4   :  { %1645 = vmatpush.msrb.mxu0 %v3998_v28  ;;  %1665 = vmatpush.msrb.mxu3 %v4000_v29 }
 0x942   :  { %v1209_v31 = vpop.f32.mrf.mxu0 }
 0x943   :  { %v1234_v32 = vrot.slane %v1209_v31, 6 }
 0x945   :  { %v1238_v34 = vadd.f32 %v1234_v32, %v1188_v33 }
 0x947   :  { %v3018_v35 = vmul.f32 -1.442695, %v1238_v34 }
 0x948   :  { %v1229_v38 = vpop.f32.mrf.mxu3 }
 0x949   :  { %3177 = vpow2.f32 %v3018_v35  ;;  %v1235_v39 = vrot.slane %v1229_v38, 6 }
 0x94b   :  { %v1239_v42 = vadd.f32 %v1235_v39, %v1189_v40 }
 0x94d   :  { %v3019_v55 = vmul.f32 -1.442695, %v1239_v42 }
 0x94f   :  { %v3178_v36 = vpop.eup %3177 }
 0x950   :  { %v1243_v37 = vadd.f32 1.0, %v3178_v36 }
 0x952   :  { %3179 = vrcp.f32 %v1243_v37  ;;  %v1255_v45 = vand.u32 2147483648, %v1243_v37  ;;  %v1253_v46 = vand.u32 2147483647, %v1243_v37  ;;  %vm1249_vm6 = vweird.f32 %v1243_v37 }
 0x953   :  { %3181 = vtanh.f32 %v1239_v42 }
 0x954   :  { %v1256_v49 = vor.u32 1.1754944e-38, %v1255_v45  ;;  %vm1254_vm9 = vcmp.eq.f32.partialorder %v1253_v46, 8.507059e+37  ;;  %3183 = vpow2.f32 %v3019_v55 }
 0x958   :  { %v3180_v41 = vpop.eup %3179 }
 0x959   :  { %v1245_v43 = vmul.f32 %v3180_v41, %v1243_v37  ;;  %vm1250_vm5 = vweird.f32 %v3180_v41  ;;  %v3182_v53 = vpop.eup %3181  ;;  %v1298_v37 = vld [vmem:[#allocation2] sm:$0x30] }
 0x95a   :  { %vm1251_vm8 = vmor %vm1249_vm6, %vm1250_vm5  ;;  %v3184_v57 = vpop.eup %3183 }
 0x95b   :  { %v1246_v44 = vsub.f32 1.0, %v1245_v43  ;;  %v1263_v58 = vadd.f32 1.0, %v3184_v57 }
 0x95d   :  { %v1247_v47 = vmul.f32 %v3180_v41, %v1246_v44  ;;  %3185 = vrcp.f32 %v1263_v58  ;;  %v1275_v7 = vand.u32 2147483648, %v1263_v58  ;;  %vm1269_vm11 = vweird.f32 %v1263_v58 }
 0x95e   :  { %v1273_v8 = vand.u32 2147483647, %v1263_v58 }
 0x95f   :  { %v1248_v48 = vadd.f32 %v3180_v41, %v1247_v47  ;;  %v1276_v12 = vor.u32 1.1754944e-38, %v1275_v7 }
 0x960   :  { %vm1274_vm12 = vcmp.eq.f32.partialorder %v1273_v8, 8.507059e+37 }
 0x961   :  { %v1252_v51 = vsel %vm1251_vm8, %v3180_v41, %v1248_v48 }
 0x962   :  { %v1257_v52 = vsel %vm1254_vm9, %v1256_v49, %v1252_v51 }
 0x963   :  { %v1283_v60 = vmul.f32 %v3182_v53, %v1257_v52  ;;  %v1282_v54 = vmul.f32 %v1280_v50, %v1257_v52  ;;  %v3186_v59 = vpop.eup %3185 }
 0x964   :  { %v1265_v61 = vmul.f32 %v3186_v59, %v1263_v58  ;;  %vm1270_vm10 = vweird.f32 %v3186_v59 }
 0x965   :  { %1285 = vrot.lane.b32.xlu0 %v1283_v60, %s3605_s28  ;;  %vm1271_vm7 = vmor %vm1269_vm11, %vm1270_vm10 }
 0x966   :  { %v1266_v62 = vsub.f32 1.0, %v1265_v61 }
 0x968   :  { %v1267_v63 = vmul.f32 %v3186_v59, %v1266_v62 }
 0x96a   :  { %v1268_v4 = vadd.f32 %v3186_v59, %v1267_v63 }
 0x96c   :  { %v1272_v11 = vsel %vm1271_vm7, %v3186_v59, %v1268_v4 }
 0x96d   :  { %v1277_v14 = vsel %vm1274_vm12, %v1276_v12, %v1272_v11 }
 0x9d7   :  { %v1286_v0 = vpop.permute.xlu0 %1285 }
 0x9d8   :  { %v4114_v3 = vadd.f32 %v1286_v0, %v1282_v54 }
 0x9da   :  { %3187 = vtanh.f32 %v4114_v3  ;;  %v1392_v46 = vrot.slane %v4114_v3, 6 }
 0x9e0   :  { %v3188_v13 = vpop.eup %3187 }
 0x9e1   :  { %v4117_v56 = vmul.f32 %v3188_v13, %v1277_v14 }
 0x9e3   :  { %v1299_v22 = vrot.slane %v4117_v56, 2 }
 0x9e5   :  { %1300 = vrot.lane.b32.xlu1 %v1299_v22, %s3605_s28 }
 0xa57   :  { %v1301_v25 = vpop.permute.xlu1 %1300 }
 0xa58   :  { %3020 = vmatmul.msk.f32.vlgmr.msra.gmra.mxu1 %vm418_vm15, %v1301_v25  ;;  %3021 = vmatmul.msk.f32.vlgmr.msra.gmra.mxu2 %vm418_vm15, %v1301_v25 }
 0xa59   :  { %1749 = vmatpush.msra.mxu1 %v3942_v1  ;;  %1769 = vmatpush.msra.mxu2 %v3944_v2 }
 0xa5b   :  { %1750 = vmatpush.msra.mxu1 %v3949_v5  ;;  %1770 = vmatpush.msra.mxu2 %v3951_v6 }
 0xa5d   :  { %1751 = vmatpush.msra.mxu1 %v3955_v9  ;;  %1771 = vmatpush.msra.mxu2 %v3957_v10 }
 0xa5f   :  { %1752 = vmatpush.msra.mxu1 %v3964_v15  ;;  %1772 = vmatpush.msra.mxu2 %v3966_v16 }
 0xa61   :  { %1753 = vmatpush.msra.mxu1 %v3968_v17  ;;  %1773 = vmatpush.msra.mxu2 %v3975_v18 }
 0xa63   :  { %1754 = vmatpush.msra.mxu1 %v3978_v19  ;;  %1774 = vmatpush.msra.mxu2 %v3980_v20 }
 0xa65   :  { %1755 = vmatpush.msra.mxu1 %v3986_v23  ;;  %1775 = vmatpush.msra.mxu2 %v3988_v24 }
 0xa67   :  { %1756 = vmatpush.msra.mxu1 %v3998_v28  ;;  %1776 = vmatpush.msra.mxu2 %v4000_v29 }
 0xad5   :  { %v1321_v26 = vpop.f32.mrf.mxu1 }
 0xad6   :  { %v1346_v27 = vrot.slane %v1321_v26, 4 }
 0xad8   :  { %v1350_v31 = vadd.f32 %v1346_v27, %v1297_v30 }
 0xada   :  { %v3022_v32 = vmul.f32 -1.442695, %v1350_v31 }
 0xadb   :  { %v1341_v35 = vpop.f32.mrf.mxu2 }
 0xadc   :  { %3189 = vpow2.f32 %v3022_v32  ;;  %v1347_v36 = vrot.slane %v1341_v35, 4 }
 0xade   :  { %v1351_v39 = vadd.f32 %v1347_v36, %v1298_v37 }
 0xae0   :  { %v3023_v52 = vmul.f32 -1.442695, %v1351_v39 }
 0xae2   :  { %v3190_v33 = vpop.eup %3189 }
 0xae3   :  { %v1355_v34 = vadd.f32 1.0, %v3190_v33 }
 0xae5   :  { %3191 = vrcp.f32 %v1355_v34  ;;  %v1367_v42 = vand.u32 2147483648, %v1355_v34  ;;  %v1365_v44 = vand.u32 2147483647, %v1355_v34  ;;  %vm1361_vm14 = vweird.f32 %v1355_v34 }
 0xae6   :  { %3193 = vtanh.f32 %v1351_v39 }
 0xae7   :  { %v1368_v47 = vor.u32 1.1754944e-38, %v1367_v42  ;;  %vm1366_vm1 = vcmp.eq.f32.partialorder %v1365_v44, 8.507059e+37  ;;  %3195 = vpow2.f32 %v3023_v52 }
 0xaeb   :  { %v3192_v38 = vpop.eup %3191 }
 0xaec   :  { %v1357_v40 = vmul.f32 %v3192_v38, %v1355_v34  ;;  %vm1362_vm13 = vweird.f32 %v3192_v38  ;;  %v3194_v49 = vpop.eup %3193 }
 0xaed   :  { %vm1363_vm0 = vmor %vm1361_vm14, %vm1362_vm13  ;;  %v3196_v60 = vpop.eup %3195 }
 0xaee   :  { %v1358_v41 = vsub.f32 1.0, %v1357_v40  ;;  %v1375_v54 = vadd.f32 1.0, %v3196_v60  ;;  %v1521_v60 = vld [vmem:[#allocation2 + $0x18] sm:$0x3] }
 0xaf0   :  { %v1359_v43 = vmul.f32 %v3192_v38, %v1358_v41  ;;  %3197 = vrcp.f32 %v1375_v54  ;;  %v1387_v0 = vand.u32 2147483648, %v1375_v54  ;;  %vm1381_vm3 = vweird.f32 %v1375_v54 }
 0xaf1   :  { %v1385_v3 = vand.u32 2147483647, %v1375_v54 }
 0xaf2   :  { %v1360_v45 = vadd.f32 %v3192_v38, %v1359_v43  ;;  %v1388_v7 = vor.u32 1.1754944e-38, %v1387_v0 }
 0xaf3   :  { %vm1386_vm6 = vcmp.eq.f32.partialorder %v1385_v3, 8.507059e+37 }
 0xaf4   :  { %v1364_v48 = vsel %vm1363_vm0, %v3192_v38, %v1360_v45 }
 0xaf5   :  { %v1369_v50 = vsel %vm1366_vm1, %v1368_v47, %v1364_v48 }
 0xaf6   :  { %v1395_v51 = vmul.f32 %v3194_v49, %v1369_v50  ;;  %v1394_v53 = vmul.f32 %v1392_v46, %v1369_v50  ;;  %v3198_v55 = vpop.eup %3197 }
 0xaf7   :  { %v1377_v57 = vmul.f32 %v3198_v55, %v1375_v54  ;;  %vm1382_vm2 = vweird.f32 %v3198_v55 }
 0xaf8   :  { %1397 = vrot.lane.b32.xlu0 %v1395_v51, %s3605_s28  ;;  %vm1383_vm5 = vmor %vm1381_vm3, %vm1382_vm2 }
 0xaf9   :  { %v1378_v58 = vsub.f32 1.0, %v1377_v57 }
 0xafb   :  { %v1379_v59 = vmul.f32 %v3198_v55, %v1378_v58 }
 0xafd   :  { %v1380_v63 = vadd.f32 %v3198_v55, %v1379_v59 }
 0xaff   :  { %v1384_v4 = vsel %vm1383_vm5, %v3198_v55, %v1380_v63 }
 0xb00   :  { %v1389_v11 = vsel %vm1386_vm6, %v1388_v7, %v1384_v4 }
 0xb6a   :  { %v1398_v61 = vpop.permute.xlu0 %1397 }
 0xb6b   :  { %v4141_v62 = vadd.f32 %v1398_v61, %v1394_v53 }
 0xb6d   :  { %3199 = vtanh.f32 %v4141_v62  ;;  %v1504_v27 = vrot.slane %v4141_v62, 6  ;;  %v1522_v62 = vld [vmem:[#allocation2 + $0x8] sm:$0x3] }
 0xb73   :  { %v3200_v8 = vpop.eup %3199 }
 0xb74   :  { %v4144_v12 = vmul.f32 %v3200_v8, %v1389_v11 }
 0xb76   :  { %v1411_v13 = vrot.slane %v4144_v12, 4 }
 0xb78   :  { %1412 = vrot.lane.b32.xlu2 %v1411_v13, %s3605_s28 }
 0xbd2   :  { %v1413_v14 = vpop.permute.xlu2 %1412 }
 0xbd3   :  { %3024 = vmatmul.msk.f32.vlgmr.msra.gmra.mxu0 %vm418_vm15, %v1413_v14  ;;  %3025 = vmatmul.msk.f32.vlgmr.msra.gmra.mxu3 %vm418_vm15, %v1413_v14 }
 0xbd4   :  { %1860 = vmatpush.msra.mxu0 %v3942_v1  ;;  %1880 = vmatpush.msra.mxu3 %v3944_v2 }
 0xbd6   :  { %1861 = vmatpush.msra.mxu0 %v3949_v5  ;;  %1881 = vmatpush.msra.mxu3 %v3951_v6  ;;  %v1409_v5 = vld [vmem:[#allocation2 + $0x10] sm:$0xc0] }
 0xbd8   :  { %1862 = vmatpush.msra.mxu0 %v3955_v9  ;;  %1882 = vmatpush.msra.mxu3 %v3957_v10 }
 0xbda   :  { %1863 = vmatpush.msra.mxu0 %v3964_v15  ;;  %1883 = vmatpush.msra.mxu3 %v3966_v16 }
 0xbdc   :  { %1864 = vmatpush.msra.mxu0 %v3968_v17  ;;  %1884 = vmatpush.msra.mxu3 %v3975_v18  ;;  %v1410_v18 = vld [vmem:[#allocation2] sm:$0xc0] }
 0xbde   :  { %1865 = vmatpush.msra.mxu0 %v3978_v19  ;;  %1885 = vmatpush.msra.mxu3 %v3980_v20 }
 0xbe0   :  { %1866 = vmatpush.msra.mxu0 %v3986_v23  ;;  %1886 = vmatpush.msra.mxu3 %v3988_v24 }
 0xbe2   :  { %1867 = vmatpush.msra.mxu0 %v3998_v28  ;;  %1887 = vmatpush.msra.mxu3 %v4000_v29 }
 0xc50   :  { %v1433_v1 = vpop.f32.mrf.mxu0 }
 0xc51   :  { %v1458_v2 = vrot.slane %v1433_v1, 2 }
 0xc53   :  { %v1462_v6 = vadd.f32 %v1458_v2, %v1409_v5 }
 0xc55   :  { %v3026_v9 = vmul.f32 -1.442695, %v1462_v6 }
 0xc56   :  { %v1453_v16 = vpop.f32.mrf.mxu3 }
 0xc57   :  { %3201 = vpow2.f32 %v3026_v9  ;;  %v1459_v17 = vrot.slane %v1453_v16, 2 }
 0xc59   :  { %v1463_v20 = vadd.f32 %v1459_v17, %v1410_v18 }
 0xc5b   :  { %v3027_v35 = vmul.f32 -1.442695, %v1463_v20 }
 0xc5d   :  { %v3202_v10 = vpop.eup %3201 }
 0xc5e   :  { %v1467_v15 = vadd.f32 1.0, %v3202_v10 }
 0xc60   :  { %3203 = vrcp.f32 %v1467_v15  ;;  %v1479_v28 = vand.u32 2147483648, %v1467_v15  ;;  %v1477_v29 = vand.u32 2147483647, %v1467_v15  ;;  %vm1473_vm9 = vweird.f32 %v1467_v15 }
 0xc61   :  { %3205 = vtanh.f32 %v1463_v20 }
 0xc62   :  { %v1480_v26 = vor.u32 1.1754944e-38, %v1479_v28  ;;  %vm1478_vm11 = vcmp.eq.f32.partialorder %v1477_v29, 8.507059e+37  ;;  %3207 = vpow2.f32 %v3027_v35 }
 0xc66   :  { %v3204_v19 = vpop.eup %3203 }
 0xc67   :  { %v1469_v23 = vmul.f32 %v3204_v19, %v1467_v15  ;;  %vm1474_vm8 = vweird.f32 %v3204_v19  ;;  %v3206_v31 = vpop.eup %3205 }
 0xc68   :  { %vm1475_vm10 = vmor %vm1473_vm9, %vm1474_vm8  ;;  %v3208_v36 = vpop.eup %3207 }
 0xc69   :  { %v1470_v24 = vsub.f32 1.0, %v1469_v23  ;;  %v1487_v37 = vadd.f32 1.0, %v3208_v36  ;;  %v1626_v36 = vld [vmem:[#allocation2 + $0x18] sm:$0xc] }
 0xc6b   :  { %v1471_v22 = vmul.f32 %v3204_v19, %v1470_v24  ;;  %3209 = vrcp.f32 %v1487_v37  ;;  %v1499_v45 = vand.u32 2147483648, %v1487_v37  ;;  %vm1493_vm12 = vweird.f32 %v1487_v37 }
 0xc6c   :  { %v1497_v47 = vand.u32 2147483647, %v1487_v37 }
 0xc6d   :  { %v1472_v25 = vadd.f32 %v3204_v19, %v1471_v22  ;;  %v1500_v48 = vor.u32 1.1754944e-38, %v1499_v45 }
 0xc6e   :  { %vm1498_vm14 = vcmp.eq.f32.partialorder %v1497_v47, 8.507059e+37 }
 0xc6f   :  { %v1476_v30 = vsel %vm1475_vm10, %v3204_v19, %v1472_v25 }
 0xc70   :  { %v1481_v32 = vsel %vm1478_vm11, %v1480_v26, %v1476_v30 }
 0xc71   :  { %v1507_v33 = vmul.f32 %v3206_v31, %v1481_v32  ;;  %v1506_v34 = vmul.f32 %v1504_v27, %v1481_v32  ;;  %v3210_v38 = vpop.eup %3209 }
 0xc72   :  { %v1489_v39 = vmul.f32 %v3210_v38, %v1487_v37  ;;  %vm1494_vm7 = vweird.f32 %v3210_v38 }
 0xc73   :  { %1509 = vrot.lane.b32.xlu1 %v1507_v33, %s3605_s28  ;;  %vm1495_vm13 = vmor %vm1493_vm12, %vm1494_vm7 }
 0xc74   :  { %v1490_v40 = vsub.f32 1.0, %v1489_v39 }
 0xc76   :  { %v1491_v41 = vmul.f32 %v3210_v38, %v1490_v40 }
 0xc78   :  { %v1492_v44 = vadd.f32 %v3210_v38, %v1491_v41 }
 0xc7a   :  { %v1496_v46 = vsel %vm1495_vm13, %v3210_v38, %v1492_v44 }
 0xc7b   :  { %v1501_v50 = vsel %vm1498_vm14, %v1500_v48, %v1496_v46 }
 0xce5   :  { %v1510_v42 = vpop.permute.xlu1 %1509 }
 0xce6   :  { %v1512_v43 = vadd.f32 %v1510_v42, %v1506_v34 }
 0xce8   :  { %3211 = vtanh.f32 %v1512_v43  ;;  %v1610_v1 = vrot.slane %v1512_v43, 6  ;;  %v1627_v43 = vld [vmem:[#allocation2 + $0x8] sm:$0xc] }
 0xcee   :  { %v3212_v49 = vpop.eup %3211 }
 0xcef   :  { %v4168_v51 = vmul.f32 %v3212_v49, %v1501_v50 }
 0xcf1   :  { %v1523_v53 = vrot.slane %v4168_v51, 6 }
 0xcf3   :  { %1524 = vrot.lane.b32.xlu0 %v1523_v53, %s3605_s28 }
 0xd65   :  { %v1525_v52 = vpop.permute.xlu0 %1524 }
 0xd66   :  { %3028 = vmatmul.msk.f32.vlgmr.msrb.gmra.mxu1 %vm418_vm15, %v1525_v52  ;;  %3029 = vmatmul.msk.f32.vlgmr.msrb.gmra.mxu2 %vm418_vm15, %v1525_v52 }
 0xde3   :  { %v1545_v54 = vpop.f32.mrf.mxu1 }
 0xde4   :  { %v1568_v55 = vadd.f32 %v1545_v54, %v1521_v60 }
 0xde6   :  { %v3030_v57 = vmul.f32 -1.442695, %v1568_v55 }
 0xde8   :  { %3213 = vpow2.f32 %v3030_v57 }
 0xde9   :  { %v1565_v61 = vpop.f32.mrf.mxu2 }
 0xdea   :  { %v1569_v0 = vadd.f32 %v1565_v61, %v1522_v62 }
 0xdec   :  { %v3031_v15 = vmul.f32 -1.442695, %v1569_v0 }
 0xdee   :  { %v3214_v58 = vpop.eup %3213 }
 0xdef   :  { %v1573_v59 = vadd.f32 1.0, %v3214_v58 }
 0xdf1   :  { %3215 = vrcp.f32 %v1573_v59  ;;  %v1585_v7 = vand.u32 2147483648, %v1573_v59  ;;  %v1583_v11 = vand.u32 2147483647, %v1573_v59  ;;  %vm1579_vm1 = vweird.f32 %v1573_v59 }
 0xdf2   :  { %3217 = vtanh.f32 %v1569_v0 }
 0xdf3   :  { %v1586_v14 = vor.u32 1.1754944e-38, %v1585_v7  ;;  %vm1584_vm3 = vcmp.eq.f32.partialorder %v1583_v11, 8.507059e+37  ;;  %3219 = vpow2.f32 %v3031_v15 }
 0xdf7   :  { %v3216_v63 = vpop.eup %3215 }
 0xdf8   :  { %v1575_v3 = vmul.f32 %v3216_v63, %v1573_v59  ;;  %vm1580_vm0 = vweird.f32 %v3216_v63  ;;  %v3218_v5 = vpop.eup %3217 }
 0xdf9   :  { %vm1581_vm2 = vmor %vm1579_vm1, %vm1580_vm0  ;;  %v3220_v16 = vpop.eup %3219  ;;  %vm1295_vm1 = vcmask 519170  }
 0xdfa   :  { %v1576_v4 = vsub.f32 1.0, %v1575_v3  ;;  %v1593_v17 = vadd.f32 1.0, %v3220_v16 }
 0xdfc   :  { %v1577_v8 = vmul.f32 %v3216_v63, %v1576_v4  ;;  %3221 = vrcp.f32 %v1593_v17  ;;  %v1605_v29 = vand.u32 2147483648, %v1593_v17  ;;  %vm1599_vm6 = vweird.f32 %v1593_v17 }
 0xdfd   :  { %v1603_v25 = vand.u32 2147483647, %v1593_v17 }
 0xdfe   :  { %v1578_v13 = vadd.f32 %v3216_v63, %v1577_v8  ;;  %v1606_v27 = vor.u32 1.1754944e-38, %v1605_v29 }
 0xdff   :  { %vm1604_vm9 = vcmp.eq.f32.partialorder %v1603_v25, 8.507059e+37  ;;  %v1735_v25 = vld [vmem:[#allocation2 + $0x8] sm:$0x30] }
 0xe00   :  { %v1582_v2 = vsel %vm1581_vm2, %v3216_v63, %v1578_v13 }
 0xe01   :  { %v1587_v6 = vsel %vm1584_vm3, %v1586_v14, %v1582_v2  ;;  %vm1407_vm3 = vcmask 521220  }
 0xe02   :  { %v1613_v9 = vmul.f32 %v3218_v5, %v1587_v6  ;;  %v1612_v10 = vmul.f32 %v1610_v1, %v1587_v6  ;;  %v3222_v18 = vpop.eup %3221 }
 0xe03   :  { %v1595_v19 = vmul.f32 %v3222_v18, %v1593_v17  ;;  %vm1600_vm5 = vweird.f32 %v3222_v18 }
 0xe04   :  { %1615 = vrot.lane.b32.xlu2 %v1613_v9, %s3605_s28  ;;  %vm1601_vm8 = vmor %vm1599_vm6, %vm1600_vm5 }
 0xe05   :  { %v1596_v20 = vsub.f32 1.0, %v1595_v19 }
 0xe07   :  { %v1597_v23 = vmul.f32 %v3222_v18, %v1596_v20  ;;  %v1734_v20 = vld [vmem:[#allocation2 + $0x18] sm:$0x30] }
 0xe09   :  { %v1598_v22 = vadd.f32 %v3222_v18, %v1597_v23 }
 0xe0b   :  { %v1602_v26 = vsel %vm1601_vm8, %v3222_v18, %v1598_v22 }
 0xe0c   :  { %v1607_v31 = vsel %vm1604_vm9, %v1606_v27, %v1602_v26 }
 0xe5e   :  { %v1616_v24 = vpop.permute.xlu2 %1615 }
 0xe5f   :  { %v1618_v28 = vadd.f32 %v1616_v24, %v1612_v10 }
 0xe61   :  { %3223 = vtanh.f32 %v1618_v28  ;;  %v1718_v60 = vrot.slane %v1618_v28, 6 }
 0xe67   :  { %v3224_v30 = vpop.eup %3223 }
 0xe68   :  { %v1620_v32 = vmul.f32 %v3224_v30, %v1607_v31 }
 0xe6a   :  { %1622 = vrot.lane.b32.xlu1 %v1620_v32, %s3605_s28 }
 0xedc   :  { %v1623_v33 = vpop.permute.xlu1 %1622 }
 0xedd   :  { %1625 = vst.msk [vmem:[#allocation3 + $0x8] sm:$0x3] %vm1186_vm4, %v1623_v33  ;;  %3032 = vmatmul.msk.f32.vlgmr.msrb.gmra.mxu0 %vm418_vm15, %v1623_v33  ;;  %3033 = vmatmul.msk.f32.vlgmr.msrb.gmra.mxu3 %vm418_vm15, %v1623_v33 }
 0xf5a   :  { %v1647_v34 = vpop.f32.mrf.mxu0 }
 0xf5b   :  { %v1672_v35 = vrot.slane %v1647_v34, 6 }
 0xf5d   :  { %v1676_v37 = vadd.f32 %v1672_v35, %v1626_v36 }
 0xf5f   :  { %v3034_v38 = vmul.f32 -1.442695, %v1676_v37 }
 0xf60   :  { %v1667_v41 = vpop.f32.mrf.mxu3 }
 0xf61   :  { %3225 = vpow2.f32 %v3034_v38  ;;  %v1673_v42 = vrot.slane %v1667_v41, 6 }
 0xf63   :  { %v1677_v45 = vadd.f32 %v1673_v42, %v1627_v43 }
 0xf65   :  { %v3035_v61 = vmul.f32 -1.442695, %v1677_v45 }
 0xf67   :  { %v3226_v39 = vpop.eup %3225 }
 0xf68   :  { %v1681_v40 = vadd.f32 1.0, %v3226_v39 }
 0xf6a   :  { %3227 = vrcp.f32 %v1681_v40  ;;  %v1693_v48 = vand.u32 2147483648, %v1681_v40  ;;  %v1691_v50 = vand.u32 2147483647, %v1681_v40  ;;  %vm1687_vm11 = vweird.f32 %v1681_v40 }
 0xf6b   :  { %3229 = vtanh.f32 %v1677_v45  ;;  %v1974_v45 = vld [vmem:[#allocation15 + $0xf8] sm:$0xff] }
 0xf6c   :  { %v1694_v52 = vor.u32 1.1754944e-38, %v1693_v48  ;;  %vm1692_vm12 = vcmp.eq.f32.partialorder %v1691_v50, 8.507059e+37  ;;  %3231 = vpow2.f32 %v3035_v61  ;;  %2019 = vmatpush.msrb.mxu2 %v1974_v45  ;;  %v1969_v48 = vld [vmem:[#allocation15 + $0xd0] sm:$0xff]  ;;  %v1959_v61 = vld [vmem:[#allocation15 + $0x80] sm:$0xff] }
 0xf70   :  { %v3228_v44 = vpop.eup %3227 }
 0xf71   :  { %v1683_v47 = vmul.f32 %v3228_v44, %v1681_v40  ;;  %vm1688_vm10 = vweird.f32 %v3228_v44  ;;  %v3230_v55 = vpop.eup %3229 }
 0xf72   :  { %vm1689_vm7 = vmor %vm1687_vm11, %vm1688_vm10  ;;  %v3232_v62 = vpop.eup %3231 }
 0xf73   :  { %v1684_v46 = vsub.f32 1.0, %v1683_v47  ;;  %v1701_v63 = vadd.f32 1.0, %v3232_v62  ;;  %v1971_v47 = vld [vmem:[#allocation15 + $0xe0] sm:$0xff]  ;;  %v1960_v62 = vld [vmem:[#allocation15 + $0x88] sm:$0xff] }
 0xf75   :  { %v1685_v49 = vmul.f32 %v3228_v44, %v1684_v46  ;;  %3233 = vrcp.f32 %v1701_v63  ;;  %v1713_v14 = vand.u32 2147483648, %v1701_v63  ;;  %vm1707_vm14 = vweird.f32 %v1701_v63  ;;  %v1972_v46 = vld [vmem:[#allocation15 + $0xe8] sm:$0xff] }
 0xf76   :  { %v1711_v1 = vand.u32 2147483647, %v1701_v63  ;;  %2020 = vmatpush.msrb.mxu2 %v1972_v46 }
 0xf77   :  { %v1686_v53 = vadd.f32 %v3228_v44, %v1685_v49  ;;  %v1714_v2 = vor.u32 1.1754944e-38, %v1713_v14  ;;  %v1970_v49 = vld [vmem:[#allocation15 + $0xd8] sm:$0xff] }
 0xf78   :  { %vm1712_vm2 = vcmp.eq.f32.partialorder %v1711_v1, 8.507059e+37  ;;  %2021 = vmatpush.msrb.mxu2 %v1970_v49  ;;  %v4215_v1 = vld [vmem:[#allocation16 + $0xc0] sm:$0xff] }
 0xf79   :  { %v1690_v54 = vsel %vm1689_vm7, %v3228_v44, %v1686_v53  ;;  %v1973_v44 = vld [vmem:[#allocation15 + $0xf0] sm:$0xff]  ;;  %v1967_v53 = vld [vmem:[#allocation15 + $0xc0] sm:$0xff] }
 0xf7a   :  { %v1695_v57 = vsel %vm1692_vm12, %v1694_v52, %v1690_v54  ;;  %1996 = vmatpush.msrb.mxu1 %v1973_v44  ;;  %v1968_v52 = vld [vmem:[#allocation15 + $0xc8] sm:$0xff]  ;;  %v1966_v54 = vld [vmem:[#allocation15 + $0xb8] sm:$0xff]  ;;  %vm1519_vm12 = vcmask 523270  }
 0xf7b   :  { %v1721_v58 = vmul.f32 %v3230_v55, %v1695_v57  ;;  %v1720_v59 = vmul.f32 %v1718_v60, %v1695_v57  ;;  %v3234_v0 = vpop.eup %3233  ;;  %2022 = vmatpush.msrb.mxu2 %v1968_v52  ;;  %v1963_v55 = vld [vmem:[#allocation15 + $0xa0] sm:$0xff]  ;;  %v1964_v57 = vld [vmem:[#allocation15 + $0xa8] sm:$0xff] }
 0xf7c   :  { %v1703_v3 = vmul.f32 %v3234_v0, %v1701_v63  ;;  %vm1708_vm13 = vweird.f32 %v3234_v0  ;;  %1997 = vmatpush.msrb.mxu1 %v1971_v47 }
 0xf7d   :  { %1723 = vrot.lane.b32.xlu0 %v1721_v58, %s3605_s28  ;;  %vm1709_vm0 = vmor %vm1707_vm14, %vm1708_vm13  ;;  %2023 = vmatpush.msrb.mxu2 %v1966_v54  ;;  %v1961_v58 = vld [vmem:[#allocation15 + $0x90] sm:$0xff] }
 0xf7e   :  { %v1704_v4 = vsub.f32 1.0, %v1703_v3  ;;  %1998 = vmatpush.msrb.mxu1 %v1969_v48  ;;  %v4197_v3 = vld [vmem:[#allocation16 + $0xf0] sm:$0xff] }
 0xf7f   :  { %2024 = vmatpush.msrb.mxu2 %v1964_v57  ;;  %2065 = vmatpush.msrb.mxu0 %v4197_v3 }
 0xf80   :  { %v1705_v7 = vmul.f32 %v3234_v0, %v1704_v4  ;;  %1999 = vmatpush.msrb.mxu1 %v1967_v53  ;;  %v4199_v4 = vld [vmem:[#allocation16 + $0xf8] sm:$0xff] }
 0xf81   :  { %2085 = vmatpush.msrb.mxu3 %v4199_v4 }
 0xf82   :  { %v1706_v13 = vadd.f32 %v3234_v0, %v1705_v7  ;;  %v4201_v7 = vld [vmem:[#allocation16 + $0xe0] sm:$0xff] }
 0xf83   :  { %2066 = vmatpush.msrb.mxu0 %v4201_v7 }
 0xf85   :  { %1292 = vrot.lane.b32.xlu0 %v4117_v56, %s3605_s28  ;;  %v1710_v56 = vsel %vm1709_vm0, %v3234_v0, %v1706_v13  ;;  %v4209_v13 = vld [vmem:[#allocation16 + $0xd8] sm:$0xff] }
 0xf86   :  { %v1715_v9 = vsel %vm1712_vm2, %v1714_v2, %v1710_v56  ;;  %v4217_v56 = vld [vmem:[#allocation16 + $0xc8] sm:$0xff] }
 0xfef   :  { %v1724_v8 = vpop.permute.xlu0 %1723 }
 0xff0   :  { %v1726_v11 = vadd.f32 %v1724_v8, %v1720_v59  ;;  %v1962_v59 = vld [vmem:[#allocation15 + $0x98] sm:$0xff]  ;;  %v4205_v8 = vld [vmem:[#allocation16 + $0xe8] sm:$0xff] }
 0xff1   :  { %2025 = vmatpush.msrb.mxu2 %v1962_v59  ;;  %2086 = vmatpush.msrb.mxu3 %v4205_v8 }
 0xff2   :  { %3235 = vtanh.f32 %v1726_v11  ;;  %v1829_v37 = vrot.slane %v1726_v11, 6  ;;  %v4207_v11 = vld [vmem:[#allocation16 + $0xd0] sm:$0xff] }
 0xff3   :  { %2026 = vmatpush.msrb.mxu2 %v1960_v62  ;;  %2067 = vmatpush.msrb.mxu0 %v4207_v11 }
 0xff4   :  { %2087 = vmatpush.msrb.mxu3 %v4209_v13 }
 0xff5   :  { %2068 = vmatpush.msrb.mxu0 %v4215_v1 }
 0xff6   :  { %2088 = vmatpush.msrb.mxu3 %v4217_v56 }
 0xff7   :  { %v1293_v5 = vpop.permute.xlu0 %1292 }
 0xff8   :  { %v3236_v6 = vpop.eup %3235  ;;  %1296 = vst.msk [vmem:[#allocation3] sm:$0xc] %vm1295_vm1, %v1293_v5 }
 0xff9   :  { %v4183_v10 = vmul.f32 %v3236_v6, %v1715_v9 }
 0xffb   :  { %v1736_v15 = vrot.slane %v4183_v10, 2 }
 0xffd   :  { %1737 = vrot.lane.b32.xlu2 %v1736_v15, %s3605_s28 }
0x1005   :  { %1404 = vrot.lane.b32.xlu2 %v4144_v12, %s3605_s28 }
0x1057   :  { %v1738_v16 = vpop.permute.xlu2 %1737 }
0x1058   :  { %3036 = vmatmul.msk.f32.vlgmr.msra.gmra.mxu1 %vm418_vm15, %v1738_v16  ;;  %3037 = vmatmul.msk.f32.vlgmr.msra.gmra.mxu2 %vm418_vm15, %v1738_v16 }
0x1059   :  { %2184 = vmatpush.msra.mxu2 %v4199_v4 }
0x105b   :  { %2185 = vmatpush.msra.mxu2 %v4205_v8 }
0x105d   :  { %2186 = vmatpush.msra.mxu2 %v4209_v13 }
0x105f   :  { %v1405_v17 = vpop.permute.xlu2 %1404  ;;  %2187 = vmatpush.msra.mxu2 %v4217_v56 }
0x1060   :  { %1408 = vst.msk [vmem:[#allocation3] sm:$0x30] %vm1407_vm3, %v1405_v17 }
0x10d5   :  { %v1758_v18 = vpop.f32.mrf.mxu1 }
0x10d6   :  { %v1783_v19 = vrot.slane %v1758_v18, 4 }
0x10d8   :  { %v1787_v23 = vadd.f32 %v1783_v19, %v1734_v20 }
0x10da   :  { %v3038_v24 = vmul.f32 -1.442695, %v1787_v23 }
0x10db   :  { %v1778_v29 = vpop.f32.mrf.mxu2 }
0x10dc   :  { %3237 = vpow2.f32 %v3038_v24  ;;  %v1784_v12 = vrot.slane %v1778_v29, 4  ;;  %v4242_v29 = vld [vmem:[#allocation16 + $0xb0] sm:$0xff] }
0x10dd   :  { %2069 = vmatpush.msrb.mxu0 %v4242_v29 }
0x10de   :  { %v1788_v27 = vadd.f32 %v1784_v12, %v1735_v25  ;;  %v4244_v12 = vld [vmem:[#allocation16 + $0xb8] sm:$0xff]  ;;  %v4246_v25 = vld [vmem:[#allocation16 + $0xa0] sm:$0xff] }
0x10df   :  { %2089 = vmatpush.msrb.mxu3 %v4244_v12  ;;  %2188 = vmatpush.msra.mxu2 %v4244_v12 }
0x10e0   :  { %v3039_v43 = vmul.f32 -1.442695, %v1788_v27  ;;  %2070 = vmatpush.msrb.mxu0 %v4246_v25 }
0x10e2   :  { %v3238_v28 = vpop.eup %3237 }
0x10e3   :  { %v1792_v22 = vadd.f32 1.0, %v3238_v28 }
0x10e5   :  { %3239 = vrcp.f32 %v1792_v22  ;;  %v1804_v32 = vand.u32 2147483648, %v1792_v22  ;;  %v1802_v34 = vand.u32 2147483647, %v1792_v22  ;;  %vm1798_vm6 = vweird.f32 %v1792_v22 }
0x10e6   :  { %3241 = vtanh.f32 %v1788_v27  ;;  %v4252_v27 = vld [vmem:[#allocation16 + $0x90] sm:$0xff] }
0x10e7   :  { %v1805_v36 = vor.u32 1.1754944e-38, %v1804_v32  ;;  %vm1803_vm9 = vcmp.eq.f32.partialorder %v1802_v34, 8.507059e+37  ;;  %3243 = vpow2.f32 %v3039_v43  ;;  %2071 = vmatpush.msrb.mxu0 %v4252_v27  ;;  %v4299_v34 = vld [vmem:[%s3754_s27 + $0x2] sm:$0x3] }
0x10eb   :  { %v3240_v26 = vpop.eup %3239 }
0x10ec   :  { %v1794_v30 = vmul.f32 %v3240_v26, %v1792_v22  ;;  %vm1799_vm5 = vweird.f32 %v3240_v26  ;;  %v3242_v39 = vpop.eup %3241 }
0x10ed   :  { %vm1800_vm8 = vmor %vm1798_vm6, %vm1799_vm5  ;;  %v3244_v50 = vpop.eup %3243 }
0x10ee   :  { %v1795_v31 = vsub.f32 1.0, %v1794_v30  ;;  %v1812_v60 = vadd.f32 1.0, %v3244_v50  ;;  %v4254_v30 = vld [vmem:[#allocation16 + $0x98] sm:$0xff] }
0x10f0   :  { %v1796_v33 = vmul.f32 %v3240_v26, %v1795_v31  ;;  %3245 = vrcp.f32 %v1812_v60  ;;  %v1824_v15 = vand.u32 2147483648, %v1812_v60  ;;  %vm1818_vm11 = vweird.f32 %v1812_v60  ;;  %v4262_v31 = vld [vmem:[#allocation16 + $0x88] sm:$0xff] }
0x10f1   :  { %v1822_v16 = vand.u32 2147483647, %v1812_v60 }
0x10f2   :  { %v1797_v35 = vadd.f32 %v3240_v26, %v1796_v33  ;;  %v1825_v18 = vor.u32 1.1754944e-38, %v1824_v15 }
0x10f3   :  { %vm1823_vm13 = vcmp.eq.f32.partialorder %v1822_v16, 8.507059e+37 }
0x10f4   :  { %v1801_v38 = vsel %vm1800_vm8, %v3240_v26, %v1797_v35  ;;  %v4250_v26 = vld [vmem:[#allocation16 + $0xa8] sm:$0xff]  ;;  %v1978_v35 = vperm.slane %v4299_v34, 0 }
0x10f5   :  { %v1806_v40 = vsel %vm1803_vm9, %v1805_v36, %v1801_v38  ;;  %2090 = vmatpush.msrb.mxu3 %v4250_v26  ;;  %2189 = vmatpush.msra.mxu2 %v4250_v26 }
0x10f6   :  { %v1832_v41 = vmul.f32 %v3242_v39, %v1806_v40  ;;  %v4192_v42 = vmul.f32 %v1829_v37, %v1806_v40  ;;  %v3246_v63 = vpop.eup %3245 }
0x10f7   :  { %v1814_v0 = vmul.f32 %v3246_v63, %v1812_v60  ;;  %vm1819_vm10 = vweird.f32 %v3246_v63  ;;  %2091 = vmatpush.msrb.mxu3 %v4254_v30  ;;  %2190 = vmatpush.msra.mxu2 %v4254_v30 }
0x10f8   :  { %1834 = vrot.lane.b32.xlu1 %v1832_v41, %s3605_s28  ;;  %vm1820_vm7 = vmor %vm1818_vm11, %vm1819_vm10 }
0x10f9   :  { %v1815_v14 = vsub.f32 1.0, %v1814_v0  ;;  %2092 = vmatpush.msrb.mxu3 %v4262_v31  ;;  %2191 = vmatpush.msra.mxu2 %v4262_v31 }
0x10fb   :  { %v1816_v2 = vmul.f32 %v3246_v63, %v1815_v14 }
0x10fd   :  { %v1817_v9 = vadd.f32 %v3246_v63, %v1816_v2 }
0x10ff   :  { %v1821_v17 = vsel %vm1820_vm7, %v3246_v63, %v1817_v9 }
0x1100   :  { %1516 = vrot.lane.b32.xlu1 %v4168_v51, %s3605_s28  ;;  %v1965_v51 = vld [vmem:[#allocation15 + $0xb0] sm:$0xff]  ;;  %v1826_v23 = vsel %vm1823_vm13, %v1825_v18, %v1821_v17 }
0x1101   :  { %2000 = vmatpush.msrb.mxu1 %v1965_v51  ;;  %v1846_v51 = vld [vmem:[#allocation2 + $0x8] sm:$0xc0] }
0x1103   :  { %2001 = vmatpush.msrb.mxu1 %v1963_v55 }
0x1105   :  { %2002 = vmatpush.msrb.mxu1 %v1961_v58 }
0x1107   :  { %2003 = vmatpush.msrb.mxu1 %v1959_v61 }
0x1109   :  { %2164 = vmatpush.msra.mxu1 %v4197_v3 }
0x110b   :  { %2165 = vmatpush.msra.mxu1 %v4201_v7 }
0x110d   :  { %2166 = vmatpush.msra.mxu1 %v4207_v11 }
0x110f   :  { %2167 = vmatpush.msra.mxu1 %v4215_v1 }
0x1111   :  { %2168 = vmatpush.msra.mxu1 %v4242_v29 }
0x1113   :  { %2169 = vmatpush.msra.mxu1 %v4246_v25 }
0x1115   :  { %2170 = vmatpush.msra.mxu1 %v4252_v27 }
0x116a   :  { %v1835_v5 = vpop.permute.xlu1 %1834 }
0x116b   :  { %v4230_v6 = vadd.f32 %v1835_v5, %v4192_v42  ;;  %v1845_v42 = vld [vmem:[#allocation2 + $0x18] sm:$0xc0] }
0x116d   :  { %3247 = vtanh.f32 %v4230_v6  ;;  %v1940_v17 = vrot.slane %v4230_v6, 6 }
0x1172   :  { %v1517_v19 = vpop.permute.xlu1 %1516 }
0x1173   :  { %v3248_v20 = vpop.eup %3247  ;;  %1520 = vst.msk [vmem:[#allocation3] sm:$0xc0] %vm1519_vm12, %v1517_v19 }
0x1174   :  { %v4234_v24 = vmul.f32 %v3248_v20, %v1826_v23 }
0x1176   :  { %v1847_v28 = vrot.slane %v4234_v24, 4 }
0x1178   :  { %1848 = vrot.lane.b32.xlu0 %v1847_v28, %s3605_s28 }
0x117a   :  { %v1956_v22 = vld [vmem:[#allocation3] sm:$0xff] }
0x117b   :  { %3045 = vmatmul.msk.f32.vlgmr.msrb.gmra.mxu1 %vm418_vm15, %v1956_v22  ;;  %3047 = vmatmul.msk.f32.vlgmr.msrb.gmra.mxu2 %vm418_vm15, %v1956_v22 }
0x117c   :  { %2406 = vmatpush.msrb.mxu2 %v4199_v4 }
0x117e   :  { %2407 = vmatpush.msrb.mxu2 %v4205_v8 }
0x1180   :  { %1730 = vrot.lane.b32.xlu0 %v4183_v10, %s3605_s28  ;;  %v4260_v10 = vld [vmem:[#allocation16 + $0x80] sm:$0xff]  ;;  %2408 = vmatpush.msrb.mxu2 %v4209_v13 }
0x1181   :  { %2072 = vmatpush.msrb.mxu0 %v4260_v10  ;;  %2171 = vmatpush.msra.mxu1 %v4260_v10 }
0x1182   :  { %2409 = vmatpush.msrb.mxu2 %v4217_v56 }
0x1183   :  { %2386 = vmatpush.msrb.mxu1 %v4197_v3 }
0x1184   :  { %2410 = vmatpush.msrb.mxu2 %v4244_v12 }
0x1185   :  { %2387 = vmatpush.msrb.mxu1 %v4201_v7 }
0x1186   :  { %2411 = vmatpush.msrb.mxu2 %v4250_v26 }
0x1187   :  { %2388 = vmatpush.msrb.mxu1 %v4207_v11 }
0x1188   :  { %2412 = vmatpush.msrb.mxu2 %v4254_v30 }
0x1189   :  { %2389 = vmatpush.msrb.mxu1 %v4215_v1 }
0x118a   :  { %2413 = vmatpush.msrb.mxu2 %v4262_v31 }
0x118b   :  { %2390 = vmatpush.msrb.mxu1 %v4242_v29 }
0x118d   :  { %2391 = vmatpush.msrb.mxu1 %v4246_v25 }
0x118f   :  { %2392 = vmatpush.msrb.mxu1 %v4252_v27 }
0x1191   :  { %2393 = vmatpush.msrb.mxu1 %v4260_v10 }
0x11ea   :  { %v1849_v32 = vpop.permute.xlu0 %1848 }
0x11eb   :  { %3040 = vmatmul.msk.f32.vlgmr.msra.gmra.mxu0 %vm418_vm15, %v1849_v32  ;;  %3041 = vmatmul.msk.f32.vlgmr.msra.gmra.mxu3 %vm418_vm15, %v1849_v32 }
0x11ec   :  { %2275 = vmatpush.msra.mxu0 %v4197_v3  ;;  %2295 = vmatpush.msra.mxu3 %v4199_v4 }
0x11ee   :  { %2276 = vmatpush.msra.mxu0 %v4201_v7  ;;  %2296 = vmatpush.msra.mxu3 %v4205_v8 }
0x11f0   :  { %2277 = vmatpush.msra.mxu0 %v4207_v11  ;;  %2297 = vmatpush.msra.mxu3 %v4209_v13 }
0x11f2   :  { %v1731_v33 = vpop.permute.xlu0 %1730  ;;  %2278 = vmatpush.msra.mxu0 %v4215_v1  ;;  %2298 = vmatpush.msra.mxu3 %v4217_v56 }
0x11f3   :  { %1733 = vst.msk [vmem:[#allocation3 + $0x8] sm:$0xc] %vm1295_vm1, %v1731_v33  ;;  %2073 = vmatmul.f32.vlgmr.msrb.gmra.mxu0 %v3603_v21  ;;  %2093 = vmatmul.f32.vlgmr.msrb.gmra.mxu3 %v3603_v21  ;;  %v1979_v21 = vperm.slane %v4299_v34, 1 }
0x11f4   :  { %2279 = vmatpush.msra.mxu0 %v4242_v29  ;;  %2299 = vmatpush.msra.mxu3 %v4244_v12 }
0x11f6   :  { %2280 = vmatpush.msra.mxu0 %v4246_v25  ;;  %2300 = vmatpush.msra.mxu3 %v4250_v26 }
0x11f8   :  { %v2005_v36 = vpop.f32.mrf.mxu1  ;;  %2281 = vmatpush.msra.mxu0 %v4252_v27  ;;  %2301 = vmatpush.msra.mxu3 %v4254_v30 }
0x11f9   :  { %v2006_v37 = vadd.f32 %v2005_v36, %v1978_v35 }
0x11fa   :  { %2282 = vmatpush.msra.mxu0 %v4260_v10  ;;  %2302 = vmatpush.msra.mxu3 %v4262_v31 }
0x11fb   :  { %2034 = vst [vmem:[#allocation2 + $0x10] sm:$0xff] %v2006_v37 }
0x11fc   :  { %2497 = vmatpush.msrb.mxu0 %v4197_v3  ;;  %2517 = vmatpush.msrb.mxu3 %v4199_v4 }
0x11fe   :  { %2498 = vmatpush.msrb.mxu0 %v4201_v7  ;;  %2518 = vmatpush.msrb.mxu3 %v4205_v8  ;;  %v2028_v38 = vpop.f32.mrf.mxu2 }
0x11ff   :  { %v2029_v39 = vadd.f32 %v2028_v38, %v1979_v21 }
0x1200   :  { %2499 = vmatpush.msrb.mxu0 %v4207_v11  ;;  %2519 = vmatpush.msrb.mxu3 %v4209_v13 }
0x1201   :  { %2035 = vst [vmem:[#allocation2] sm:$0xff] %v2029_v39 }
0x1202   :  { %2500 = vmatpush.msrb.mxu0 %v4215_v1  ;;  %2520 = vmatpush.msrb.mxu3 %v4217_v56  ;;  %v2055_v45 = vld [vmem:[#allocation2 + $0x10] sm:$0x3] }
0x1204   :  { %2501 = vmatpush.msrb.mxu0 %v4242_v29  ;;  %2521 = vmatpush.msrb.mxu3 %v4244_v12 }
0x1206   :  { %2502 = vmatpush.msrb.mxu0 %v4246_v25  ;;  %2522 = vmatpush.msrb.mxu3 %v4250_v26 }
0x1208   :  { %2503 = vmatpush.msrb.mxu0 %v4252_v27  ;;  %2523 = vmatpush.msrb.mxu3 %v4254_v30  ;;  %v2056_v14 = vld [vmem:[#allocation2] sm:$0x3] }
0x120a   :  { %2504 = vmatpush.msrb.mxu0 %v4260_v10  ;;  %2524 = vmatpush.msrb.mxu3 %v4262_v31 }
0x1268   :  { %v1869_v40 = vpop.f32.mrf.mxu0 }
0x1269   :  { %v1894_v41 = vrot.slane %v1869_v40, 2 }
0x126b   :  { %v1898_v43 = vadd.f32 %v1894_v41, %v1845_v42 }
0x126d   :  { %v3042_v44 = vmul.f32 -1.442695, %v1898_v43 }
0x126e   :  { %v1889_v53 = vpop.f32.mrf.mxu3 }
0x126f   :  { %3249 = vpow2.f32 %v3042_v44  ;;  %v1895_v52 = vrot.slane %v1889_v53, 2 }
0x1270   :  { %v2074_v47 = vpop.f32.mrf.mxu0 }
0x1271   :  { %v2097_v46 = vadd.f32 %v2074_v47, %v2055_v45  ;;  %v1899_v57 = vadd.f32 %v1895_v52, %v1846_v51 }
0x1273   :  { %v3049_v48 = vmul.f32 -1.442695, %v2097_v46  ;;  %v3043_v42 = vmul.f32 -1.442695, %v1899_v57 }
0x1275   :  { %v3250_v49 = vpop.eup %3249  ;;  %3251 = vpow2.f32 %v3049_v48 }
0x1276   :  { %v1903_v50 = vadd.f32 1.0, %v3250_v49  ;;  %v2094_v61 = vpop.f32.mrf.mxu3 }
0x1277   :  { %v2098_v5 = vadd.f32 %v2094_v61, %v2056_v14 }
0x1278   :  { %3253 = vrcp.f32 %v1903_v50  ;;  %v1915_v62 = vand.u32 2147483648, %v1903_v50  ;;  %v1913_v0 = vand.u32 2147483647, %v1903_v50  ;;  %vm1909_vm0 = vweird.f32 %v1903_v50 }
0x1279   :  { %v3050_v48 = vmul.f32 -1.442695, %v2098_v5 }
0x127a   :  { %v1916_v16 = vor.u32 1.1754944e-38, %v1915_v62  ;;  %vm1914_vm5 = vcmp.eq.f32.partialorder %v1913_v0, 8.507059e+37 }
0x127b   :  { %v3252_v60 = vpop.eup %3251 }
0x127c   :  { %v2102_v54 = vadd.f32 1.0, %v3252_v60 }
0x127e   :  { %v3254_v55 = vpop.eup %3253  ;;  %3255 = vrcp.f32 %v2102_v54  ;;  %v2114_v22 = vand.u32 2147483648, %v2102_v54  ;;  %v2112_v36 = vand.u32 2147483647, %v2102_v54  ;;  %vm2108_vm8 = vweird.f32 %v2102_v54 }
0x127f   :  { %v1905_v58 = vmul.f32 %v3254_v55, %v1903_v50  ;;  %3257 = vtanh.f32 %v1899_v57  ;;  %vm1910_vm14 = vweird.f32 %v3254_v55 }
0x1280   :  { %vm1911_vm2 = vmor %vm1909_vm0, %vm1910_vm14  ;;  %3259 = vtanh.f32 %v2098_v5  ;;  %v2115_v38 = vor.u32 1.1754944e-38, %v2114_v22  ;;  %vm2113_vm10 = vcmp.eq.f32.partialorder %v2112_v36, 8.507059e+37 }
0x1281   :  { %v1906_v59 = vsub.f32 1.0, %v1905_v58  ;;  %3261 = vpow2.f32 %v3043_v42  ;;  %v2152_v42 = vld [vmem:[#allocation2 + $0x10] sm:$0xc] }
0x1283   :  { %v1907_v63 = vmul.f32 %v3254_v55, %v1906_v59 }
0x1284   :  { %v3256_v2 = vpop.eup %3255 }
0x1285   :  { %v1908_v9 = vadd.f32 %v3254_v55, %v1907_v63  ;;  %v2104_v15 = vmul.f32 %v3256_v2, %v2102_v54  ;;  %v3258_v19 = vpop.eup %3257  ;;  %vm2109_vm6 = vweird.f32 %v3256_v2 }
0x1286   :  { %vm2110_vm9 = vmor %vm2108_vm8, %vm2109_vm6  ;;  %v3260_v6 = vpop.eup %3259 }
0x1287   :  { %v1912_v18 = vsel %vm1911_vm2, %v3254_v55, %v1908_v9  ;;  %v2105_v23 = vsub.f32 1.0, %v2104_v15  ;;  %v3262_v43 = vpop.eup %3261 }
0x1288   :  { %v1917_v20 = vsel %vm1914_vm5, %v1916_v16, %v1912_v18  ;;  %v1923_v44 = vadd.f32 1.0, %v3262_v43 }
0x1289   :  { %v1943_v28 = vmul.f32 %v3258_v19, %v1917_v20  ;;  %v1942_v32 = vmul.f32 %v1940_v17, %v1917_v20  ;;  %v2106_v33 = vmul.f32 %v3256_v2, %v2105_v23 }
0x128a   :  { %3263 = vrcp.f32 %v1923_v44  ;;  %v1935_v60 = vand.u32 2147483648, %v1923_v44  ;;  %vm1929_vm7 = vweird.f32 %v1923_v44  ;;  %v1933_v51 = vand.u32 2147483647, %v1923_v44 }
0x128b   :  { %1945 = vrot.lane.b32.xlu2 %v1943_v28, %s3605_s28  ;;  %v2107_v37 = vadd.f32 %v3256_v2, %v2106_v33  ;;  %3265 = vpow2.f32 %v3050_v48 }
0x128c   :  { %v1936_v55 = vor.u32 1.1754944e-38, %v1935_v60  ;;  %vm1934_vm14 = vcmp.eq.f32.partialorder %v1933_v51, 8.507059e+37 }
0x128d   :  { %v2111_v39 = vsel %vm2110_vm9, %v3256_v2, %v2107_v37 }
0x128e   :  { %v2116_v40 = vsel %vm2113_vm10, %v2115_v38, %v2111_v39 }
0x128f   :  { %v2139_v41 = vmul.f32 %v3260_v6, %v2116_v40  ;;  %v2138_v5 = vmul.f32 0.0, %v2116_v40 }
0x1290   :  { %v3264_v45 = vpop.eup %3263 }
0x1291   :  { %2141 = vrot.lane.b32.xlu1 %v2139_v41, %s3605_s28  ;;  %v1925_v47 = vmul.f32 %v3264_v45, %v1923_v44  ;;  %vm1930_vm11 = vweird.f32 %v3264_v45 }
0x1292   :  { %vm1931_vm13 = vmor %vm1929_vm7, %vm1930_vm11 }
0x1293   :  { %1841 = vrot.lane.b32.xlu2 %v4234_v24, %s3605_s28  ;;  %v1926_v46 = vsub.f32 1.0, %v1925_v47  ;;  %v3266_v24 = vpop.eup %3265 }
0x1294   :  { %v2122_v57 = vadd.f32 1.0, %v3266_v24 }
0x1295   :  { %v1927_v49 = vmul.f32 %v3264_v45, %v1926_v46 }
0x1296   :  { %v2134_v17 = vand.u32 2147483648, %v2122_v57  ;;  %vm2128_vm2 = vweird.f32 %v2122_v57  ;;  %v2132_v18 = vand.u32 2147483647, %v2122_v57 }
0x1297   :  { %v1928_v52 = vadd.f32 %v3264_v45, %v1927_v49  ;;  %v2153_v49 = vld [vmem:[#allocation2] sm:$0xc] }
0x1298   :  { %v2135_v20 = vor.u32 1.1754944e-38, %v2134_v17  ;;  %vm2133_vm6 = vcmp.eq.f32.partialorder %v2132_v18, 8.507059e+37 }
0x1299   :  { %v1932_v54 = vsel %vm1931_vm13, %v3264_v45, %v1928_v52 }
0x129a   :  { %v1937_v61 = vsel %vm1934_vm14, %v1936_v55, %v1932_v54 }
0x12e5   :  { %v1946_v50 = vpop.permute.xlu2 %1945 }
0x12e6   :  { %v1948_v53 = vadd.f32 %v1946_v50, %v1942_v32 }
0x12e8   :  { %3267 = vtanh.f32 %v1948_v53 }
0x12e9   :  { %3269 = vrcp.f32 %v2122_v57 }
0x12ed   :  { %v1842_v58 = vpop.permute.xlu2 %1841 }
0x12ee   :  { %v3268_v59 = vpop.eup %3267  ;;  %1844 = vst.msk [vmem:[#allocation3 + $0x8] sm:$0x30] %vm1407_vm3, %v1842_v58 }
0x12ef   :  { %v1950_v62 = vmul.f32 %v3268_v59, %v1937_v61  ;;  %v3270_v63 = vpop.eup %3269 }
0x12f0   :  { %v2124_v0 = vmul.f32 %v3270_v63, %v2122_v57  ;;  %vm2129_vm0 = vweird.f32 %v3270_v63 }
0x12f1   :  { %1952 = vrot.lane.b32.xlu1 %v1950_v62, %s3605_s28  ;;  %vm2130_vm5 = vmor %vm2128_vm2, %vm2129_vm0 }
0x12f2   :  { %v2125_v14 = vsub.f32 1.0, %v2124_v0 }
0x12f4   :  { %v2126_v2 = vmul.f32 %v3270_v63, %v2125_v14 }
0x12f6   :  { %v2127_v16 = vadd.f32 %v3270_v63, %v2126_v2 }
0x12f8   :  { %v2131_v19 = vsel %vm2130_vm5, %v3270_v63, %v2127_v16 }
0x12f9   :  { %v2136_v28 = vsel %vm2133_vm6, %v2135_v20, %v2131_v19 }
0x1303   :  { %v2142_v9 = vpop.permute.xlu1 %2141 }
0x1304   :  { %v4343_v15 = vadd.f32 %v2142_v9, %v2138_v5 }
0x1306   :  { %3271 = vtanh.f32 %v4343_v15  ;;  %v2244_v54 = vrot.slane %v4343_v15, 6 }
0x130c   :  { %v3272_v23 = vpop.eup %3271 }
0x130d   :  { %v2146_v22 = vmul.f32 %v3272_v23, %v2136_v28 }
0x130f   :  { %2148 = vrot.lane.b32.xlu0 %v2146_v22, %s3605_s28 }
0x1363   :  { %v1953_v32 = vpop.permute.xlu1 %1952 }
0x1364   :  { %1955 = vst.msk [vmem:[#allocation3 + $0x8] sm:$0xc0] %vm1519_vm12, %v1953_v32 }
0x136b   :  { %v1957_v33 = vld [vmem:[#allocation3 + $0x8] sm:$0xff] }
0x136c   :  { %3046 = vmatmul.msk.f32.gmra.mxu1 %vm418_vm15, %v1957_v33  ;;  %3048 = vmatmul.msk.f32.gmra.mxu2 %vm418_vm15, %v1957_v33 }
0x1381   :  { %v2149_v36 = vpop.permute.xlu0 %2148 }
0x1382   :  { %2151 = vst.msk [vmem:[#allocation3] sm:$0x3] %vm1186_vm4, %v2149_v36  ;;  %3051 = vmatmul.msk.f32.vlgmr.msra.gmra.mxu1 %vm418_vm15, %v2149_v36  ;;  %3052 = vmatmul.msk.f32.vlgmr.msra.gmra.mxu2 %vm418_vm15, %v2149_v36 }
0x1383   :  { %2599 = vmatpush.msra.mxu1 %v4197_v3  ;;  %2619 = vmatpush.msra.mxu2 %v4199_v4 }
0x1385   :  { %2600 = vmatpush.msra.mxu1 %v4201_v7  ;;  %2620 = vmatpush.msra.mxu2 %v4205_v8 }
0x1387   :  { %2601 = vmatpush.msra.mxu1 %v4207_v11  ;;  %2621 = vmatpush.msra.mxu2 %v4209_v13 }
0x1389   :  { %2602 = vmatpush.msra.mxu1 %v4215_v1  ;;  %2622 = vmatpush.msra.mxu2 %v4217_v56 }
0x138b   :  { %2603 = vmatpush.msra.mxu1 %v4242_v29  ;;  %2623 = vmatpush.msra.mxu2 %v4244_v12 }
0x138d   :  { %2604 = vmatpush.msra.mxu1 %v4246_v25  ;;  %2624 = vmatpush.msra.mxu2 %v4250_v26 }
0x138f   :  { %2605 = vmatpush.msra.mxu1 %v4252_v27  ;;  %2625 = vmatpush.msra.mxu2 %v4254_v30 }
0x1391   :  { %2606 = vmatpush.msra.mxu1 %v4260_v10  ;;  %2626 = vmatpush.msra.mxu2 %v4262_v31 }
0x13e9   :  { %v2008_v37 = vpop.f32.mrf.mxu1 }
0x13ea   :  { %v2009_v38 = vadd.f32 %v2008_v37, %v1978_v35 }
0x13ec   :  { %2036 = vst [vmem:[#allocation2 + $0x18] sm:$0xff] %v2009_v38 }
0x13ef   :  { %v2031_v39 = vpop.f32.mrf.mxu2 }
0x13f0   :  { %v2032_v6 = vadd.f32 %v2031_v39, %v1979_v21  ;;  %v2260_v39 = vld [vmem:[#allocation2 + $0x10] sm:$0x30] }
0x13f2   :  { %2037 = vst [vmem:[#allocation2 + $0x8] sm:$0xff] %v2032_v6 }
0x13ff   :  { %v2173_v40 = vpop.f32.mrf.mxu1 }
0x1400   :  { %v2198_v41 = vrot.slane %v2173_v40, 6 }
0x1402   :  { %v2202_v43 = vadd.f32 %v2198_v41, %v2152_v42 }
0x1404   :  { %v3053_v44 = vmul.f32 -1.442695, %v2202_v43 }
0x1405   :  { %v2193_v46 = vpop.f32.mrf.mxu2 }
0x1406   :  { %3273 = vpow2.f32 %v3053_v44  ;;  %v2199_v48 = vrot.slane %v2193_v46, 6 }
0x1408   :  { %v2203_v35 = vadd.f32 %v2199_v48, %v2153_v49 }
0x140a   :  { %v3054_v62 = vmul.f32 -1.442695, %v2203_v35 }
0x140c   :  { %v3274_v45 = vpop.eup %3273 }
0x140d   :  { %v2207_v47 = vadd.f32 1.0, %v3274_v45  ;;  %v2261_v45 = vld [vmem:[#allocation2] sm:$0x30] }
0x140f   :  { %3275 = vrcp.f32 %v2207_v47  ;;  %v2219_v34 = vand.u32 2147483648, %v2207_v47  ;;  %v2217_v60 = vand.u32 2147483647, %v2207_v47  ;;  %vm2213_vm9 = vweird.f32 %v2207_v47 }
0x1410   :  { %3277 = vtanh.f32 %v2203_v35 }
0x1411   :  { %v2220_v24 = vor.u32 1.1754944e-38, %v2219_v34  ;;  %vm2218_vm11 = vcmp.eq.f32.partialorder %v2217_v60, 8.507059e+37  ;;  %3279 = vpow2.f32 %v3054_v62 }
0x1415   :  { %v3276_v50 = vpop.eup %3275 }
0x1416   :  { %v2209_v53 = vmul.f32 %v3276_v50, %v2207_v47  ;;  %vm2214_vm8 = vweird.f32 %v3276_v50  ;;  %v3278_v57 = vpop.eup %3277 }
0x1417   :  { %vm2215_vm10 = vmor %vm2213_vm9, %vm2214_vm8  ;;  %v3280_v63 = vpop.eup %3279 }
0x1418   :  { %v2210_v52 = vsub.f32 1.0, %v2209_v53  ;;  %v2227_v0 = vadd.f32 1.0, %v3280_v63 }
0x141a   :  { %v2211_v21 = vmul.f32 %v3276_v50, %v2210_v52  ;;  %3281 = vrcp.f32 %v2227_v0  ;;  %v2239_v18 = vand.u32 2147483648, %v2227_v0  ;;  %vm2233_vm13 = vweird.f32 %v2227_v0 }
0x141b   :  { %v2237_v19 = vand.u32 2147483647, %v2227_v0 }
0x141c   :  { %v2212_v51 = vadd.f32 %v3276_v50, %v2211_v21  ;;  %v2240_v23 = vor.u32 1.1754944e-38, %v2239_v18 }
0x141d   :  { %vm2238_vm0 = vcmp.eq.f32.partialorder %v2237_v19, 8.507059e+37 }
0x141e   :  { %v2216_v55 = vsel %vm2215_vm10, %v3276_v50, %v2212_v51 }
0x141f   :  { %v2221_v58 = vsel %vm2218_vm11, %v2220_v24, %v2216_v55 }
0x1420   :  { %v2247_v59 = vmul.f32 %v3278_v57, %v2221_v58  ;;  %v2246_v61 = vmul.f32 %v2244_v54, %v2221_v58  ;;  %v3282_v14 = vpop.eup %3281 }
0x1421   :  { %v2229_v2 = vmul.f32 %v3282_v14, %v2227_v0  ;;  %vm2234_vm7 = vweird.f32 %v3282_v14 }
0x1422   :  { %2249 = vrot.lane.b32.xlu2 %v2247_v59, %s3605_s28  ;;  %vm2235_vm14 = vmor %vm2233_vm13, %vm2234_vm7 }
0x1423   :  { %v2230_v5 = vsub.f32 1.0, %v2229_v2 }
0x1425   :  { %v2231_v9 = vmul.f32 %v3282_v14, %v2230_v5 }
0x1427   :  { %v2232_v15 = vadd.f32 %v3282_v14, %v2231_v9 }
0x1429   :  { %v2236_v20 = vsel %vm2235_vm14, %v3282_v14, %v2232_v15 }
0x142a   :  { %v2241_v22 = vsel %vm2238_vm0, %v2240_v23, %v2236_v20 }
0x147c   :  { %v2250_v16 = vpop.permute.xlu2 %2249 }
0x147d   :  { %v4375_v17 = vadd.f32 %v2250_v16, %v2246_v61 }
0x147f   :  { %3283 = vtanh.f32 %v4375_v17  ;;  %v2355_v21 = vrot.slane %v4375_v17, 6 }
0x1485   :  { %v3284_v28 = vpop.eup %3283 }
0x1486   :  { %v4378_v32 = vmul.f32 %v3284_v28, %v2241_v22 }
0x1488   :  { %v2262_v33 = vrot.slane %v4378_v32, 2 }
0x148a   :  { %2263 = vrot.lane.b32.xlu1 %v2262_v33, %s3605_s28 }
0x14fc   :  { %v2264_v36 = vpop.permute.xlu1 %2263 }
0x14fd   :  { %3055 = vmatmul.msk.f32.vlgmr.msra.gmra.mxu0 %vm418_vm15, %v2264_v36  ;;  %3056 = vmatmul.msk.f32.vlgmr.msra.gmra.mxu3 %vm418_vm15, %v2264_v36 }
0x14fe   :  { %2710 = vmatpush.msra.mxu0 %v4197_v3  ;;  %2730 = vmatpush.msra.mxu3 %v4199_v4 }
0x1500   :  { %2711 = vmatpush.msra.mxu0 %v4201_v7  ;;  %2731 = vmatpush.msra.mxu3 %v4205_v8 }
0x1502   :  { %2712 = vmatpush.msra.mxu0 %v4207_v11  ;;  %2732 = vmatpush.msra.mxu3 %v4209_v13 }
0x1504   :  { %2713 = vmatpush.msra.mxu0 %v4215_v1  ;;  %2733 = vmatpush.msra.mxu3 %v4217_v56 }
0x1506   :  { %2714 = vmatpush.msra.mxu0 %v4242_v29  ;;  %2734 = vmatpush.msra.mxu3 %v4244_v12 }
0x1508   :  { %2715 = vmatpush.msra.mxu0 %v4246_v25  ;;  %2735 = vmatpush.msra.mxu3 %v4250_v26 }
0x150a   :  { %2716 = vmatpush.msra.mxu0 %v4252_v27  ;;  %2736 = vmatpush.msra.mxu3 %v4254_v30 }
0x150c   :  { %2717 = vmatpush.msra.mxu0 %v4260_v10  ;;  %2737 = vmatpush.msra.mxu3 %v4262_v31 }
0x157a   :  { %v2284_v37 = vpop.f32.mrf.mxu0 }
0x157b   :  { %v2309_v38 = vrot.slane %v2284_v37, 4 }
0x157d   :  { %v2313_v6 = vadd.f32 %v2309_v38, %v2260_v39 }
0x157f   :  { %v3057_v40 = vmul.f32 -1.442695, %v2313_v6 }
0x1580   :  { %v2304_v43 = vpop.f32.mrf.mxu3 }
0x1581   :  { %3285 = vpow2.f32 %v3057_v40  ;;  %v2310_v44 = vrot.slane %v2304_v43, 4 }
0x1583   :  { %v2314_v46 = vadd.f32 %v2310_v44, %v2261_v45 }
0x1585   :  { %v3058_v57 = vmul.f32 -1.442695, %v2314_v46 }
0x1587   :  { %v3286_v41 = vpop.eup %3285 }
0x1588   :  { %v2318_v42 = vadd.f32 1.0, %v3286_v41 }
0x158a   :  { %3287 = vrcp.f32 %v2318_v42  ;;  %v2330_v50 = vand.u32 2147483648, %v2318_v42  ;;  %v2328_v53 = vand.u32 2147483647, %v2318_v42  ;;  %vm2324_vm5 = vweird.f32 %v2318_v42 }
0x158b   :  { %3289 = vtanh.f32 %v2314_v46 }
0x158c   :  { %v2331_v34 = vor.u32 1.1754944e-38, %v2330_v50  ;;  %vm2329_vm8 = vcmp.eq.f32.partialorder %v2328_v53, 8.507059e+37  ;;  %3291 = vpow2.f32 %v3058_v57  ;;  %v2482_v57 = vld [vmem:[#allocation2 + $0x18] sm:$0x3] }
0x1590   :  { %v3288_v47 = vpop.eup %3287 }
0x1591   :  { %v2320_v48 = vmul.f32 %v3288_v47, %v2318_v42  ;;  %vm2325_vm2 = vweird.f32 %v3288_v47  ;;  %v3290_v51 = vpop.eup %3289 }
0x1592   :  { %vm2326_vm6 = vmor %vm2324_vm5, %vm2325_vm2  ;;  %v3292_v58 = vpop.eup %3291 }
0x1593   :  { %v2321_v49 = vsub.f32 1.0, %v2320_v48  ;;  %v2338_v59 = vadd.f32 1.0, %v3292_v58 }
0x1595   :  { %v2322_v35 = vmul.f32 %v3288_v47, %v2321_v49  ;;  %3293 = vrcp.f32 %v2338_v59  ;;  %v2350_v9 = vand.u32 2147483648, %v2338_v59  ;;  %vm2344_vm10 = vweird.f32 %v2338_v59 }
0x1596   :  { %v2348_v16 = vand.u32 2147483647, %v2338_v59 }
0x1597   :  { %v2323_v52 = vadd.f32 %v3288_v47, %v2322_v35  ;;  %v2351_v15 = vor.u32 1.1754944e-38, %v2350_v9 }
0x1598   :  { %vm2349_vm7 = vcmp.eq.f32.partialorder %v2348_v16, 8.507059e+37 }
0x1599   :  { %v2327_v60 = vsel %vm2326_vm6, %v3288_v47, %v2323_v52 }
0x159a   :  { %v2332_v24 = vsel %vm2329_vm8, %v2331_v34, %v2327_v60 }
0x159b   :  { %v2358_v54 = vmul.f32 %v3290_v51, %v2332_v24  ;;  %v2357_v55 = vmul.f32 %v2355_v21, %v2332_v24  ;;  %v3294_v61 = vpop.eup %3293 }
0x159c   :  { %v2340_v62 = vmul.f32 %v3294_v61, %v2338_v59  ;;  %vm2345_vm9 = vweird.f32 %v3294_v61 }
0x159d   :  { %2360 = vrot.lane.b32.xlu0 %v2358_v54, %s3605_s28  ;;  %vm2346_vm11 = vmor %vm2344_vm10, %vm2345_vm9 }
0x159e   :  { %v2341_v63 = vsub.f32 1.0, %v2340_v62 }
0x15a0   :  { %v2342_v0 = vmul.f32 %v3294_v61, %v2341_v63 }
0x15a2   :  { %v2343_v5 = vadd.f32 %v3294_v61, %v2342_v0 }
0x15a4   :  { %v2347_v17 = vsel %vm2346_vm11, %v3294_v61, %v2343_v5 }
0x15a5   :  { %v2352_v19 = vsel %vm2349_vm7, %v2351_v15, %v2347_v17 }
0x160f   :  { %v2361_v14 = vpop.permute.xlu0 %2360 }
0x1610   :  { %v4402_v2 = vadd.f32 %v2361_v14, %v2357_v55  ;;  %v2483_v14 = vld [vmem:[#allocation2 + $0x8] sm:$0x3] }
0x1612   :  { %3295 = vtanh.f32 %v4402_v2  ;;  %v2466_v37 = vrot.slane %v4402_v2, 6 }
0x1618   :  { %v3296_v18 = vpop.eup %3295 }
0x1619   :  { %v4405_v20 = vmul.f32 %v3296_v18, %v2352_v19 }
0x161b   :  { %v2373_v23 = vrot.slane %v4405_v20, 4 }
0x161d   :  { %2374 = vrot.lane.b32.xlu2 %v2373_v23, %s3605_s28 }
0x1677   :  { %v2375_v28 = vpop.permute.xlu2 %2374 }
0x1678   :  { %3059 = vmatmul.msk.f32.vlgmr.msrb.gmra.mxu1 %vm418_vm15, %v2375_v28  ;;  %3060 = vmatmul.msk.f32.vlgmr.msrb.gmra.mxu2 %vm418_vm15, %v2375_v28 }
0x1679   :  { %2821 = vmatpush.msrb.mxu1 %v4197_v3  ;;  %2841 = vmatpush.msrb.mxu2 %v4199_v4 }
0x167b   :  { %2822 = vmatpush.msrb.mxu1 %v4201_v7  ;;  %2842 = vmatpush.msrb.mxu2 %v4205_v8  ;;  %v2371_v7 = vld [vmem:[#allocation2 + $0x10] sm:$0xc0] }
0x167d   :  { %2823 = vmatpush.msrb.mxu1 %v4207_v11  ;;  %2843 = vmatpush.msrb.mxu2 %v4209_v13 }
0x167f   :  { %2824 = vmatpush.msrb.mxu1 %v4215_v1  ;;  %2844 = vmatpush.msrb.mxu2 %v4217_v56 }
0x1681   :  { %2825 = vmatpush.msrb.mxu1 %v4242_v29  ;;  %2845 = vmatpush.msrb.mxu2 %v4244_v12  ;;  %v2372_v12 = vld [vmem:[#allocation2] sm:$0xc0] }
0x1683   :  { %2826 = vmatpush.msrb.mxu1 %v4246_v25  ;;  %2846 = vmatpush.msrb.mxu2 %v4250_v26 }
0x1685   :  { %2827 = vmatpush.msrb.mxu1 %v4252_v27  ;;  %2847 = vmatpush.msrb.mxu2 %v4254_v30 }
0x1687   :  { %2828 = vmatpush.msrb.mxu1 %v4260_v10  ;;  %2848 = vmatpush.msrb.mxu2 %v4262_v31 }
0x16f5   :  { %v2395_v3 = vpop.f32.mrf.mxu1 }
0x16f6   :  { %v2420_v4 = vrot.slane %v2395_v3, 2 }
0x16f8   :  { %v2424_v8 = vadd.f32 %v2420_v4, %v2371_v7 }
0x16fa   :  { %v3061_v11 = vmul.f32 -1.442695, %v2424_v8 }
0x16fb   :  { %v2415_v56 = vpop.f32.mrf.mxu2 }
0x16fc   :  { %3297 = vpow2.f32 %v3061_v11  ;;  %v2421_v29 = vrot.slane %v2415_v56, 2 }
0x16fe   :  { %v2425_v26 = vadd.f32 %v2421_v29, %v2372_v12 }
0x1700   :  { %v3062_v42 = vmul.f32 -1.442695, %v2425_v26 }
0x1702   :  { %v3298_v13 = vpop.eup %3297 }
0x1703   :  { %v2429_v1 = vadd.f32 1.0, %v3298_v13 }
0x1705   :  { %3299 = vrcp.f32 %v2429_v1  ;;  %v2441_v10 = vand.u32 2147483648, %v2429_v1  ;;  %v2439_v31 = vand.u32 2147483647, %v2429_v1  ;;  %vm2435_vm14 = vweird.f32 %v2429_v1 }
0x1706   :  { %3301 = vtanh.f32 %v2425_v26 }
0x1707   :  { %v2442_v36 = vor.u32 1.1754944e-38, %v2441_v10  ;;  %vm2440_vm2 = vcmp.eq.f32.partialorder %v2439_v31, 8.507059e+37  ;;  %3303 = vpow2.f32 %v3062_v42  ;;  %v2587_v42 = vld [vmem:[#allocation2 + $0x18] sm:$0xc] }
0x170b   :  { %v3300_v25 = vpop.eup %3299 }
0x170c   :  { %v2431_v27 = vmul.f32 %v3300_v25, %v2429_v1  ;;  %vm2436_vm13 = vweird.f32 %v3300_v25  ;;  %v3302_v39 = vpop.eup %3301 }
0x170d   :  { %vm2437_vm0 = vmor %vm2435_vm14, %vm2436_vm13  ;;  %v3304_v43 = vpop.eup %3303 }
0x170e   :  { %v2432_v30 = vsub.f32 1.0, %v2431_v27  ;;  %v2449_v44 = vadd.f32 1.0, %v3304_v43 }
0x1710   :  { %v2433_v22 = vmul.f32 %v3300_v25, %v2432_v30  ;;  %3305 = vrcp.f32 %v2449_v44  ;;  %v2461_v53 = vand.u32 2147483648, %v2449_v44  ;;  %vm2455_vm6 = vweird.f32 %v2449_v44 }
0x1711   :  { %v2459_v52 = vand.u32 2147483647, %v2449_v44 }
0x1712   :  { %v2434_v33 = vadd.f32 %v3300_v25, %v2433_v22  ;;  %v2462_v21 = vor.u32 1.1754944e-38, %v2461_v53 }
0x1713   :  { %vm2460_vm9 = vcmp.eq.f32.partialorder %v2459_v52, 8.507059e+37 }
0x1714   :  { %v2438_v38 = vsel %vm2437_vm0, %v3300_v25, %v2434_v33 }
0x1715   :  { %v2443_v6 = vsel %vm2440_vm2, %v2442_v36, %v2438_v38 }
0x1716   :  { %v2469_v40 = vmul.f32 %v3302_v39, %v2443_v6  ;;  %v2468_v41 = vmul.f32 %v2466_v37, %v2443_v6  ;;  %v3306_v45 = vpop.eup %3305 }
0x1717   :  { %v2451_v47 = vmul.f32 %v3306_v45, %v2449_v44  ;;  %vm2456_vm5 = vweird.f32 %v3306_v45 }
0x1718   :  { %2471 = vrot.lane.b32.xlu1 %v2469_v40, %s3605_s28  ;;  %vm2457_vm8 = vmor %vm2455_vm6, %vm2456_vm5 }
0x1719   :  { %v2452_v46 = vsub.f32 1.0, %v2451_v47 }
0x171b   :  { %v2453_v48 = vmul.f32 %v3306_v45, %v2452_v46 }
0x171d   :  { %v2454_v35 = vadd.f32 %v3306_v45, %v2453_v48 }
0x171f   :  { %v2458_v34 = vsel %vm2457_vm8, %v3306_v45, %v2454_v35 }
0x1720   :  { %v2463_v51 = vsel %vm2460_vm9, %v2462_v21, %v2458_v34 }
0x178a   :  { %v2472_v49 = vpop.permute.xlu1 %2471 }
0x178b   :  { %v2474_v50 = vadd.f32 %v2472_v49, %v2468_v41  ;;  %v2588_v49 = vld [vmem:[#allocation2 + $0x8] sm:$0xc] }
0x178d   :  { %3307 = vtanh.f32 %v2474_v50  ;;  %v2571_v28 = vrot.slane %v2474_v50, 6 }
0x1793   :  { %v3308_v60 = vpop.eup %3307 }
0x1794   :  { %v4429_v24 = vmul.f32 %v3308_v60, %v2463_v51 }
0x1796   :  { %v2484_v54 = vrot.slane %v4429_v24, 6 }
0x1798   :  { %2485 = vrot.lane.b32.xlu0 %v2484_v54, %s3605_s28 }
0x180a   :  { %v2486_v55 = vpop.permute.xlu0 %2485 }
0x180b   :  { %3063 = vmatmul.msk.f32.vlgmr.msrb.gmra.mxu0 %vm418_vm15, %v2486_v55  ;;  %3064 = vmatmul.msk.f32.vlgmr.msrb.gmra.mxu3 %vm418_vm15, %v2486_v55 }
0x1888   :  { %v2506_v58 = vpop.f32.mrf.mxu0 }
0x1889   :  { %v2529_v59 = vadd.f32 %v2506_v58, %v2482_v57 }
0x188b   :  { %v3065_v61 = vmul.f32 -1.442695, %v2529_v59 }
0x188d   :  { %3309 = vpow2.f32 %v3065_v61 }
0x188e   :  { %v2526_v0 = vpop.f32.mrf.mxu3 }
0x188f   :  { %v2530_v5 = vadd.f32 %v2526_v0, %v2483_v14 }
0x1891   :  { %v3066_v13 = vmul.f32 -1.442695, %v2530_v5 }
0x1893   :  { %v3310_v62 = vpop.eup %3309 }
0x1894   :  { %v2534_v63 = vadd.f32 1.0, %v3310_v62 }
0x1896   :  { %3311 = vrcp.f32 %v2534_v63  ;;  %v2546_v17 = vand.u32 2147483648, %v2534_v63  ;;  %v2544_v18 = vand.u32 2147483647, %v2534_v63  ;;  %vm2540_vm11 = vweird.f32 %v2534_v63 }
0x1897   :  { %3313 = vtanh.f32 %v2530_v5 }
0x1898   :  { %v2547_v23 = vor.u32 1.1754944e-38, %v2546_v17  ;;  %vm2545_vm13 = vcmp.eq.f32.partialorder %v2544_v18, 8.507059e+37  ;;  %3315 = vpow2.f32 %v3066_v13 }
0x189c   :  { %v3312_v2 = vpop.eup %3311 }
0x189d   :  { %v2536_v9 = vmul.f32 %v3312_v2, %v2534_v63  ;;  %vm2541_vm10 = vweird.f32 %v3312_v2  ;;  %v3314_v4 = vpop.eup %3313 }
0x189e   :  { %vm2542_vm7 = vmor %vm2540_vm11, %vm2541_vm10  ;;  %v3316_v1 = vpop.eup %3315 }
0x189f   :  { %v2537_v16 = vsub.f32 1.0, %v2536_v9  ;;  %v2554_v56 = vadd.f32 1.0, %v3316_v1 }
0x18a1   :  { %v2538_v15 = vmul.f32 %v3312_v2, %v2537_v16  ;;  %3317 = vrcp.f32 %v2554_v56  ;;  %v2566_v22 = vand.u32 2147483648, %v2554_v56  ;;  %vm2560_vm0 = vweird.f32 %v2554_v56 }
0x18a2   :  { %v2564_v31 = vand.u32 2147483647, %v2554_v56 }
0x18a3   :  { %v2539_v19 = vadd.f32 %v3312_v2, %v2538_v15  ;;  %v2567_v36 = vor.u32 1.1754944e-38, %v2566_v22  ;;  %v2696_v22 = vld [vmem:[#allocation2 + $0x8] sm:$0x30] }
0x18a4   :  { %vm2565_vm5 = vcmp.eq.f32.partialorder %v2564_v31, 8.507059e+37 }
0x18a5   :  { %v2543_v3 = vsel %vm2542_vm7, %v3312_v2, %v2539_v19 }
0x18a6   :  { %v2548_v7 = vsel %vm2545_vm13, %v2547_v23, %v2543_v3 }
0x18a7   :  { %v2574_v8 = vmul.f32 %v3314_v4, %v2548_v7  ;;  %v2573_v11 = vmul.f32 %v2571_v28, %v2548_v7  ;;  %v3318_v29 = vpop.eup %3317 }
0x18a8   :  { %v2556_v12 = vmul.f32 %v3318_v29, %v2554_v56  ;;  %vm2561_vm14 = vweird.f32 %v3318_v29 }
0x18a9   :  { %2576 = vrot.lane.b32.xlu2 %v2574_v8, %s3605_s28  ;;  %vm2562_vm2 = vmor %vm2560_vm0, %vm2561_vm14 }
0x18aa   :  { %v2557_v25 = vsub.f32 1.0, %v2556_v12 }
0x18ac   :  { %v2558_v26 = vmul.f32 %v3318_v29, %v2557_v25 }
0x18ae   :  { %v2559_v10 = vadd.f32 %v3318_v29, %v2558_v26 }
0x18b0   :  { %v2563_v33 = vsel %vm2562_vm2, %v3318_v29, %v2559_v10  ;;  %v2695_v29 = vld [vmem:[#allocation2 + $0x18] sm:$0x30] }
0x18b1   :  { %v2568_v38 = vsel %vm2565_vm5, %v2567_v36, %v2563_v33 }
0x1903   :  { %v2577_v27 = vpop.permute.xlu2 %2576 }
0x1904   :  { %v2579_v30 = vadd.f32 %v2577_v27, %v2573_v11 }
0x1906   :  { %3319 = vtanh.f32 %v2579_v30  ;;  %v2679_v55 = vrot.slane %v2579_v30, 6 }
0x190c   :  { %v3320_v37 = vpop.eup %3319 }
0x190d   :  { %v2581_v39 = vmul.f32 %v3320_v37, %v2568_v38 }
0x190f   :  { %2583 = vrot.lane.b32.xlu1 %v2581_v39, %s3605_s28 }
0x1981   :  { %v2584_v6 = vpop.permute.xlu1 %2583 }
0x1982   :  { %2586 = vst.msk [vmem:[#allocation3 + $0x8] sm:$0x3] %vm1186_vm4, %v2584_v6  ;;  %3067 = vmatmul.msk.f32.vlgmr.msra.gmra.mxu1 %vm418_vm15, %v2584_v6  ;;  %3068 = vmatmul.msk.f32.vlgmr.msra.gmra.mxu2 %vm418_vm15, %v2584_v6 }
0x19ff   :  { %v2608_v40 = vpop.f32.mrf.mxu1 }
0x1a00   :  { %v2633_v41 = vrot.slane %v2608_v40, 6 }
0x1a02   :  { %v2637_v43 = vadd.f32 %v2633_v41, %v2587_v42 }
0x1a04   :  { %v3069_v44 = vmul.f32 -1.442695, %v2637_v43 }
0x1a05   :  { %v2628_v46 = vpop.f32.mrf.mxu2 }
0x1a06   :  { %3321 = vpow2.f32 %v3069_v44  ;;  %v2634_v48 = vrot.slane %v2628_v46, 6 }
0x1a08   :  { %v2638_v35 = vadd.f32 %v2634_v48, %v2588_v49 }
0x1a0a   :  { %v3070_v63 = vmul.f32 -1.442695, %v2638_v35 }
0x1a0c   :  { %v3322_v45 = vpop.eup %3321 }
0x1a0d   :  { %v2642_v47 = vadd.f32 1.0, %v3322_v45 }
0x1a0f   :  { %3323 = vrcp.f32 %v2642_v47  ;;  %v2654_v34 = vand.u32 2147483648, %v2642_v47  ;;  %v2652_v60 = vand.u32 2147483647, %v2642_v47  ;;  %vm2648_vm6 = vweird.f32 %v2642_v47 }
0x1a10   :  { %3325 = vtanh.f32 %v2638_v35 }
0x1a11   :  { %v2655_v54 = vor.u32 1.1754944e-38, %v2654_v34  ;;  %vm2653_vm9 = vcmp.eq.f32.partialorder %v2652_v60, 8.507059e+37  ;;  %3327 = vpow2.f32 %v3070_v63 }
0x1a15   :  { %v3324_v50 = vpop.eup %3323 }
0x1a16   :  { %v2644_v53 = vmul.f32 %v3324_v50, %v2642_v47  ;;  %vm2649_vm4 = vweird.f32 %v3324_v50  ;;  %v3326_v58 = vpop.eup %3325 }
0x1a17   :  { %vm2650_vm8 = vmor %vm2648_vm6, %vm2649_vm4  ;;  %v3328_v0 = vpop.eup %3327 }
0x1a18   :  { %v2645_v52 = vsub.f32 1.0, %v2644_v53  ;;  %v2662_v14 = vadd.f32 1.0, %v3328_v0 }
0x1a1a   :  { %v2646_v21 = vmul.f32 %v3324_v50, %v2645_v52  ;;  %3329 = vrcp.f32 %v2662_v14  ;;  %v2674_v19 = vand.u32 2147483648, %v2662_v14  ;;  %vm2668_vm11 = vweird.f32 %v2662_v14 }
0x1a1b   :  { %v2672_v23 = vand.u32 2147483647, %v2662_v14 }
0x1a1c   :  { %v2647_v51 = vadd.f32 %v3324_v50, %v2646_v21  ;;  %v2675_v3 = vor.u32 1.1754944e-38, %v2674_v19 }
0x1a1d   :  { %vm2673_vm13 = vcmp.eq.f32.partialorder %v2672_v23, 8.507059e+37 }
0x1a1e   :  { %v2651_v57 = vsel %vm2650_vm8, %v3324_v50, %v2647_v51 }
0x1a1f   :  { %v2656_v59 = vsel %vm2653_vm9, %v2655_v54, %v2651_v57 }
0x1a20   :  { %v2682_v61 = vmul.f32 %v3326_v58, %v2656_v59  ;;  %v2681_v62 = vmul.f32 %v2679_v55, %v2656_v59  ;;  %v3330_v2 = vpop.eup %3329 }
0x1a21   :  { %v2664_v5 = vmul.f32 %v3330_v2, %v2662_v14  ;;  %vm2669_vm10 = vweird.f32 %v3330_v2 }
0x1a22   :  { %2684 = vrot.lane.b32.xlu0 %v2682_v61, %s3605_s28  ;;  %vm2670_vm7 = vmor %vm2668_vm11, %vm2669_vm10 }
0x1a23   :  { %v2665_v9 = vsub.f32 1.0, %v2664_v5 }
0x1a25   :  { %v2666_v16 = vmul.f32 %v3330_v2, %v2665_v9 }
0x1a27   :  { %v2667_v18 = vadd.f32 %v3330_v2, %v2666_v16 }
0x1a29   :  { %v2671_v28 = vsel %vm2670_vm7, %v3330_v2, %v2667_v18 }
0x1a2a   :  { %v2676_v7 = vsel %vm2673_vm13, %v2675_v3, %v2671_v28  ;;  %v2807_v3 = vld [vmem:[#allocation2 + $0x8] sm:$0xc0] }
0x1a94   :  { %v2685_v17 = vpop.permute.xlu0 %2684 }
0x1a95   :  { %v2687_v15 = vadd.f32 %v2685_v17, %v2681_v62  ;;  %v2806_v17 = vld [vmem:[#allocation2 + $0x18] sm:$0xc0] }
0x1a97   :  { %3331 = vtanh.f32 %v2687_v15  ;;  %v2790_v42 = vrot.slane %v2687_v15, 6 }
0x1a9d   :  { %v3332_v4 = vpop.eup %3331 }
0x1a9e   :  { %v2689_v8 = vmul.f32 %v3332_v4, %v2676_v7 }
0x1aa0   :  { %v2697_v11 = vrot.slane %v2689_v8, 2 }
0x1aa2   :  { %2698 = vrot.lane.b32.xlu2 %v2697_v11, %s3605_s28 }
0x1afc   :  { %v2699_v13 = vpop.permute.xlu2 %2698 }
0x1afd   :  { %3071 = vmatmul.msk.f32.vlgmr.msra.gmra.mxu0 %vm418_vm15, %v2699_v13  ;;  %3072 = vmatmul.msk.f32.vlgmr.msra.gmra.mxu3 %vm418_vm15, %v2699_v13 }
0x1b7a   :  { %v2719_v1 = vpop.f32.mrf.mxu0 }
0x1b7b   :  { %v2744_v56 = vrot.slane %v2719_v1, 4 }
0x1b7d   :  { %v2748_v12 = vadd.f32 %v2744_v56, %v2695_v29 }
0x1b7f   :  { %v3073_v25 = vmul.f32 -1.442695, %v2748_v12 }
0x1b80   :  { %v2739_v30 = vpop.f32.mrf.mxu3 }
0x1b81   :  { %3333 = vpow2.f32 %v3073_v25  ;;  %v2745_v10 = vrot.slane %v2739_v30, 4 }
0x1b83   :  { %v2749_v33 = vadd.f32 %v2745_v10, %v2696_v22 }
0x1b85   :  { %v3074_v48 = vmul.f32 -1.442695, %v2749_v33 }
0x1b87   :  { %v3334_v26 = vpop.eup %3333 }
0x1b88   :  { %v2753_v27 = vadd.f32 1.0, %v3334_v26 }
0x1b8a   :  { %3335 = vrcp.f32 %v2753_v27  ;;  %v2765_v38 = vand.u32 2147483648, %v2753_v27  ;;  %v2763_v6 = vand.u32 2147483647, %v2753_v27  ;;  %vm2759_vm0 = vweird.f32 %v2753_v27 }
0x1b8b   :  { %3337 = vtanh.f32 %v2749_v33 }
0x1b8c   :  { %v2766_v41 = vor.u32 1.1754944e-38, %v2765_v38  ;;  %vm2764_vm5 = vcmp.eq.f32.partialorder %v2763_v6, 8.507059e+37  ;;  %3339 = vpow2.f32 %v3074_v48 }
0x1b90   :  { %v3336_v31 = vpop.eup %3335 }
0x1b91   :  { %v2755_v36 = vmul.f32 %v3336_v31, %v2753_v27  ;;  %vm2760_vm14 = vweird.f32 %v3336_v31  ;;  %v3338_v44 = vpop.eup %3337 }
0x1b92   :  { %vm2761_vm2 = vmor %vm2759_vm0, %vm2760_vm14  ;;  %v3340_v49 = vpop.eup %3339 }
0x1b93   :  { %v2756_v37 = vsub.f32 1.0, %v2755_v36  ;;  %v2773_v50 = vadd.f32 1.0, %v3340_v49 }
0x1b95   :  { %v2757_v39 = vmul.f32 %v3336_v31, %v2756_v37  ;;  %3341 = vrcp.f32 %v2773_v50  ;;  %v2785_v54 = vand.u32 2147483648, %v2773_v50  ;;  %vm2779_vm6 = vweird.f32 %v2773_v50 }
0x1b96   :  { %v2783_v55 = vand.u32 2147483647, %v2773_v50 }
0x1b97   :  { %v2758_v40 = vadd.f32 %v3336_v31, %v2757_v39  ;;  %v2786_v57 = vor.u32 1.1754944e-38, %v2785_v54  ;;  %v3142_v54 = vld [vmem:[#allocation4] ss:$0 sm:$0xff] }
0x1b98   :  { %vm2784_vm9 = vcmp.eq.f32.partialorder %v2783_v55, 8.507059e+37 }
0x1b99   :  { %v2762_v43 = vsel %vm2761_vm2, %v3336_v31, %v2758_v40  ;;  %vm2937_vm2 = vcmask 7168  }
0x1b9a   :  { %v2767_v45 = vsel %vm2764_vm5, %v2766_v41, %v2762_v43 }
0x1b9b   :  { %v2793_v47 = vmul.f32 %v3338_v44, %v2767_v45  ;;  %v2792_v46 = vmul.f32 %v2790_v42, %v2767_v45  ;;  %v3342_v35 = vpop.eup %3341 }
0x1b9c   :  { %v2775_v53 = vmul.f32 %v3342_v35, %v2773_v50  ;;  %vm2780_vm4 = vweird.f32 %v3342_v35  ;;  %v3141_v50 = vld [vmem:[%s3759_s19] ss:$0 sm:$0xff] }
0x1b9d   :  { %2795 = vrot.lane.b32.xlu1 %v2793_v47, %s3605_s28  ;;  %vm2781_vm8 = vmor %vm2779_vm6, %vm2780_vm4 }
0x1b9e   :  { %v2776_v52 = vsub.f32 1.0, %v2775_v53 }
0x1ba0   :  { %v2777_v34 = vmul.f32 %v3342_v35, %v2776_v52 }
0x1ba2   :  { %v2778_v51 = vadd.f32 %v3342_v35, %v2777_v34 }
0x1ba5   :  { %2256 = vrot.lane.b32.xlu1 %v4378_v32, %s3605_s28  ;;  %v2782_v32 = vsel %vm2781_vm8, %v3342_v35, %v2778_v51 }
0x1ba6   :  { %v2787_v61 = vsel %vm2784_vm9, %v2786_v57, %v2782_v32 }
0x1bad   :  { %2691 = vrot.lane.b32.xlu1 %v2689_v8, %s3605_s28 }
0x1c0f   :  { %v2796_v21 = vpop.permute.xlu1 %2795 }
0x1c10   :  { %v2798_v60 = vadd.f32 %v2796_v21, %v2792_v46 }
0x1c12   :  { %3343 = vtanh.f32 %v2798_v60  ;;  %v2901_v25 = vrot.slane %v2798_v60, 6 }
0x1c17   :  { %v2257_v58 = vpop.permute.xlu1 %2256 }
0x1c18   :  { %v3344_v59 = vpop.eup %3343  ;;  %2259 = vst.msk [vmem:[#allocation3] sm:$0xc] %vm1295_vm1, %v2257_v58 }
0x1c19   :  { %v2800_v62 = vmul.f32 %v3344_v59, %v2787_v61 }
0x1c1b   :  { %v2808_v63 = vrot.slane %v2800_v62, 4 }
0x1c1d   :  { %2809 = vrot.lane.b32.xlu0 %v2808_v63, %s3605_s28 }
0x1c1f   :  { %v2692_v0 = vpop.permute.xlu1 %2691 }
0x1c20   :  { %2694 = vst.msk [vmem:[#allocation3 + $0x8] sm:$0xc] %vm1295_vm1, %v2692_v0 }
0x1c25   :  { %2367 = vrot.lane.b32.xlu0 %v4405_v20, %s3605_s28 }
0x1c2d   :  { %2802 = vrot.lane.b32.xlu0 %v2800_v62, %s3605_s28 }
0x1c8f   :  { %v2810_v14 = vpop.permute.xlu0 %2809 }
0x1c90   :  { %3075 = vmatmul.msk.f32.vlgmr.msrb.gmra.mxu1 %vm418_vm15, %v2810_v14  ;;  %3076 = vmatmul.msk.f32.vlgmr.msrb.gmra.mxu2 %vm418_vm15, %v2810_v14 }
0x1c97   :  { %v2368_v2 = vpop.permute.xlu0 %2367 }
0x1c98   :  { %2370 = vst.msk [vmem:[#allocation3] sm:$0x30] %vm1407_vm3, %v2368_v2 }
0x1c9f   :  { %v2803_v5 = vpop.permute.xlu0 %2802 }
0x1ca0   :  { %2805 = vst.msk [vmem:[#allocation3 + $0x8] sm:$0x30] %vm1407_vm3, %v2803_v5 }
0x1d0d   :  { %v2830_v9 = vpop.f32.mrf.mxu1 }
0x1d0e   :  { %v2855_v16 = vrot.slane %v2830_v9, 2 }
0x1d10   :  { %v2859_v15 = vadd.f32 %v2855_v16, %v2806_v17 }
0x1d12   :  { %v3077_v18 = vmul.f32 -1.442695, %v2859_v15 }
0x1d13   :  { %v2850_v23 = vpop.f32.mrf.mxu2 }
0x1d14   :  { %3345 = vpow2.f32 %v3077_v18  ;;  %v2856_v28 = vrot.slane %v2850_v23, 2 }
0x1d16   :  { %v2860_v7 = vadd.f32 %v2856_v28, %v2807_v3 }
0x1d18   :  { %v3078_v31 = vmul.f32 -1.442695, %v2860_v7 }
0x1d1a   :  { %v3346_v20 = vpop.eup %3345 }
0x1d1b   :  { %v2864_v19 = vadd.f32 1.0, %v3346_v20 }
0x1d1d   :  { %3347 = vrcp.f32 %v2864_v19  ;;  %v2876_v13 = vand.u32 2147483648, %v2864_v19  ;;  %v2874_v56 = vand.u32 2147483647, %v2864_v19  ;;  %vm2870_vm3 = vweird.f32 %v2864_v19 }
0x1d1e   :  { %3349 = vtanh.f32 %v2860_v7 }
0x1d1f   :  { %v2877_v12 = vor.u32 1.1754944e-38, %v2876_v13  ;;  %vm2875_vm11 = vcmp.eq.f32.partialorder %v2874_v56, 8.507059e+37  ;;  %3351 = vpow2.f32 %v3078_v31 }
0x1d23   :  { %v3348_v4 = vpop.eup %3347 }
0x1d24   :  { %v2866_v8 = vmul.f32 %v3348_v4, %v2864_v19  ;;  %vm2871_vm1 = vweird.f32 %v3348_v4  ;;  %v3350_v27 = vpop.eup %3349 }
0x1d25   :  { %vm2872_vm10 = vmor %vm2870_vm3, %vm2871_vm1  ;;  %v3352_v33 = vpop.eup %3351 }
0x1d26   :  { %v2867_v11 = vsub.f32 1.0, %v2866_v8  ;;  %v2884_v36 = vadd.f32 1.0, %v3352_v33 }
0x1d28   :  { %v2868_v1 = vmul.f32 %v3348_v4, %v2867_v11  ;;  %3353 = vrcp.f32 %v2884_v36  ;;  %v2896_v43 = vand.u32 2147483648, %v2884_v36  ;;  %vm2890_vm13 = vweird.f32 %v2884_v36 }
0x1d29   :  { %v2894_v44 = vand.u32 2147483647, %v2884_v36 }
0x1d2a   :  { %v2869_v29 = vadd.f32 %v3348_v4, %v2868_v1  ;;  %v2897_v45 = vor.u32 1.1754944e-38, %v2896_v43 }
0x1d2b   :  { %vm2895_vm0 = vcmp.eq.f32.partialorder %v2894_v44, 8.507059e+37 }
0x1d2c   :  { %v2873_v26 = vsel %vm2872_vm10, %v3348_v4, %v2869_v29 }
0x1d2d   :  { %v2878_v30 = vsel %vm2875_vm11, %v2877_v12, %v2873_v26 }
0x1d2e   :  { %v2904_v10 = vmul.f32 %v3350_v27, %v2878_v30  ;;  %v2903_v22 = vmul.f32 %v2901_v25, %v2878_v30  ;;  %v3354_v37 = vpop.eup %3353 }
0x1d2f   :  { %v2886_v38 = vmul.f32 %v3354_v37, %v2884_v36  ;;  %vm2891_vm7 = vweird.f32 %v3354_v37 }
0x1d30   :  { %2906 = vrot.lane.b32.xlu2 %v2904_v10, %s3605_s28  ;;  %vm2892_vm14 = vmor %vm2890_vm13, %vm2891_vm7 }
0x1d31   :  { %v2887_v39 = vsub.f32 1.0, %v2886_v38 }
0x1d33   :  { %v2888_v6 = vmul.f32 %v3354_v37, %v2887_v39 }
0x1d35   :  { %v2889_v42 = vadd.f32 %v3354_v37, %v2888_v6 }
0x1d38   :  { %2478 = vrot.lane.b32.xlu2 %v4429_v24, %s3605_s28  ;;  %v2893_v24 = vsel %vm2892_vm14, %v3354_v37, %v2889_v42 }
0x1d39   :  { %v2898_v48 = vsel %vm2895_vm0, %v2897_v45, %v2893_v24 }
0x1d8a   :  { %v2907_v40 = vpop.permute.xlu2 %2906 }
0x1d8b   :  { %v2909_v41 = vadd.f32 %v2907_v40, %v2903_v22 }
0x1d8d   :  { %3355 = vtanh.f32 %v2909_v41 }
0x1d92   :  { %v2479_v47 = vpop.permute.xlu2 %2478 }
0x1d93   :  { %v3356_v46 = vpop.eup %3355  ;;  %2481 = vst.msk [vmem:[#allocation3] sm:$0xc0] %vm1519_vm12, %v2479_v47 }
0x1d94   :  { %v2911_v49 = vmul.f32 %v3356_v46, %v2898_v48 }
0x1d96   :  { %2913 = vrot.lane.b32.xlu2 %v2911_v49, %s3605_s28 }
0x1d9a   :  { %v2917_v35 = vld [vmem:[#allocation3] sm:$0xff] }
0x1d9b   :  { %v2923_v53 = vmul.f32 %v3141_v50, %v2917_v35 }
0x1d9d   :  { %v2925_v52 = vsel %vm418_vm15, %v2923_v53, 0.0 }
0x1d9e   :  { %2926 = vadd.xlane.f32.xlu1 %v2925_v52 }
0x1df0   :  { %v2914_v34 = vpop.permute.xlu2 %2913 }
0x1df1   :  { %2916 = vst.msk [vmem:[#allocation3 + $0x8] sm:$0xc0] %vm1519_vm12, %v2914_v34 }
0x1df8   :  { %v2918_v21 = vld [vmem:[#allocation3 + $0x8] sm:$0xff] }
0x1df9   :  { %v2924_v60 = vmul.f32 %v3141_v50, %v2918_v21 }
0x1dfb   :  { %v2928_v51 = vsel %vm418_vm15, %v2924_v60, 0.0 }
0x1dfc   :  { %2929 = vadd.xlane.f32.xlu0 %v2928_v51 }
0x1e11   :  { %v2927_v55 = vpop.xlane.xlu1 %2926 }
0x1e12   :  { %v2935_v32 = vadd.f32 %v3142_v54, %v2927_v55 }
0x1e14   :  { %2938 = vst.msk [vmem:[%s3767_s21] sm:$0xff] %vm2937_vm2, %v2935_v32 }
0x1e6f   :  { %v2930_v57 = vpop.xlane.xlu0 %2929 }
0x1e70   :  { %v2936_v58 = vadd.f32 %v3142_v54, %v2930_v57 }
0x1e72   :  { %2939 = vst.msk [vmem:[%s3767_s21 + $0x8] sm:$0xff] %vm2937_vm2, %v2936_v58 }
0x1e73   :  { %2944 = vsyncpa [#allocation6], 1 }
0x1e74   :  { %2945 = vsyncpa [#allocation8], 1 }
0x1e75   :  { %2946 = vsyncpa [#allocation11], 1 }
0x1e76   :  { %2947 = vsyncpa [#allocation14], 1 }
0x1e77   :  { %2948 = vsyncpa [#allocation17], 1 }

</bundles_post_ra>
